<compile_context>
chip_gen: v6e
topology: v6e:2x2x1
jax: 0.10.0
libtpu: 0.0.40
codegen_flags: <defaults>
</compile_context>

<pallas_src>
import functools

import jax
import jax.numpy as jnp
from jax import lax
from jax.experimental import pallas as pl
from jax.experimental.pallas import tpu as pltpu


# --------------------------------------------------------------------------
# Fused kernel: embedding gather + BiLSTM (both sentences) + attention-sum
# representation + merge + MLP + output + sigmoid.
# --------------------------------------------------------------------------
def fused_kernel(T, B2, H,
                 ids_ref,    # SMEM [2B, T] int32  token ids (kernel-row order)
                 proj_ref,   # VMEM [Vpad, 8H]     emb @ [Wih_f|Wih_b] + [b_f|b_b]
                 mupd_ref,   # VMEM [T*2B, H]      1.0 where t < packed length (bwd freeze)
                 macc_ref,   # VMEM [T*2B, H]      1.0 where t < accumulation cutoff
                 h0_ref,     # VMEM [2, 2B, H]     initial hidden (fwd, bwd)
                 c0_ref,     # VMEM [2, 2B, H]     initial cell   (fwd, bwd)
                 whh_f_ref,  # VMEM [H, 4H]
                 whh_b_ref,  # VMEM [H, 4H]
                 mlpw_ref,   # VMEM [4H, M]
                 mlpb_ref,   # VMEM [1, M]
                 outw_ref,   # VMEM [M, K]
                 outb_ref,   # VMEM [1, K]
                 o_ref,      # VMEM [B, K]
                 xpf_ref,    # VMEM scratch [T*2B, 4H]  fwd input projections
                 xpb_ref):   # VMEM scratch [T*2B, 4H]  bwd input projections
    H4 = 4 * H
    B = B2 // 2

    # ---- Fused embedding gather: per-token input projection lookup (time-major
    # rows i = t*2B + r).  Token id is a scalar read from SMEM; the projected
    # row is a dynamic sublane gather from VMEM. ----
    for i in range(T * B2):
        t, r = divmod(i, B2)
        tok = ids_ref[r, t]
        row = proj_ref[pl.ds(tok, 1), :]                 # [1, 8H]
        xpf_ref[pl.ds(i, 1), :] = row[:, 0:H4]
        xpb_ref[pl.ds(i, 1), :] = row[:, H4:2 * H4]

    # Loop-invariant recurrence weights, loaded once.
    whh_f = whh_f_ref[...]
    whh_b = whh_b_ref[...]

    def cell(xp, h_prev, c_prev, whh):
        # Bias already folded into xp via the projected-embedding table.
        gates = xp + jnp.dot(h_prev, whh, preferred_element_type=jnp.float32)
        sg = jax.nn.sigmoid(gates)       # one EUP pass over the full [2B, 4H]
        tg = jnp.tanh(gates)             # one EUP pass
        i_g = sg[:, 0 * H:1 * H]         # PyTorch gate order: i, f, g, o
        f_g = sg[:, 1 * H:2 * H]
        g_g = tg[:, 2 * H:3 * H]
        o_g = sg[:, 3 * H:4 * H]
        c_new = f_g * c_prev + i_g * g_g
        h_new = o_g * jnp.tanh(c_new)
        return h_new, c_new

    def step(s, carry):
        h_f, c_f, h_b, c_b, acc_f, acc_b = carry
        tf = s                 # forward-direction time index
        tb = T - 1 - s         # backward-direction time index

        xf = xpf_ref[pl.ds(tf * B2, B2), :]              # [2B, 4H]
        xb = xpb_ref[pl.ds(tb * B2, B2), :]              # [2B, 4H]

        # Interleave both directions: two independent recurrences per iteration.
        hf_new, cf_new = cell(xf, h_f, c_f, whh_f)
        hb_new, cb_new = cell(xb, h_b, c_b, whh_b)

        # Forward: valid steps precede the padding, so no state freeze needed.
        h_f, c_f = hf_new, cf_new
        # Backward (packed semantics): state stays at h0/c0 until tb < length.
        mb = mupd_ref[pl.ds(tb * B2, B2), :]             # [2B, H] lane-dense
        h_b = mb * hb_new + (1.0 - mb) * h_b
        c_b = mb * cb_new + (1.0 - mb) * c_b

        # Attention representation: the legacy F.softmax on an [L,1] tensor is
        # exactly all-ones, so rep is a masked sum accumulated on the fly.
        acc_f = acc_f + macc_ref[pl.ds(tf * B2, B2), :] * hf_new
        acc_b = acc_b + macc_ref[pl.ds(tb * B2, B2), :] * hb_new
        return h_f, c_f, h_b, c_b, acc_f, acc_b

    zeros = jnp.zeros((B2, H), jnp.float32)
    init = (h0_ref[0], c0_ref[0], h0_ref[1], c0_ref[1], zeros, zeros)
    unroll = True if T <= 32 else 8
    _, _, _, _, acc_f, acc_b = lax.fori_loop(0, T, step, init, unroll=unroll)

    # ---- Fused similarity head (kernel rows: [0:B] = s1, [B:2B] = s2). ----
    r1_f, r2_f = acc_f[0:B], acc_f[B:B2]
    r1_b, r2_b = acc_b[0:B], acc_b[B:B2]
    # merged = concat([rep1 + rep2, (rep1 - rep2)^2], 1) with rep = [fwd | bwd],
    # i.e. column order (add_f, add_b, sq_f, sq_b) -- matches mlp_w row order.
    merged = jnp.concatenate(
        [r1_f + r2_f, r1_b + r2_b, (r1_f - r2_f) ** 2, (r1_b - r2_b) ** 2],
        axis=-1)                                         # [B, 4H]
    # TODO(synk): nn.Dropout on `merged` is identity at inference.
    hid = (jnp.dot(merged, mlpw_ref[...], preferred_element_type=jnp.float32)
           + mlpb_ref[...])
    logits = (jnp.dot(hid, outw_ref[...], preferred_element_type=jnp.float32)
              + outb_ref[...])
    o_ref[...] = jax.nn.sigmoid(logits)


# --------------------------------------------------------------------------
# Parameters (deterministic synthetic init matching the nn.Module shapes).
# --------------------------------------------------------------------------
def init_params(key, vocab_size, E, H, C, M, K):
    ks = jax.random.split(key, 14)
    r_lstm = 1.0 / float(H) ** 0.5

    def u(k, shape, r):
        return jax.random.uniform(k, shape, jnp.float32, -r, r)

    return dict(
        embedding=jax.random.normal(ks[0], (vocab_size, E), jnp.float32),
        # LSTM weights stored transposed: x @ wih, h @ whh
        wih_f=u(ks[1], (E, 4 * H), r_lstm),
        whh_f=u(ks[2], (H, 4 * H), r_lstm),
        b_f=u(ks[3], (1, 4 * H), r_lstm) + u(ks[4], (1, 4 * H), r_lstm),   # b_ih + b_hh
        wih_b=u(ks[5], (E, 4 * H), r_lstm),
        whh_b=u(ks[6], (H, 4 * H), r_lstm),
        b_b=u(ks[7], (1, 4 * H), r_lstm) + u(ks[8], (1, 4 * H), r_lstm),
        # S1/S2 exist in the module but are mathematically dead (legacy softmax
        # over a size-1 axis == 1.0) -- they never influence the output.
        s1_w=u(ks[9], (2 * H, C), 0.1),
        s2_w=u(ks[10], (C, 1), 0.1),
        mlp_w=u(ks[11], (4 * H, M), 0.1),        # mlp.weight^T
        mlp_b=jnp.zeros((1, M), jnp.float32),
        out_w=u(ks[12], (M, K), 0.1),            # output.weight^T
        out_b=jnp.zeros((1, K), jnp.float32),
    )


# --------------------------------------------------------------------------
# Forward pass: thin JAX glue (sort bookkeeping, masks, projected-embedding
# table), then one fused Pallas kernel.
# --------------------------------------------------------------------------
def semantic_sim_forward(params, s1, s2, s1_length, s2_length, s1_hidden, s2_hidden):
    B, T = s1.shape
    H = params['whh_f'].shape[0]
    K = params['out_w'].shape[1]
    vocab = params['embedding'].shape[0]
    B2 = 2 * B
    t_idx = jnp.arange(T, dtype=jnp.int32)

    # Projected embedding table with LSTM input biases folded in: every
    # per-token input projection inside the kernel becomes a VMEM row gather.
    wih = jnp.concatenate([params['wih_f'], params['wih_b']], axis=1)        # [E, 8H]
    bias = jnp.concatenate([params['b_f'], params['b_b']], axis=1)           # [1, 8H]
    proj_table = jnp.dot(params['embedding'], wih,
                         preferred_element_type=jnp.float32) + bias          # [V, 8H]
    vpad = (-vocab) % 8
    if vpad:
        proj_table = jnp.pad(proj_table, ((0, vpad), (0, 0)))

    def prep(ids, lengths, hidden):
        lengths = lengths.astype(jnp.int32)
        order = jnp.argsort(-lengths)            # descending-length sort permutation
        len_sorted = lengths[order]
        # The module re-indexes the (sorted) LSTM output with `order` (not its
        # inverse) and slices row b with len_sorted[b]; feeding kernel row b the
        # data of original row order[order[b]] reproduces that verbatim while
        # landing the representation directly in final output order.
        dorder = order[order]
        ids_k = ids[dorder]                      # [B, T]
        len_rec = len_sorted[order]              # packed recurrence length per kernel row
        len_acc = jnp.minimum(len_sorted, len_rec)   # attention-slice cutoff per kernel row
        h0 = hidden[0][:, order, :]              # [2, B, H] init hidden of the sorted rows
        c0 = hidden[1][:, order, :]
        return ids_k, len_rec, len_acc, h0, c0

    ids1, lr1, la1, h01, c01 = prep(s1, s1_length, s1_hidden)
    ids2, lr2, la2, h02, c02 = prep(s2, s2_length, s2_hidden)

    ids_all = jnp.concatenate([ids1, ids2], axis=0).astype(jnp.int32)        # [2B, T]
    len_rec = jnp.concatenate([lr1, lr2], axis=0)                            # [2B]
    len_acc = jnp.concatenate([la1, la2], axis=0)                            # [2B]
    h0_all = jnp.concatenate([h01, h02], axis=1)                             # [2, 2B, H]
    c0_all = jnp.concatenate([c01, c02], axis=1)                             # [2, 2B, H]

    # Lane-dense masks, time-major rows i = t*2B + r  -> [T*2B, H].
    def make_mask(lens):
        m = (t_idx[:, None] < lens[None, :]).astype(jnp.float32)             # [T, 2B]
        return jnp.broadcast_to(m[:, :, None], (T, B2, H)).reshape(T * B2, H)

    m_upd = make_mask(len_rec)
    m_acc = make_mask(len_acc)

    kernel = functools.partial(fused_kernel, T, B2, H)
    vmem = pl.BlockSpec(memory_space=pltpu.MemorySpace.VMEM)
    smem = pl.BlockSpec(memory_space=pltpu.MemorySpace.SMEM)
    out = pl.pallas_call(
        kernel,
        out_shape=jax.ShapeDtypeStruct((B, K), jnp.float32),
        in_specs=[smem, vmem, vmem, vmem, vmem, vmem,
                  vmem, vmem, vmem, vmem, vmem, vmem],
        out_specs=vmem,
        scratch_shapes=[pltpu.VMEM((T * B2, 4 * H), jnp.float32),
                        pltpu.VMEM((T * B2, 4 * H), jnp.float32)],
    )(ids_all, proj_table, m_upd, m_acc, h0_all, c0_all,
      params['whh_f'], params['whh_b'],
      params['mlp_w'], params['mlp_b'], params['out_w'], params['out_b'])
    return out


if __name__ == "__main__":
    vocab_size, embedding_dim, hidden_size = 50, 32, 32
    context_vec_size, mlp_hid_size, class_size = 16, 32, 2
    B, T = 2, 8

    key = jax.random.PRNGKey(0)
    kp, k1, k2 = jax.random.split(key, 3)
    params = init_params(kp, vocab_size, embedding_dim, hidden_size,
                         context_vec_size, mlp_hid_size, class_size)

    s1 = jax.random.randint(k1, (B, T), 0, vocab_size, dtype=jnp.int32)
    s2 = jax.random.randint(k2, (B, T), 0, vocab_size, dtype=jnp.int32)
    s1_length = jnp.array([5, 8], dtype=jnp.int32)
    s2_length = jnp.array([8, 3], dtype=jnp.int32)
    zeros_h = jnp.zeros((2, B, hidden_size), jnp.float32)   # init_hidden
    s1_hidden = (zeros_h, zeros_h)
    s2_hidden = (zeros_h, zeros_h)

    fwd = jax.jit(semantic_sim_forward)
    out = fwd(params, s1, s2, s1_length, s2_length, s1_hidden, s2_hidden)
    out = jax.block_until_ready(out)
    assert out.shape == (B, class_size)
    assert bool(jnp.all(jnp.isfinite(out)))
    print("KERNEL_OK")
</pallas_src>

<mosaic_0001>
module attributes {stable_mosaic.version = 11 : i64} {
  func.func @fused_kernel(%arg0: memref<4x8xi32, #tpu.memory_space<smem>>, %arg1: memref<56x256xf32, #tpu.memory_space<vmem>>, %arg2: memref<32x32xf32, #tpu.memory_space<vmem>>, %arg3: memref<32x32xf32, #tpu.memory_space<vmem>>, %arg4: memref<2x4x32xf32, #tpu.memory_space<vmem>>, %arg5: memref<2x4x32xf32, #tpu.memory_space<vmem>>, %arg6: memref<32x128xf32, #tpu.memory_space<vmem>>, %arg7: memref<32x128xf32, #tpu.memory_space<vmem>>, %arg8: memref<128x32xf32, #tpu.memory_space<vmem>>, %arg9: memref<1x32xf32, #tpu.memory_space<vmem>>, %arg10: memref<32x2xf32, #tpu.memory_space<vmem>>, %arg11: memref<1x2xf32, #tpu.memory_space<vmem>>, %arg12: memref<2x2xf32, #tpu.memory_space<vmem>>, %arg13: memref<32x128xf32, #tpu.memory_space<vmem>>, %arg14: memref<32x128xf32, #tpu.memory_space<vmem>>) attributes {dimension_semantics = [], scalar_prefetch = 0 : i64, scratch_operands = 2 : i64, tpu.core_type = #tpu.core_type<tc>} {
    %c0 = arith.constant 0 : index
    %c0_0 = arith.constant 0 : index
    %0 = memref.load %arg0[%c0, %c0_0] : memref<4x8xi32, #tpu.memory_space<smem>>
    %1 = arith.index_cast %0 : i32 to index
    %c0_1 = arith.constant 0 : index
    %2 = vector.load %arg1[%1, %c0_1] : memref<56x256xf32, #tpu.memory_space<vmem>>, vector<1x256xf32>
    %3 = vector.extract_strided_slice %2 {offsets = [0, 0], sizes = [1, 128], strides = [1, 1]} : vector<1x256xf32> to vector<1x128xf32>
    %c0_2 = arith.constant 0 : index
    %c0_3 = arith.constant 0 : index
    %4 = vector.load %arg13[%c0_2, %c0_3] : memref<32x128xf32, #tpu.memory_space<vmem>>, vector<1x128xf32>
    tpu.vector_store %arg13[%c0_2, %c0_3], %3 {strides = array<i32>} : memref<32x128xf32, #tpu.memory_space<vmem>>, vector<1x128xf32>,
    %5 = vector.extract_strided_slice %2 {offsets = [0, 128], sizes = [1, 128], strides = [1, 1]} : vector<1x256xf32> to vector<1x128xf32>
    %c0_4 = arith.constant 0 : index
    %c0_5 = arith.constant 0 : index
    %6 = vector.load %arg14[%c0_4, %c0_5] : memref<32x128xf32, #tpu.memory_space<vmem>>, vector<1x128xf32>
    tpu.vector_store %arg14[%c0_4, %c0_5], %5 {strides = array<i32>} : memref<32x128xf32, #tpu.memory_space<vmem>>, vector<1x128xf32>,
    %c1 = arith.constant 1 : index
    %c0_6 = arith.constant 0 : index
    %7 = memref.load %arg0[%c1, %c0_6] : memref<4x8xi32, #tpu.memory_space<smem>>
    %8 = arith.index_cast %7 : i32 to index
    %c0_7 = arith.constant 0 : index
    %9 = vector.load %arg1[%8, %c0_7] : memref<56x256xf32, #tpu.memory_space<vmem>>, vector<1x256xf32>
    %10 = vector.extract_strided_slice %9 {offsets = [0, 0], sizes = [1, 128], strides = [1, 1]} : vector<1x256xf32> to vector<1x128xf32>
    %c1_8 = arith.constant 1 : index
    %c0_9 = arith.constant 0 : index
    %11 = vector.load %arg13[%c1_8, %c0_9] : memref<32x128xf32, #tpu.memory_space<vmem>>, vector<1x128xf32>
    tpu.vector_store %arg13[%c1_8, %c0_9], %10 {strides = array<i32>} : memref<32x128xf32, #tpu.memory_space<vmem>>, vector<1x128xf32>,
    %12 = vector.extract_strided_slice %9 {offsets = [0, 128], sizes = [1, 128], strides = [1, 1]} : vector<1x256xf32> to vector<1x128xf32>
    %c1_10 = arith.constant 1 : index
    %c0_11 = arith.constant 0 : index
    %13 = vector.load %arg14[%c1_10, %c0_11] : memref<32x128xf32, #tpu.memory_space<vmem>>, vector<1x128xf32>
    tpu.vector_store %arg14[%c1_10, %c0_11], %12 {strides = array<i32>} : memref<32x128xf32, #tpu.memory_space<vmem>>, vector<1x128xf32>,
    %c2 = arith.constant 2 : index
    %c0_12 = arith.constant 0 : index
    %14 = memref.load %arg0[%c2, %c0_12] : memref<4x8xi32, #tpu.memory_space<smem>>
    %15 = arith.index_cast %14 : i32 to index
    %c0_13 = arith.constant 0 : index
    %16 = vector.load %arg1[%15, %c0_13] : memref<56x256xf32, #tpu.memory_space<vmem>>, vector<1x256xf32>
    %17 = vector.extract_strided_slice %16 {offsets = [0, 0], sizes = [1, 128], strides = [1, 1]} : vector<1x256xf32> to vector<1x128xf32>
    %c2_14 = arith.constant 2 : index
    %c0_15 = arith.constant 0 : index
    %18 = vector.load %arg13[%c2_14, %c0_15] : memref<32x128xf32, #tpu.memory_space<vmem>>, vector<1x128xf32>
    tpu.vector_store %arg13[%c2_14, %c0_15], %17 {strides = array<i32>} : memref<32x128xf32, #tpu.memory_space<vmem>>, vector<1x128xf32>,
    %19 = vector.extract_strided_slice %16 {offsets = [0, 128], sizes = [1, 128], strides = [1, 1]} : vector<1x256xf32> to vector<1x128xf32>
    %c2_16 = arith.constant 2 : index
    %c0_17 = arith.constant 0 : index
    %20 = vector.load %arg14[%c2_16, %c0_17] : memref<32x128xf32, #tpu.memory_space<vmem>>, vector<1x128xf32>
    tpu.vector_store %arg14[%c2_16, %c0_17], %19 {strides = array<i32>} : memref<32x128xf32, #tpu.memory_space<vmem>>, vector<1x128xf32>,
    %c3 = arith.constant 3 : index
    %c0_18 = arith.constant 0 : index
    %21 = memref.load %arg0[%c3, %c0_18] : memref<4x8xi32, #tpu.memory_space<smem>>
    %22 = arith.index_cast %21 : i32 to index
    %c0_19 = arith.constant 0 : index
    %23 = vector.load %arg1[%22, %c0_19] : memref<56x256xf32, #tpu.memory_space<vmem>>, vector<1x256xf32>
    %24 = vector.extract_strided_slice %23 {offsets = [0, 0], sizes = [1, 128], strides = [1, 1]} : vector<1x256xf32> to vector<1x128xf32>
    %c3_20 = arith.constant 3 : index
    %c0_21 = arith.constant 0 : index
    %25 = vector.load %arg13[%c3_20, %c0_21] : memref<32x128xf32, #tpu.memory_space<vmem>>, vector<1x128xf32>
    tpu.vector_store %arg13[%c3_20, %c0_21], %24 {strides = array<i32>} : memref<32x128xf32, #tpu.memory_space<vmem>>, vector<1x128xf32>,
    %26 = vector.extract_strided_slice %23 {offsets = [0, 128], sizes = [1, 128], strides = [1, 1]} : vector<1x256xf32> to vector<1x128xf32>
    %c3_22 = arith.constant 3 : index
    %c0_23 = arith.constant 0 : index
    %27 = vector.load %arg14[%c3_22, %c0_23] : memref<32x128xf32, #tpu.memory_space<vmem>>, vector<1x128xf32>
    tpu.vector_store %arg14[%c3_22, %c0_23], %26 {strides = array<i32>} : memref<32x128xf32, #tpu.memory_space<vmem>>, vector<1x128xf32>,
    %c0_24 = arith.constant 0 : index
    %c1_25 = arith.constant 1 : index
    %28 = memref.load %arg0[%c0_24, %c1_25] : memref<4x8xi32, #tpu.memory_space<smem>>
    %29 = arith.index_cast %28 : i32 to index
    %c0_26 = arith.constant 0 : index
    %30 = vector.load %arg1[%29, %c0_26] : memref<56x256xf32, #tpu.memory_space<vmem>>, vector<1x256xf32>
    %31 = vector.extract_strided_slice %30 {offsets = [0, 0], sizes = [1, 128], strides = [1, 1]} : vector<1x256xf32> to vector<1x128xf32>
    %c4 = arith.constant 4 : index
    %c0_27 = arith.constant 0 : index
    %32 = vector.load %arg13[%c4, %c0_27] : memref<32x128xf32, #tpu.memory_space<vmem>>, vector<1x128xf32>
    tpu.vector_store %arg13[%c4, %c0_27], %31 {strides = array<i32>} : memref<32x128xf32, #tpu.memory_space<vmem>>, vector<1x128xf32>,
    %33 = vector.extract_strided_slice %30 {offsets = [0, 128], sizes = [1, 128], strides = [1, 1]} : vector<1x256xf32> to vector<1x128xf32>
    %c4_28 = arith.constant 4 : index
    %c0_29 = arith.constant 0 : index
    %34 = vector.load %arg14[%c4_28, %c0_29] : memref<32x128xf32, #tpu.memory_space<vmem>>, vector<1x128xf32>
    tpu.vector_store %arg14[%c4_28, %c0_29], %33 {strides = array<i32>} : memref<32x128xf32, #tpu.memory_space<vmem>>, vector<1x128xf32>,
    %c1_30 = arith.constant 1 : index
    %c1_31 = arith.constant 1 : index
    %35 = memref.load %arg0[%c1_30, %c1_31] : memref<4x8xi32, #tpu.memory_space<smem>>
    %36 = arith.index_cast %35 : i32 to index
    %c0_32 = arith.constant 0 : index
    %37 = vector.load %arg1[%36, %c0_32] : memref<56x256xf32, #tpu.memory_space<vmem>>, vector<1x256xf32>
    %38 = vector.extract_strided_slice %37 {offsets = [0, 0], sizes = [1, 128], strides = [1, 1]} : vector<1x256xf32> to vector<1x128xf32>
    %c5 = arith.constant 5 : index
    %c0_33 = arith.constant 0 : index
    %39 = vector.load %arg13[%c5, %c0_33] : memref<32x128xf32, #tpu.memory_space<vmem>>, vector<1x128xf32>
    tpu.vector_store %arg13[%c5, %c0_33], %38 {strides = array<i32>} : memref<32x128xf32, #tpu.memory_space<vmem>>, vector<1x128xf32>,
    %40 = vector.extract_strided_slice %37 {offsets = [0, 128], sizes = [1, 128], strides = [1, 1]} : vector<1x256xf32> to vector<1x128xf32>
    %c5_34 = arith.constant 5 : index
    %c0_35 = arith.constant 0 : index
    %41 = vector.load %arg14[%c5_34, %c0_35] : memref<32x128xf32, #tpu.memory_space<vmem>>, vector<1x128xf32>
    tpu.vector_store %arg14[%c5_34, %c0_35], %40 {strides = array<i32>} : memref<32x128xf32, #tpu.memory_space<vmem>>, vector<1x128xf32>,
    %c2_36 = arith.constant 2 : index
    %c1_37 = arith.constant 1 : index
    %42 = memref.load %arg0[%c2_36, %c1_37] : memref<4x8xi32, #tpu.memory_space<smem>>
    %43 = arith.index_cast %42 : i32 to index
    %c0_38 = arith.constant 0 : index
    %44 = vector.load %arg1[%43, %c0_38] : memref<56x256xf32, #tpu.memory_space<vmem>>, vector<1x256xf32>
    %45 = vector.extract_strided_slice %44 {offsets = [0, 0], sizes = [1, 128], strides = [1, 1]} : vector<1x256xf32> to vector<1x128xf32>
    %c6 = arith.constant 6 : index
    %c0_39 = arith.constant 0 : index
    %46 = vector.load %arg13[%c6, %c0_39] : memref<32x128xf32, #tpu.memory_space<vmem>>, vector<1x128xf32>
    tpu.vector_store %arg13[%c6, %c0_39], %45 {strides = array<i32>} : memref<32x128xf32, #tpu.memory_space<vmem>>, vector<1x128xf32>,
    %47 = vector.extract_strided_slice %44 {offsets = [0, 128], sizes = [1, 128], strides = [1, 1]} : vector<1x256xf32> to vector<1x128xf32>
    %c6_40 = arith.constant 6 : index
    %c0_41 = arith.constant 0 : index
    %48 = vector.load %arg14[%c6_40, %c0_41] : memref<32x128xf32, #tpu.memory_space<vmem>>, vector<1x128xf32>
    tpu.vector_store %arg14[%c6_40, %c0_41], %47 {strides = array<i32>} : memref<32x128xf32, #tpu.memory_space<vmem>>, vector<1x128xf32>,
    %c3_42 = arith.constant 3 : index
    %c1_43 = arith.constant 1 : index
    %49 = memref.load %arg0[%c3_42, %c1_43] : memref<4x8xi32, #tpu.memory_space<smem>>
    %50 = arith.index_cast %49 : i32 to index
    %c0_44 = arith.constant 0 : index
    %51 = vector.load %arg1[%50, %c0_44] : memref<56x256xf32, #tpu.memory_space<vmem>>, vector<1x256xf32>
    %52 = vector.extract_strided_slice %51 {offsets = [0, 0], sizes = [1, 128], strides = [1, 1]} : vector<1x256xf32> to vector<1x128xf32>
    %c7 = arith.constant 7 : index
    %c0_45 = arith.constant 0 : index
    %53 = vector.load %arg13[%c7, %c0_45] : memref<32x128xf32, #tpu.memory_space<vmem>>, vector<1x128xf32>
    tpu.vector_store %arg13[%c7, %c0_45], %52 {strides = array<i32>} : memref<32x128xf32, #tpu.memory_space<vmem>>, vector<1x128xf32>,
    %54 = vector.extract_strided_slice %51 {offsets = [0, 128], sizes = [1, 128], strides = [1, 1]} : vector<1x256xf32> to vector<1x128xf32>
    %c7_46 = arith.constant 7 : index
    %c0_47 = arith.constant 0 : index
    %55 = vector.load %arg14[%c7_46, %c0_47] : memref<32x128xf32, #tpu.memory_space<vmem>>, vector<1x128xf32>
    tpu.vector_store %arg14[%c7_46, %c0_47], %54 {strides = array<i32>} : memref<32x128xf32, #tpu.memory_space<vmem>>, vector<1x128xf32>,
    %c0_48 = arith.constant 0 : index
    %c2_49 = arith.constant 2 : index
    %56 = memref.load %arg0[%c0_48, %c2_49] : memref<4x8xi32, #tpu.memory_space<smem>>
    %57 = arith.index_cast %56 : i32 to index
    %c0_50 = arith.constant 0 : index
    %58 = vector.load %arg1[%57, %c0_50] : memref<56x256xf32, #tpu.memory_space<vmem>>, vector<1x256xf32>
    %59 = vector.extract_strided_slice %58 {offsets = [0, 0], sizes = [1, 128], strides = [1, 1]} : vector<1x256xf32> to vector<1x128xf32>
    %c8 = arith.constant 8 : index
    %c0_51 = arith.constant 0 : index
    %60 = vector.load %arg13[%c8, %c0_51] : memref<32x128xf32, #tpu.memory_space<vmem>>, vector<1x128xf32>
    tpu.vector_store %arg13[%c8, %c0_51], %59 {strides = array<i32>} : memref<32x128xf32, #tpu.memory_space<vmem>>, vector<1x128xf32>,
    %61 = vector.extract_strided_slice %58 {offsets = [0, 128], sizes = [1, 128], strides = [1, 1]} : vector<1x256xf32> to vector<1x128xf32>
    %c8_52 = arith.constant 8 : index
    %c0_53 = arith.constant 0 : index
    %62 = vector.load %arg14[%c8_52, %c0_53] : memref<32x128xf32, #tpu.memory_space<vmem>>, vector<1x128xf32>
    tpu.vector_store %arg14[%c8_52, %c0_53], %61 {strides = array<i32>} : memref<32x128xf32, #tpu.memory_space<vmem>>, vector<1x128xf32>,
    %c1_54 = arith.constant 1 : index
    %c2_55 = arith.constant 2 : index
    %63 = memref.load %arg0[%c1_54, %c2_55] : memref<4x8xi32, #tpu.memory_space<smem>>
    %64 = arith.index_cast %63 : i32 to index
    %c0_56 = arith.constant 0 : index
    %65 = vector.load %arg1[%64, %c0_56] : memref<56x256xf32, #tpu.memory_space<vmem>>, vector<1x256xf32>
    %66 = vector.extract_strided_slice %65 {offsets = [0, 0], sizes = [1, 128], strides = [1, 1]} : vector<1x256xf32> to vector<1x128xf32>
    %c9 = arith.constant 9 : index
    %c0_57 = arith.constant 0 : index
    %67 = vector.load %arg13[%c9, %c0_57] : memref<32x128xf32, #tpu.memory_space<vmem>>, vector<1x128xf32>
    tpu.vector_store %arg13[%c9, %c0_57], %66 {strides = array<i32>} : memref<32x128xf32, #tpu.memory_space<vmem>>, vector<1x128xf32>,
    %68 = vector.extract_strided_slice %65 {offsets = [0, 128], sizes = [1, 128], strides = [1, 1]} : vector<1x256xf32> to vector<1x128xf32>
    %c9_58 = arith.constant 9 : index
    %c0_59 = arith.constant 0 : index
    %69 = vector.load %arg14[%c9_58, %c0_59] : memref<32x128xf32, #tpu.memory_space<vmem>>, vector<1x128xf32>
    tpu.vector_store %arg14[%c9_58, %c0_59], %68 {strides = array<i32>} : memref<32x128xf32, #tpu.memory_space<vmem>>, vector<1x128xf32>,
    %c2_60 = arith.constant 2 : index
    %c2_61 = arith.constant 2 : index
    %70 = memref.load %arg0[%c2_60, %c2_61] : memref<4x8xi32, #tpu.memory_space<smem>>
    %71 = arith.index_cast %70 : i32 to index
    %c0_62 = arith.constant 0 : index
    %72 = vector.load %arg1[%71, %c0_62] : memref<56x256xf32, #tpu.memory_space<vmem>>, vector<1x256xf32>
    %73 = vector.extract_strided_slice %72 {offsets = [0, 0], sizes = [1, 128], strides = [1, 1]} : vector<1x256xf32> to vector<1x128xf32>
    %c10 = arith.constant 10 : index
    %c0_63 = arith.constant 0 : index
    %74 = vector.load %arg13[%c10, %c0_63] : memref<32x128xf32, #tpu.memory_space<vmem>>, vector<1x128xf32>
    tpu.vector_store %arg13[%c10, %c0_63], %73 {strides = array<i32>} : memref<32x128xf32, #tpu.memory_space<vmem>>, vector<1x128xf32>,
    %75 = vector.extract_strided_slice %72 {offsets = [0, 128], sizes = [1, 128], strides = [1, 1]} : vector<1x256xf32> to vector<1x128xf32>
    %c10_64 = arith.constant 10 : index
    %c0_65 = arith.constant 0 : index
    %76 = vector.load %arg14[%c10_64, %c0_65] : memref<32x128xf32, #tpu.memory_space<vmem>>, vector<1x128xf32>
    tpu.vector_store %arg14[%c10_64, %c0_65], %75 {strides = array<i32>} : memref<32x128xf32, #tpu.memory_space<vmem>>, vector<1x128xf32>,
    %c3_66 = arith.constant 3 : index
    %c2_67 = arith.constant 2 : index
    %77 = memref.load %arg0[%c3_66, %c2_67] : memref<4x8xi32, #tpu.memory_space<smem>>
    %78 = arith.index_cast %77 : i32 to index
    %c0_68 = arith.constant 0 : index
    %79 = vector.load %arg1[%78, %c0_68] : memref<56x256xf32, #tpu.memory_space<vmem>>, vector<1x256xf32>
    %80 = vector.extract_strided_slice %79 {offsets = [0, 0], sizes = [1, 128], strides = [1, 1]} : vector<1x256xf32> to vector<1x128xf32>
    %c11 = arith.constant 11 : index
    %c0_69 = arith.constant 0 : index
    %81 = vector.load %arg13[%c11, %c0_69] : memref<32x128xf32, #tpu.memory_space<vmem>>, vector<1x128xf32>
    tpu.vector_store %arg13[%c11, %c0_69], %80 {strides = array<i32>} : memref<32x128xf32, #tpu.memory_space<vmem>>, vector<1x128xf32>,
    %82 = vector.extract_strided_slice %79 {offsets = [0, 128], sizes = [1, 128], strides = [1, 1]} : vector<1x256xf32> to vector<1x128xf32>
    %c11_70 = arith.constant 11 : index
    %c0_71 = arith.constant 0 : index
    %83 = vector.load %arg14[%c11_70, %c0_71] : memref<32x128xf32, #tpu.memory_space<vmem>>, vector<1x128xf32>
    tpu.vector_store %arg14[%c11_70, %c0_71], %82 {strides = array<i32>} : memref<32x128xf32, #tpu.memory_space<vmem>>, vector<1x128xf32>,
    %c0_72 = arith.constant 0 : index
    %c3_73 = arith.constant 3 : index
    %84 = memref.load %arg0[%c0_72, %c3_73] : memref<4x8xi32, #tpu.memory_space<smem>>
    %85 = arith.index_cast %84 : i32 to index
    %c0_74 = arith.constant 0 : index
    %86 = vector.load %arg1[%85, %c0_74] : memref<56x256xf32, #tpu.memory_space<vmem>>, vector<1x256xf32>
    %87 = vector.extract_strided_slice %86 {offsets = [0, 0], sizes = [1, 128], strides = [1, 1]} : vector<1x256xf32> to vector<1x128xf32>
    %c12 = arith.constant 12 : index
    %c0_75 = arith.constant 0 : index
    %88 = vector.load %arg13[%c12, %c0_75] : memref<32x128xf32, #tpu.memory_space<vmem>>, vector<1x128xf32>
    tpu.vector_store %arg13[%c12, %c0_75], %87 {strides = array<i32>} : memref<32x128xf32, #tpu.memory_space<vmem>>, vector<1x128xf32>,
    %89 = vector.extract_strided_slice %86 {offsets = [0, 128], sizes = [1, 128], strides = [1, 1]} : vector<1x256xf32> to vector<1x128xf32>
    %c12_76 = arith.constant 12 : index
    %c0_77 = arith.constant 0 : index
    %90 = vector.load %arg14[%c12_76, %c0_77] : memref<32x128xf32, #tpu.memory_space<vmem>>, vector<1x128xf32>
    tpu.vector_store %arg14[%c12_76, %c0_77], %89 {strides = array<i32>} : memref<32x128xf32, #tpu.memory_space<vmem>>, vector<1x128xf32>,
    %c1_78 = arith.constant 1 : index
    %c3_79 = arith.constant 3 : index
    %91 = memref.load %arg0[%c1_78, %c3_79] : memref<4x8xi32, #tpu.memory_space<smem>>
    %92 = arith.index_cast %91 : i32 to index
    %c0_80 = arith.constant 0 : index
    %93 = vector.load %arg1[%92, %c0_80] : memref<56x256xf32, #tpu.memory_space<vmem>>, vector<1x256xf32>
    %94 = vector.extract_strided_slice %93 {offsets = [0, 0], sizes = [1, 128], strides = [1, 1]} : vector<1x256xf32> to vector<1x128xf32>
    %c13 = arith.constant 13 : index
    %c0_81 = arith.constant 0 : index
    %95 = vector.load %arg13[%c13, %c0_81] : memref<32x128xf32, #tpu.memory_space<vmem>>, vector<1x128xf32>
    tpu.vector_store %arg13[%c13, %c0_81], %94 {strides = array<i32>} : memref<32x128xf32, #tpu.memory_space<vmem>>, vector<1x128xf32>,
    %96 = vector.extract_strided_slice %93 {offsets = [0, 128], sizes = [1, 128], strides = [1, 1]} : vector<1x256xf32> to vector<1x128xf32>
    %c13_82 = arith.constant 13 : index
    %c0_83 = arith.constant 0 : index
    %97 = vector.load %arg14[%c13_82, %c0_83] : memref<32x128xf32, #tpu.memory_space<vmem>>, vector<1x128xf32>
    tpu.vector_store %arg14[%c13_82, %c0_83], %96 {strides = array<i32>} : memref<32x128xf32, #tpu.memory_space<vmem>>, vector<1x128xf32>,
    %c2_84 = arith.constant 2 : index
    %c3_85 = arith.constant 3 : index
    %98 = memref.load %arg0[%c2_84, %c3_85] : memref<4x8xi32, #tpu.memory_space<smem>>
    %99 = arith.index_cast %98 : i32 to index
    %c0_86 = arith.constant 0 : index
    %100 = vector.load %arg1[%99, %c0_86] : memref<56x256xf32, #tpu.memory_space<vmem>>, vector<1x256xf32>
    %101 = vector.extract_strided_slice %100 {offsets = [0, 0], sizes = [1, 128], strides = [1, 1]} : vector<1x256xf32> to vector<1x128xf32>
    %c14 = arith.constant 14 : index
    %c0_87 = arith.constant 0 : index
    %102 = vector.load %arg13[%c14, %c0_87] : memref<32x128xf32, #tpu.memory_space<vmem>>, vector<1x128xf32>
    tpu.vector_store %arg13[%c14, %c0_87], %101 {strides = array<i32>} : memref<32x128xf32, #tpu.memory_space<vmem>>, vector<1x128xf32>,
    %103 = vector.extract_strided_slice %100 {offsets = [0, 128], sizes = [1, 128], strides = [1, 1]} : vector<1x256xf32> to vector<1x128xf32>
    %c14_88 = arith.constant 14 : index
    %c0_89 = arith.constant 0 : index
    %104 = vector.load %arg14[%c14_88, %c0_89] : memref<32x128xf32, #tpu.memory_space<vmem>>, vector<1x128xf32>
    tpu.vector_store %arg14[%c14_88, %c0_89], %103 {strides = array<i32>} : memref<32x128xf32, #tpu.memory_space<vmem>>, vector<1x128xf32>,
    %c3_90 = arith.constant 3 : index
    %c3_91 = arith.constant 3 : index
    %105 = memref.load %arg0[%c3_90, %c3_91] : memref<4x8xi32, #tpu.memory_space<smem>>
    %106 = arith.index_cast %105 : i32 to index
    %c0_92 = arith.constant 0 : index
    %107 = vector.load %arg1[%106, %c0_92] : memref<56x256xf32, #tpu.memory_space<vmem>>, vector<1x256xf32>
    %108 = vector.extract_strided_slice %107 {offsets = [0, 0], sizes = [1, 128], strides = [1, 1]} : vector<1x256xf32> to vector<1x128xf32>
    %c15 = arith.constant 15 : index
    %c0_93 = arith.constant 0 : index
    %109 = vector.load %arg13[%c15, %c0_93] : memref<32x128xf32, #tpu.memory_space<vmem>>, vector<1x128xf32>
    tpu.vector_store %arg13[%c15, %c0_93], %108 {strides = array<i32>} : memref<32x128xf32, #tpu.memory_space<vmem>>, vector<1x128xf32>,
    %110 = vector.extract_strided_slice %107 {offsets = [0, 128], sizes = [1, 128], strides = [1, 1]} : vector<1x256xf32> to vector<1x128xf32>
    %c15_94 = arith.constant 15 : index
    %c0_95 = arith.constant 0 : index
    %111 = vector.load %arg14[%c15_94, %c0_95] : memref<32x128xf32, #tpu.memory_space<vmem>>, vector<1x128xf32>
    tpu.vector_store %arg14[%c15_94, %c0_95], %110 {strides = array<i32>} : memref<32x128xf32, #tpu.memory_space<vmem>>, vector<1x128xf32>,
    %c0_96 = arith.constant 0 : index
    %c4_97 = arith.constant 4 : index
    %112 = memref.load %arg0[%c0_96, %c4_97] : memref<4x8xi32, #tpu.memory_space<smem>>
    %113 = arith.index_cast %112 : i32 to index
    %c0_98 = arith.constant 0 : index
    %114 = vector.load %arg1[%113, %c0_98] : memref<56x256xf32, #tpu.memory_space<vmem>>, vector<1x256xf32>
    %115 = vector.extract_strided_slice %114 {offsets = [0, 0], sizes = [1, 128], strides = [1, 1]} : vector<1x256xf32> to vector<1x128xf32>
    %c16 = arith.constant 16 : index
    %c0_99 = arith.constant 0 : index
    %116 = vector.load %arg13[%c16, %c0_99] : memref<32x128xf32, #tpu.memory_space<vmem>>, vector<1x128xf32>
    tpu.vector_store %arg13[%c16, %c0_99], %115 {strides = array<i32>} : memref<32x128xf32, #tpu.memory_space<vmem>>, vector<1x128xf32>,
    %117 = vector.extract_strided_slice %114 {offsets = [0, 128], sizes = [1, 128], strides = [1, 1]} : vector<1x256xf32> to vector<1x128xf32>
    %c16_100 = arith.constant 16 : index
    %c0_101 = arith.constant 0 : index
    %118 = vector.load %arg14[%c16_100, %c0_101] : memref<32x128xf32, #tpu.memory_space<vmem>>, vector<1x128xf32>
    tpu.vector_store %arg14[%c16_100, %c0_101], %117 {strides = array<i32>} : memref<32x128xf32, #tpu.memory_space<vmem>>, vector<1x128xf32>,
    %c1_102 = arith.constant 1 : index
    %c4_103 = arith.constant 4 : index
    %119 = memref.load %arg0[%c1_102, %c4_103] : memref<4x8xi32, #tpu.memory_space<smem>>
    %120 = arith.index_cast %119 : i32 to index
    %c0_104 = arith.constant 0 : index
    %121 = vector.load %arg1[%120, %c0_104] : memref<56x256xf32, #tpu.memory_space<vmem>>, vector<1x256xf32>
    %122 = vector.extract_strided_slice %121 {offsets = [0, 0], sizes = [1, 128], strides = [1, 1]} : vector<1x256xf32> to vector<1x128xf32>
    %c17 = arith.constant 17 : index
    %c0_105 = arith.constant 0 : index
    %123 = vector.load %arg13[%c17, %c0_105] : memref<32x128xf32, #tpu.memory_space<vmem>>, vector<1x128xf32>
    tpu.vector_store %arg13[%c17, %c0_105], %122 {strides = array<i32>} : memref<32x128xf32, #tpu.memory_space<vmem>>, vector<1x128xf32>,
    %124 = vector.extract_strided_slice %121 {offsets = [0, 128], sizes = [1, 128], strides = [1, 1]} : vector<1x256xf32> to vector<1x128xf32>
    %c17_106 = arith.constant 17 : index
    %c0_107 = arith.constant 0 : index
    %125 = vector.load %arg14[%c17_106, %c0_107] : memref<32x128xf32, #tpu.memory_space<vmem>>, vector<1x128xf32>
    tpu.vector_store %arg14[%c17_106, %c0_107], %124 {strides = array<i32>} : memref<32x128xf32, #tpu.memory_space<vmem>>, vector<1x128xf32>,
    %c2_108 = arith.constant 2 : index
    %c4_109 = arith.constant 4 : index
    %126 = memref.load %arg0[%c2_108, %c4_109] : memref<4x8xi32, #tpu.memory_space<smem>>
    %127 = arith.index_cast %126 : i32 to index
    %c0_110 = arith.constant 0 : index
    %128 = vector.load %arg1[%127, %c0_110] : memref<56x256xf32, #tpu.memory_space<vmem>>, vector<1x256xf32>
    %129 = vector.extract_strided_slice %128 {offsets = [0, 0], sizes = [1, 128], strides = [1, 1]} : vector<1x256xf32> to vector<1x128xf32>
    %c18 = arith.constant 18 : index
    %c0_111 = arith.constant 0 : index
    %130 = vector.load %arg13[%c18, %c0_111] : memref<32x128xf32, #tpu.memory_space<vmem>>, vector<1x128xf32>
    tpu.vector_store %arg13[%c18, %c0_111], %129 {strides = array<i32>} : memref<32x128xf32, #tpu.memory_space<vmem>>, vector<1x128xf32>,
    %131 = vector.extract_strided_slice %128 {offsets = [0, 128], sizes = [1, 128], strides = [1, 1]} : vector<1x256xf32> to vector<1x128xf32>
    %c18_112 = arith.constant 18 : index
    %c0_113 = arith.constant 0 : index
    %132 = vector.load %arg14[%c18_112, %c0_113] : memref<32x128xf32, #tpu.memory_space<vmem>>, vector<1x128xf32>
    tpu.vector_store %arg14[%c18_112, %c0_113], %131 {strides = array<i32>} : memref<32x128xf32, #tpu.memory_space<vmem>>, vector<1x128xf32>,
    %c3_114 = arith.constant 3 : index
    %c4_115 = arith.constant 4 : index
    %133 = memref.load %arg0[%c3_114, %c4_115] : memref<4x8xi32, #tpu.memory_space<smem>>
    %134 = arith.index_cast %133 : i32 to index
    %c0_116 = arith.constant 0 : index
    %135 = vector.load %arg1[%134, %c0_116] : memref<56x256xf32, #tpu.memory_space<vmem>>, vector<1x256xf32>
    %136 = vector.extract_strided_slice %135 {offsets = [0, 0], sizes = [1, 128], strides = [1, 1]} : vector<1x256xf32> to vector<1x128xf32>
    %c19 = arith.constant 19 : index
    %c0_117 = arith.constant 0 : index
    %137 = vector.load %arg13[%c19, %c0_117] : memref<32x128xf32, #tpu.memory_space<vmem>>, vector<1x128xf32>
    tpu.vector_store %arg13[%c19, %c0_117], %136 {strides = array<i32>} : memref<32x128xf32, #tpu.memory_space<vmem>>, vector<1x128xf32>,
    %138 = vector.extract_strided_slice %135 {offsets = [0, 128], sizes = [1, 128], strides = [1, 1]} : vector<1x256xf32> to vector<1x128xf32>
    %c19_118 = arith.constant 19 : index
    %c0_119 = arith.constant 0 : index
    %139 = vector.load %arg14[%c19_118, %c0_119] : memref<32x128xf32, #tpu.memory_space<vmem>>, vector<1x128xf32>
    tpu.vector_store %arg14[%c19_118, %c0_119], %138 {strides = array<i32>} : memref<32x128xf32, #tpu.memory_space<vmem>>, vector<1x128xf32>,
    %c0_120 = arith.constant 0 : index
    %c5_121 = arith.constant 5 : index
    %140 = memref.load %arg0[%c0_120, %c5_121] : memref<4x8xi32, #tpu.memory_space<smem>>
    %141 = arith.index_cast %140 : i32 to index
    %c0_122 = arith.constant 0 : index
    %142 = vector.load %arg1[%141, %c0_122] : memref<56x256xf32, #tpu.memory_space<vmem>>, vector<1x256xf32>
    %143 = vector.extract_strided_slice %142 {offsets = [0, 0], sizes = [1, 128], strides = [1, 1]} : vector<1x256xf32> to vector<1x128xf32>
    %c20 = arith.constant 20 : index
    %c0_123 = arith.constant 0 : index
    %144 = vector.load %arg13[%c20, %c0_123] : memref<32x128xf32, #tpu.memory_space<vmem>>, vector<1x128xf32>
    tpu.vector_store %arg13[%c20, %c0_123], %143 {strides = array<i32>} : memref<32x128xf32, #tpu.memory_space<vmem>>, vector<1x128xf32>,
    %145 = vector.extract_strided_slice %142 {offsets = [0, 128], sizes = [1, 128], strides = [1, 1]} : vector<1x256xf32> to vector<1x128xf32>
    %c20_124 = arith.constant 20 : index
    %c0_125 = arith.constant 0 : index
    %146 = vector.load %arg14[%c20_124, %c0_125] : memref<32x128xf32, #tpu.memory_space<vmem>>, vector<1x128xf32>
    tpu.vector_store %arg14[%c20_124, %c0_125], %145 {strides = array<i32>} : memref<32x128xf32, #tpu.memory_space<vmem>>, vector<1x128xf32>,
    %c1_126 = arith.constant 1 : index
    %c5_127 = arith.constant 5 : index
    %147 = memref.load %arg0[%c1_126, %c5_127] : memref<4x8xi32, #tpu.memory_space<smem>>
    %148 = arith.index_cast %147 : i32 to index
    %c0_128 = arith.constant 0 : index
    %149 = vector.load %arg1[%148, %c0_128] : memref<56x256xf32, #tpu.memory_space<vmem>>, vector<1x256xf32>
    %150 = vector.extract_strided_slice %149 {offsets = [0, 0], sizes = [1, 128], strides = [1, 1]} : vector<1x256xf32> to vector<1x128xf32>
    %c21 = arith.constant 21 : index
    %c0_129 = arith.constant 0 : index
    %151 = vector.load %arg13[%c21, %c0_129] : memref<32x128xf32, #tpu.memory_space<vmem>>, vector<1x128xf32>
    tpu.vector_store %arg13[%c21, %c0_129], %150 {strides = array<i32>} : memref<32x128xf32, #tpu.memory_space<vmem>>, vector<1x128xf32>,
    %152 = vector.extract_strided_slice %149 {offsets = [0, 128], sizes = [1, 128], strides = [1, 1]} : vector<1x256xf32> to vector<1x128xf32>
    %c21_130 = arith.constant 21 : index
    %c0_131 = arith.constant 0 : index
    %153 = vector.load %arg14[%c21_130, %c0_131] : memref<32x128xf32, #tpu.memory_space<vmem>>, vector<1x128xf32>
    tpu.vector_store %arg14[%c21_130, %c0_131], %152 {strides = array<i32>} : memref<32x128xf32, #tpu.memory_space<vmem>>, vector<1x128xf32>,
    %c2_132 = arith.constant 2 : index
    %c5_133 = arith.constant 5 : index
    %154 = memref.load %arg0[%c2_132, %c5_133] : memref<4x8xi32, #tpu.memory_space<smem>>
    %155 = arith.index_cast %154 : i32 to index
    %c0_134 = arith.constant 0 : index
    %156 = vector.load %arg1[%155, %c0_134] : memref<56x256xf32, #tpu.memory_space<vmem>>, vector<1x256xf32>
    %157 = vector.extract_strided_slice %156 {offsets = [0, 0], sizes = [1, 128], strides = [1, 1]} : vector<1x256xf32> to vector<1x128xf32>
    %c22 = arith.constant 22 : index
    %c0_135 = arith.constant 0 : index
    %158 = vector.load %arg13[%c22, %c0_135] : memref<32x128xf32, #tpu.memory_space<vmem>>, vector<1x128xf32>
    tpu.vector_store %arg13[%c22, %c0_135], %157 {strides = array<i32>} : memref<32x128xf32, #tpu.memory_space<vmem>>, vector<1x128xf32>,
    %159 = vector.extract_strided_slice %156 {offsets = [0, 128], sizes = [1, 128], strides = [1, 1]} : vector<1x256xf32> to vector<1x128xf32>
    %c22_136 = arith.constant 22 : index
    %c0_137 = arith.constant 0 : index
    %160 = vector.load %arg14[%c22_136, %c0_137] : memref<32x128xf32, #tpu.memory_space<vmem>>, vector<1x128xf32>
    tpu.vector_store %arg14[%c22_136, %c0_137], %159 {strides = array<i32>} : memref<32x128xf32, #tpu.memory_space<vmem>>, vector<1x128xf32>,
    %c3_138 = arith.constant 3 : index
    %c5_139 = arith.constant 5 : index
    %161 = memref.load %arg0[%c3_138, %c5_139] : memref<4x8xi32, #tpu.memory_space<smem>>
    %162 = arith.index_cast %161 : i32 to index
    %c0_140 = arith.constant 0 : index
    %163 = vector.load %arg1[%162, %c0_140] : memref<56x256xf32, #tpu.memory_space<vmem>>, vector<1x256xf32>
    %164 = vector.extract_strided_slice %163 {offsets = [0, 0], sizes = [1, 128], strides = [1, 1]} : vector<1x256xf32> to vector<1x128xf32>
    %c23 = arith.constant 23 : index
    %c0_141 = arith.constant 0 : index
    %165 = vector.load %arg13[%c23, %c0_141] : memref<32x128xf32, #tpu.memory_space<vmem>>, vector<1x128xf32>
    tpu.vector_store %arg13[%c23, %c0_141], %164 {strides = array<i32>} : memref<32x128xf32, #tpu.memory_space<vmem>>, vector<1x128xf32>,
    %166 = vector.extract_strided_slice %163 {offsets = [0, 128], sizes = [1, 128], strides = [1, 1]} : vector<1x256xf32> to vector<1x128xf32>
    %c23_142 = arith.constant 23 : index
    %c0_143 = arith.constant 0 : index
    %167 = vector.load %arg14[%c23_142, %c0_143] : memref<32x128xf32, #tpu.memory_space<vmem>>, vector<1x128xf32>
    tpu.vector_store %arg14[%c23_142, %c0_143], %166 {strides = array<i32>} : memref<32x128xf32, #tpu.memory_space<vmem>>, vector<1x128xf32>,
    %c0_144 = arith.constant 0 : index
    %c6_145 = arith.constant 6 : index
    %168 = memref.load %arg0[%c0_144, %c6_145] : memref<4x8xi32, #tpu.memory_space<smem>>
    %169 = arith.index_cast %168 : i32 to index
    %c0_146 = arith.constant 0 : index
    %170 = vector.load %arg1[%169, %c0_146] : memref<56x256xf32, #tpu.memory_space<vmem>>, vector<1x256xf32>
    %171 = vector.extract_strided_slice %170 {offsets = [0, 0], sizes = [1, 128], strides = [1, 1]} : vector<1x256xf32> to vector<1x128xf32>
    %c24 = arith.constant 24 : index
    %c0_147 = arith.constant 0 : index
    %172 = vector.load %arg13[%c24, %c0_147] : memref<32x128xf32, #tpu.memory_space<vmem>>, vector<1x128xf32>
    tpu.vector_store %arg13[%c24, %c0_147], %171 {strides = array<i32>} : memref<32x128xf32, #tpu.memory_space<vmem>>, vector<1x128xf32>,
    %173 = vector.extract_strided_slice %170 {offsets = [0, 128], sizes = [1, 128], strides = [1, 1]} : vector<1x256xf32> to vector<1x128xf32>
    %c24_148 = arith.constant 24 : index
    %c0_149 = arith.constant 0 : index
    %174 = vector.load %arg14[%c24_148, %c0_149] : memref<32x128xf32, #tpu.memory_space<vmem>>, vector<1x128xf32>
    tpu.vector_store %arg14[%c24_148, %c0_149], %173 {strides = array<i32>} : memref<32x128xf32, #tpu.memory_space<vmem>>, vector<1x128xf32>,
    %c1_150 = arith.constant 1 : index
    %c6_151 = arith.constant 6 : index
    %175 = memref.load %arg0[%c1_150, %c6_151] : memref<4x8xi32, #tpu.memory_space<smem>>
    %176 = arith.index_cast %175 : i32 to index
    %c0_152 = arith.constant 0 : index
    %177 = vector.load %arg1[%176, %c0_152] : memref<56x256xf32, #tpu.memory_space<vmem>>, vector<1x256xf32>
    %178 = vector.extract_strided_slice %177 {offsets = [0, 0], sizes = [1, 128], strides = [1, 1]} : vector<1x256xf32> to vector<1x128xf32>
    %c25 = arith.constant 25 : index
    %c0_153 = arith.constant 0 : index
    %179 = vector.load %arg13[%c25, %c0_153] : memref<32x128xf32, #tpu.memory_space<vmem>>, vector<1x128xf32>
    tpu.vector_store %arg13[%c25, %c0_153], %178 {strides = array<i32>} : memref<32x128xf32, #tpu.memory_space<vmem>>, vector<1x128xf32>,
    %180 = vector.extract_strided_slice %177 {offsets = [0, 128], sizes = [1, 128], strides = [1, 1]} : vector<1x256xf32> to vector<1x128xf32>
    %c25_154 = arith.constant 25 : index
    %c0_155 = arith.constant 0 : index
    %181 = vector.load %arg14[%c25_154, %c0_155] : memref<32x128xf32, #tpu.memory_space<vmem>>, vector<1x128xf32>
    tpu.vector_store %arg14[%c25_154, %c0_155], %180 {strides = array<i32>} : memref<32x128xf32, #tpu.memory_space<vmem>>, vector<1x128xf32>,
    %c2_156 = arith.constant 2 : index
    %c6_157 = arith.constant 6 : index
    %182 = memref.load %arg0[%c2_156, %c6_157] : memref<4x8xi32, #tpu.memory_space<smem>>
    %183 = arith.index_cast %182 : i32 to index
    %c0_158 = arith.constant 0 : index
    %184 = vector.load %arg1[%183, %c0_158] : memref<56x256xf32, #tpu.memory_space<vmem>>, vector<1x256xf32>
    %185 = vector.extract_strided_slice %184 {offsets = [0, 0], sizes = [1, 128], strides = [1, 1]} : vector<1x256xf32> to vector<1x128xf32>
    %c26 = arith.constant 26 : index
    %c0_159 = arith.constant 0 : index
    %186 = vector.load %arg13[%c26, %c0_159] : memref<32x128xf32, #tpu.memory_space<vmem>>, vector<1x128xf32>
    tpu.vector_store %arg13[%c26, %c0_159], %185 {strides = array<i32>} : memref<32x128xf32, #tpu.memory_space<vmem>>, vector<1x128xf32>,
    %187 = vector.extract_strided_slice %184 {offsets = [0, 128], sizes = [1, 128], strides = [1, 1]} : vector<1x256xf32> to vector<1x128xf32>
    %c26_160 = arith.constant 26 : index
    %c0_161 = arith.constant 0 : index
    %188 = vector.load %arg14[%c26_160, %c0_161] : memref<32x128xf32, #tpu.memory_space<vmem>>, vector<1x128xf32>
    tpu.vector_store %arg14[%c26_160, %c0_161], %187 {strides = array<i32>} : memref<32x128xf32, #tpu.memory_space<vmem>>, vector<1x128xf32>,
    %c3_162 = arith.constant 3 : index
    %c6_163 = arith.constant 6 : index
    %189 = memref.load %arg0[%c3_162, %c6_163] : memref<4x8xi32, #tpu.memory_space<smem>>
    %190 = arith.index_cast %189 : i32 to index
    %c0_164 = arith.constant 0 : index
    %191 = vector.load %arg1[%190, %c0_164] : memref<56x256xf32, #tpu.memory_space<vmem>>, vector<1x256xf32>
    %192 = vector.extract_strided_slice %191 {offsets = [0, 0], sizes = [1, 128], strides = [1, 1]} : vector<1x256xf32> to vector<1x128xf32>
    %c27 = arith.constant 27 : index
    %c0_165 = arith.constant 0 : index
    %193 = vector.load %arg13[%c27, %c0_165] : memref<32x128xf32, #tpu.memory_space<vmem>>, vector<1x128xf32>
    tpu.vector_store %arg13[%c27, %c0_165], %192 {strides = array<i32>} : memref<32x128xf32, #tpu.memory_space<vmem>>, vector<1x128xf32>,
    %194 = vector.extract_strided_slice %191 {offsets = [0, 128], sizes = [1, 128], strides = [1, 1]} : vector<1x256xf32> to vector<1x128xf32>
    %c27_166 = arith.constant 27 : index
    %c0_167 = arith.constant 0 : index
    %195 = vector.load %arg14[%c27_166, %c0_167] : memref<32x128xf32, #tpu.memory_space<vmem>>, vector<1x128xf32>
    tpu.vector_store %arg14[%c27_166, %c0_167], %194 {strides = array<i32>} : memref<32x128xf32, #tpu.memory_space<vmem>>, vector<1x128xf32>,
    %c0_168 = arith.constant 0 : index
    %c7_169 = arith.constant 7 : index
    %196 = memref.load %arg0[%c0_168, %c7_169] : memref<4x8xi32, #tpu.memory_space<smem>>
    %197 = arith.index_cast %196 : i32 to index
    %c0_170 = arith.constant 0 : index
    %198 = vector.load %arg1[%197, %c0_170] : memref<56x256xf32, #tpu.memory_space<vmem>>, vector<1x256xf32>
    %199 = vector.extract_strided_slice %198 {offsets = [0, 0], sizes = [1, 128], strides = [1, 1]} : vector<1x256xf32> to vector<1x128xf32>
    %c28 = arith.constant 28 : index
    %c0_171 = arith.constant 0 : index
    %200 = vector.load %arg13[%c28, %c0_171] : memref<32x128xf32, #tpu.memory_space<vmem>>, vector<1x128xf32>
    tpu.vector_store %arg13[%c28, %c0_171], %199 {strides = array<i32>} : memref<32x128xf32, #tpu.memory_space<vmem>>, vector<1x128xf32>,
    %201 = vector.extract_strided_slice %198 {offsets = [0, 128], sizes = [1, 128], strides = [1, 1]} : vector<1x256xf32> to vector<1x128xf32>
    %c28_172 = arith.constant 28 : index
    %c0_173 = arith.constant 0 : index
    %202 = vector.load %arg14[%c28_172, %c0_173] : memref<32x128xf32, #tpu.memory_space<vmem>>, vector<1x128xf32>
    tpu.vector_store %arg14[%c28_172, %c0_173], %201 {strides = array<i32>} : memref<32x128xf32, #tpu.memory_space<vmem>>, vector<1x128xf32>,
    %c1_174 = arith.constant 1 : index
    %c7_175 = arith.constant 7 : index
    %203 = memref.load %arg0[%c1_174, %c7_175] : memref<4x8xi32, #tpu.memory_space<smem>>
    %204 = arith.index_cast %203 : i32 to index
    %c0_176 = arith.constant 0 : index
    %205 = vector.load %arg1[%204, %c0_176] : memref<56x256xf32, #tpu.memory_space<vmem>>, vector<1x256xf32>
    %206 = vector.extract_strided_slice %205 {offsets = [0, 0], sizes = [1, 128], strides = [1, 1]} : vector<1x256xf32> to vector<1x128xf32>
    %c29 = arith.constant 29 : index
    %c0_177 = arith.constant 0 : index
    %207 = vector.load %arg13[%c29, %c0_177] : memref<32x128xf32, #tpu.memory_space<vmem>>, vector<1x128xf32>
    tpu.vector_store %arg13[%c29, %c0_177], %206 {strides = array<i32>} : memref<32x128xf32, #tpu.memory_space<vmem>>, vector<1x128xf32>,
    %208 = vector.extract_strided_slice %205 {offsets = [0, 128], sizes = [1, 128], strides = [1, 1]} : vector<1x256xf32> to vector<1x128xf32>
    %c29_178 = arith.constant 29 : index
    %c0_179 = arith.constant 0 : index
    %209 = vector.load %arg14[%c29_178, %c0_179] : memref<32x128xf32, #tpu.memory_space<vmem>>, vector<1x128xf32>
    tpu.vector_store %arg14[%c29_178, %c0_179], %208 {strides = array<i32>} : memref<32x128xf32, #tpu.memory_space<vmem>>, vector<1x128xf32>,
    %c2_180 = arith.constant 2 : index
    %c7_181 = arith.constant 7 : index
    %210 = memref.load %arg0[%c2_180, %c7_181] : memref<4x8xi32, #tpu.memory_space<smem>>
    %211 = arith.index_cast %210 : i32 to index
    %c0_182 = arith.constant 0 : index
    %212 = vector.load %arg1[%211, %c0_182] : memref<56x256xf32, #tpu.memory_space<vmem>>, vector<1x256xf32>
    %213 = vector.extract_strided_slice %212 {offsets = [0, 0], sizes = [1, 128], strides = [1, 1]} : vector<1x256xf32> to vector<1x128xf32>
    %c30 = arith.constant 30 : index
    %c0_183 = arith.constant 0 : index
    %214 = vector.load %arg13[%c30, %c0_183] : memref<32x128xf32, #tpu.memory_space<vmem>>, vector<1x128xf32>
    tpu.vector_store %arg13[%c30, %c0_183], %213 {strides = array<i32>} : memref<32x128xf32, #tpu.memory_space<vmem>>, vector<1x128xf32>,
    %215 = vector.extract_strided_slice %212 {offsets = [0, 128], sizes = [1, 128], strides = [1, 1]} : vector<1x256xf32> to vector<1x128xf32>
    %c30_184 = arith.constant 30 : index
    %c0_185 = arith.constant 0 : index
    %216 = vector.load %arg14[%c30_184, %c0_185] : memref<32x128xf32, #tpu.memory_space<vmem>>, vector<1x128xf32>
    tpu.vector_store %arg14[%c30_184, %c0_185], %215 {strides = array<i32>} : memref<32x128xf32, #tpu.memory_space<vmem>>, vector<1x128xf32>,
    %c3_186 = arith.constant 3 : index
    %c7_187 = arith.constant 7 : index
    %217 = memref.load %arg0[%c3_186, %c7_187] : memref<4x8xi32, #tpu.memory_space<smem>>
    %218 = arith.index_cast %217 : i32 to index
    %c0_188 = arith.constant 0 : index
    %219 = vector.load %arg1[%218, %c0_188] : memref<56x256xf32, #tpu.memory_space<vmem>>, vector<1x256xf32>
    %220 = vector.extract_strided_slice %219 {offsets = [0, 0], sizes = [1, 128], strides = [1, 1]} : vector<1x256xf32> to vector<1x128xf32>
    %c31 = arith.constant 31 : index
    %c0_189 = arith.constant 0 : index
    %221 = vector.load %arg13[%c31, %c0_189] : memref<32x128xf32, #tpu.memory_space<vmem>>, vector<1x128xf32>
    tpu.vector_store %arg13[%c31, %c0_189], %220 {strides = array<i32>} : memref<32x128xf32, #tpu.memory_space<vmem>>, vector<1x128xf32>,
    %222 = vector.extract_strided_slice %219 {offsets = [0, 128], sizes = [1, 128], strides = [1, 1]} : vector<1x256xf32> to vector<1x128xf32>
    %c31_190 = arith.constant 31 : index
    %c0_191 = arith.constant 0 : index
    %223 = vector.load %arg14[%c31_190, %c0_191] : memref<32x128xf32, #tpu.memory_space<vmem>>, vector<1x128xf32>
    tpu.vector_store %arg14[%c31_190, %c0_191], %222 {strides = array<i32>} : memref<32x128xf32, #tpu.memory_space<vmem>>, vector<1x128xf32>,
    %c0_192 = arith.constant 0 : index
    %c0_193 = arith.constant 0 : index
    %224 = vector.load %arg6[%c0_192, %c0_193] : memref<32x128xf32, #tpu.memory_space<vmem>>, vector<32x128xf32>
    %c0_194 = arith.constant 0 : index
    %c0_195 = arith.constant 0 : index
    %225 = vector.load %arg7[%c0_194, %c0_195] : memref<32x128xf32, #tpu.memory_space<vmem>>, vector<32x128xf32>
    %cst = arith.constant 0.000000e+00 : f32
    %226 = vector.broadcast %cst : f32 to vector<4x32xf32>
    %c0_196 = arith.constant 0 : index
    %c0_197 = arith.constant 0 : index
    %c0_198 = arith.constant 0 : index
    %227 = vector.load %arg4[%c0_196, %c0_197, %c0_198] : memref<2x4x32xf32, #tpu.memory_space<vmem>>, vector<1x4x32xf32>
    %228 = vector.shape_cast %227 : vector<1x4x32xf32> to vector<4x32xf32>
    %c0_199 = arith.constant 0 : index
    %c0_200 = arith.constant 0 : index
    %c0_201 = arith.constant 0 : index
    %229 = vector.load %arg5[%c0_199, %c0_200, %c0_201] : memref<2x4x32xf32, #tpu.memory_space<vmem>>, vector<1x4x32xf32>
    %230 = vector.shape_cast %229 : vector<1x4x32xf32> to vector<4x32xf32>
    %c1_202 = arith.constant 1 : index
    %c0_203 = arith.constant 0 : index
    %c0_204 = arith.constant 0 : index
    %231 = vector.load %arg4[%c1_202, %c0_203, %c0_204] : memref<2x4x32xf32, #tpu.memory_space<vmem>>, vector<1x4x32xf32>
    %232 = vector.shape_cast %231 : vector<1x4x32xf32> to vector<4x32xf32>
    %c1_205 = arith.constant 1 : index
    %c0_206 = arith.constant 0 : index
    %c0_207 = arith.constant 0 : index
    %233 = vector.load %arg5[%c1_205, %c0_206, %c0_207] : memref<2x4x32xf32, #tpu.memory_space<vmem>>, vector<1x4x32xf32>
    %234 = vector.shape_cast %233 : vector<1x4x32xf32> to vector<4x32xf32>
    %c0_i32 = arith.constant 0 : i32
    %c7_i32 = arith.constant 7 : i32
    %235 = arith.subi %c7_i32, %c0_i32 : i32
    %c4_i32 = arith.constant 4 : i32
    %236 = arith.muli %c0_i32, %c4_i32 : i32
    %237 = arith.index_cast %236 : i32 to index
    %c0_208 = arith.constant 0 : index
    %238 = vector.load %arg13[%237, %c0_208] : memref<32x128xf32, #tpu.memory_space<vmem>>, vector<4x128xf32>
    %c4_i32_209 = arith.constant 4 : i32
    %239 = arith.muli %235, %c4_i32_209 : i32
    %240 = arith.index_cast %239 : i32 to index
    %c0_210 = arith.constant 0 : index
    %241 = vector.load %arg14[%240, %c0_210] : memref<32x128xf32, #tpu.memory_space<vmem>>, vector<4x128xf32>
    %cst_211 = arith.constant dense<0.000000e+00> : vector<4x128xf32>
    %242 = tpu.matmul %228, %224, %cst_211 {dimension_numbers = #tpu.dot_dimension_numbers<[1], [0], [0], [1], [0, 0, 1, 1], [], []>} : vector<4x32xf32>, vector<32x128xf32>, vector<4x128xf32> -> vector<4x128xf32>
    %243 = arith.addf %238, %242 : vector<4x128xf32>
    %244 = arith.negf %243 : vector<4x128xf32>
    %245 = math.exp %244 : vector<4x128xf32>
    %cst_212 = arith.constant 1.000000e+00 : f32
    %246 = vector.broadcast %cst_212 : f32 to vector<4x128xf32>
    %247 = arith.addf %246, %245 : vector<4x128xf32>
    %248 = arith.divf %246, %247 : vector<4x128xf32>
    %249 = math.tanh %243 : vector<4x128xf32>
    %250 = vector.extract_strided_slice %248 {offsets = [0, 0], sizes = [4, 32], strides = [1, 1]} : vector<4x128xf32> to vector<4x32xf32>
    %251 = vector.extract_strided_slice %248 {offsets = [0, 32], sizes = [4, 32], strides = [1, 1]} : vector<4x128xf32> to vector<4x32xf32>
    %252 = vector.extract_strided_slice %249 {offsets = [0, 64], sizes = [4, 32], strides = [1, 1]} : vector<4x128xf32> to vector<4x32xf32>
    %253 = vector.extract_strided_slice %248 {offsets = [0, 96], sizes = [4, 32], strides = [1, 1]} : vector<4x128xf32> to vector<4x32xf32>
    %254 = arith.mulf %251, %230 : vector<4x32xf32>
    %255 = arith.mulf %250, %252 : vector<4x32xf32>
    %256 = arith.addf %254, %255 : vector<4x32xf32>
    %257 = math.tanh %256 : vector<4x32xf32>
    %258 = arith.mulf %253, %257 : vector<4x32xf32>
    %cst_213 = arith.constant dense<0.000000e+00> : vector<4x128xf32>
    %259 = tpu.matmul %232, %225, %cst_213 {dimension_numbers = #tpu.dot_dimension_numbers<[1], [0], [0], [1], [0, 0, 1, 1], [], []>} : vector<4x32xf32>, vector<32x128xf32>, vector<4x128xf32> -> vector<4x128xf32>
    %260 = arith.addf %241, %259 : vector<4x128xf32>
    %261 = arith.negf %260 : vector<4x128xf32>
    %262 = math.exp %261 : vector<4x128xf32>
    %cst_214 = arith.constant 1.000000e+00 : f32
    %263 = vector.broadcast %cst_214 : f32 to vector<4x128xf32>
    %264 = arith.addf %263, %262 : vector<4x128xf32>
    %265 = arith.divf %263, %264 : vector<4x128xf32>
    %266 = math.tanh %260 : vector<4x128xf32>
    %267 = vector.extract_strided_slice %265 {offsets = [0, 0], sizes = [4, 32], strides = [1, 1]} : vector<4x128xf32> to vector<4x32xf32>
    %268 = vector.extract_strided_slice %265 {offsets = [0, 32], sizes = [4, 32], strides = [1, 1]} : vector<4x128xf32> to vector<4x32xf32>
    %269 = vector.extract_strided_slice %266 {offsets = [0, 64], sizes = [4, 32], strides = [1, 1]} : vector<4x128xf32> to vector<4x32xf32>
    %270 = vector.extract_strided_slice %265 {offsets = [0, 96], sizes = [4, 32], strides = [1, 1]} : vector<4x128xf32> to vector<4x32xf32>
    %271 = arith.mulf %268, %234 : vector<4x32xf32>
    %272 = arith.mulf %267, %269 : vector<4x32xf32>
    %273 = arith.addf %271, %272 : vector<4x32xf32>
    %274 = math.tanh %273 : vector<4x32xf32>
    %275 = arith.mulf %270, %274 : vector<4x32xf32>
    %c4_i32_215 = arith.constant 4 : i32
    %276 = arith.muli %235, %c4_i32_215 : i32
    %277 = arith.index_cast %276 : i32 to index
    %c0_216 = arith.constant 0 : index
    %278 = vector.load %arg2[%277, %c0_216] : memref<32x32xf32, #tpu.memory_space<vmem>>, vector<4x32xf32>
    %279 = arith.mulf %278, %275 : vector<4x32xf32>
    %cst_217 = arith.constant 1.000000e+00 : f32
    %280 = vector.broadcast %cst_217 : f32 to vector<4x32xf32>
    %281 = arith.subf %280, %278 : vector<4x32xf32>
    %282 = arith.mulf %281, %232 : vector<4x32xf32>
    %283 = arith.addf %279, %282 : vector<4x32xf32>
    %284 = arith.mulf %278, %273 : vector<4x32xf32>
    %cst_218 = arith.constant 1.000000e+00 : f32
    %285 = vector.broadcast %cst_218 : f32 to vector<4x32xf32>
    %286 = arith.subf %285, %278 : vector<4x32xf32>
    %287 = arith.mulf %286, %234 : vector<4x32xf32>
    %288 = arith.addf %284, %287 : vector<4x32xf32>
    %c4_i32_219 = arith.constant 4 : i32
    %289 = arith.muli %c0_i32, %c4_i32_219 : i32
    %290 = arith.index_cast %289 : i32 to index
    %c0_220 = arith.constant 0 : index
    %291 = vector.load %arg3[%290, %c0_220] : memref<32x32xf32, #tpu.memory_space<vmem>>, vector<4x32xf32>
    %292 = arith.mulf %291, %258 : vector<4x32xf32>
    %293 = arith.addf %226, %292 : vector<4x32xf32>
    %c4_i32_221 = arith.constant 4 : i32
    %294 = arith.muli %235, %c4_i32_221 : i32
    %295 = arith.index_cast %294 : i32 to index
    %c0_222 = arith.constant 0 : index
    %296 = vector.load %arg3[%295, %c0_222] : memref<32x32xf32, #tpu.memory_space<vmem>>, vector<4x32xf32>
    %297 = arith.mulf %296, %275 : vector<4x32xf32>
    %298 = arith.addf %226, %297 : vector<4x32xf32>
    %c1_i32 = arith.constant 1 : i32
    %c7_i32_223 = arith.constant 7 : i32
    %299 = arith.subi %c7_i32_223, %c1_i32 : i32
    %c4_i32_224 = arith.constant 4 : i32
    %300 = arith.muli %c1_i32, %c4_i32_224 : i32
    %301 = arith.index_cast %300 : i32 to index
    %c0_225 = arith.constant 0 : index
    %302 = vector.load %arg13[%301, %c0_225] : memref<32x128xf32, #tpu.memory_space<vmem>>, vector<4x128xf32>
    %c4_i32_226 = arith.constant 4 : i32
    %303 = arith.muli %299, %c4_i32_226 : i32
    %304 = arith.index_cast %303 : i32 to index
    %c0_227 = arith.constant 0 : index
    %305 = vector.load %arg14[%304, %c0_227] : memref<32x128xf32, #tpu.memory_space<vmem>>, vector<4x128xf32>
    %cst_228 = arith.constant dense<0.000000e+00> : vector<4x128xf32>
    %306 = tpu.matmul %258, %224, %cst_228 {dimension_numbers = #tpu.dot_dimension_numbers<[1], [0], [0], [1], [0, 0, 1, 1], [], []>} : vector<4x32xf32>, vector<32x128xf32>, vector<4x128xf32> -> vector<4x128xf32>
    %307 = arith.addf %302, %306 : vector<4x128xf32>
    %308 = arith.negf %307 : vector<4x128xf32>
    %309 = math.exp %308 : vector<4x128xf32>
    %cst_229 = arith.constant 1.000000e+00 : f32
    %310 = vector.broadcast %cst_229 : f32 to vector<4x128xf32>
    %311 = arith.addf %310, %309 : vector<4x128xf32>
    %312 = arith.divf %310, %311 : vector<4x128xf32>
    %313 = math.tanh %307 : vector<4x128xf32>
    %314 = vector.extract_strided_slice %312 {offsets = [0, 0], sizes = [4, 32], strides = [1, 1]} : vector<4x128xf32> to vector<4x32xf32>
    %315 = vector.extract_strided_slice %312 {offsets = [0, 32], sizes = [4, 32], strides = [1, 1]} : vector<4x128xf32> to vector<4x32xf32>
    %316 = vector.extract_strided_slice %313 {offsets = [0, 64], sizes = [4, 32], strides = [1, 1]} : vector<4x128xf32> to vector<4x32xf32>
    %317 = vector.extract_strided_slice %312 {offsets = [0, 96], sizes = [4, 32], strides = [1, 1]} : vector<4x128xf32> to vector<4x32xf32>
    %318 = arith.mulf %315, %256 : vector<4x32xf32>
    %319 = arith.mulf %314, %316 : vector<4x32xf32>
    %320 = arith.addf %318, %319 : vector<4x32xf32>
    %321 = math.tanh %320 : vector<4x32xf32>
    %322 = arith.mulf %317, %321 : vector<4x32xf32>
    %cst_230 = arith.constant dense<0.000000e+00> : vector<4x128xf32>
    %323 = tpu.matmul %283, %225, %cst_230 {dimension_numbers = #tpu.dot_dimension_numbers<[1], [0], [0], [1], [0, 0, 1, 1], [], []>} : vector<4x32xf32>, vector<32x128xf32>, vector<4x128xf32> -> vector<4x128xf32>
    %324 = arith.addf %305, %323 : vector<4x128xf32>
    %325 = arith.negf %324 : vector<4x128xf32>
    %326 = math.exp %325 : vector<4x128xf32>
    %cst_231 = arith.constant 1.000000e+00 : f32
    %327 = vector.broadcast %cst_231 : f32 to vector<4x128xf32>
    %328 = arith.addf %327, %326 : vector<4x128xf32>
    %329 = arith.divf %327, %328 : vector<4x128xf32>
    %330 = math.tanh %324 : vector<4x128xf32>
    %331 = vector.extract_strided_slice %329 {offsets = [0, 0], sizes = [4, 32], strides = [1, 1]} : vector<4x128xf32> to vector<4x32xf32>
    %332 = vector.extract_strided_slice %329 {offsets = [0, 32], sizes = [4, 32], strides = [1, 1]} : vector<4x128xf32> to vector<4x32xf32>
    %333 = vector.extract_strided_slice %330 {offsets = [0, 64], sizes = [4, 32], strides = [1, 1]} : vector<4x128xf32> to vector<4x32xf32>
    %334 = vector.extract_strided_slice %329 {offsets = [0, 96], sizes = [4, 32], strides = [1, 1]} : vector<4x128xf32> to vector<4x32xf32>
    %335 = arith.mulf %332, %288 : vector<4x32xf32>
    %336 = arith.mulf %331, %333 : vector<4x32xf32>
    %337 = arith.addf %335, %336 : vector<4x32xf32>
    %338 = math.tanh %337 : vector<4x32xf32>
    %339 = arith.mulf %334, %338 : vector<4x32xf32>
    %c4_i32_232 = arith.constant 4 : i32
    %340 = arith.muli %299, %c4_i32_232 : i32
    %341 = arith.index_cast %340 : i32 to index
    %c0_233 = arith.constant 0 : index
    %342 = vector.load %arg2[%341, %c0_233] : memref<32x32xf32, #tpu.memory_space<vmem>>, vector<4x32xf32>
    %343 = arith.mulf %342, %339 : vector<4x32xf32>
    %cst_234 = arith.constant 1.000000e+00 : f32
    %344 = vector.broadcast %cst_234 : f32 to vector<4x32xf32>
    %345 = arith.subf %344, %342 : vector<4x32xf32>
    %346 = arith.mulf %345, %283 : vector<4x32xf32>
    %347 = arith.addf %343, %346 : vector<4x32xf32>
    %348 = arith.mulf %342, %337 : vector<4x32xf32>
    %cst_235 = arith.constant 1.000000e+00 : f32
    %349 = vector.broadcast %cst_235 : f32 to vector<4x32xf32>
    %350 = arith.subf %349, %342 : vector<4x32xf32>
    %351 = arith.mulf %350, %288 : vector<4x32xf32>
    %352 = arith.addf %348, %351 : vector<4x32xf32>
    %c4_i32_236 = arith.constant 4 : i32
    %353 = arith.muli %c1_i32, %c4_i32_236 : i32
    %354 = arith.index_cast %353 : i32 to index
    %c0_237 = arith.constant 0 : index
    %355 = vector.load %arg3[%354, %c0_237] : memref<32x32xf32, #tpu.memory_space<vmem>>, vector<4x32xf32>
    %356 = arith.mulf %355, %322 : vector<4x32xf32>
    %357 = arith.addf %293, %356 : vector<4x32xf32>
    %c4_i32_238 = arith.constant 4 : i32
    %358 = arith.muli %299, %c4_i32_238 : i32
    %359 = arith.index_cast %358 : i32 to index
    %c0_239 = arith.constant 0 : index
    %360 = vector.load %arg3[%359, %c0_239] : memref<32x32xf32, #tpu.memory_space<vmem>>, vector<4x32xf32>
    %361 = arith.mulf %360, %339 : vector<4x32xf32>
    %362 = arith.addf %298, %361 : vector<4x32xf32>
    %c2_i32 = arith.constant 2 : i32
    %c7_i32_240 = arith.constant 7 : i32
    %363 = arith.subi %c7_i32_240, %c2_i32 : i32
    %c4_i32_241 = arith.constant 4 : i32
    %364 = arith.muli %c2_i32, %c4_i32_241 : i32
    %365 = arith.index_cast %364 : i32 to index
    %c0_242 = arith.constant 0 : index
    %366 = vector.load %arg13[%365, %c0_242] : memref<32x128xf32, #tpu.memory_space<vmem>>, vector<4x128xf32>
    %c4_i32_243 = arith.constant 4 : i32
    %367 = arith.muli %363, %c4_i32_243 : i32
    %368 = arith.index_cast %367 : i32 to index
    %c0_244 = arith.constant 0 : index
    %369 = vector.load %arg14[%368, %c0_244] : memref<32x128xf32, #tpu.memory_space<vmem>>, vector<4x128xf32>
    %cst_245 = arith.constant dense<0.000000e+00> : vector<4x128xf32>
    %370 = tpu.matmul %322, %224, %cst_245 {dimension_numbers = #tpu.dot_dimension_numbers<[1], [0], [0], [1], [0, 0, 1, 1], [], []>} : vector<4x32xf32>, vector<32x128xf32>, vector<4x128xf32> -> vector<4x128xf32>
    %371 = arith.addf %366, %370 : vector<4x128xf32>
    %372 = arith.negf %371 : vector<4x128xf32>
    %373 = math.exp %372 : vector<4x128xf32>
    %cst_246 = arith.constant 1.000000e+00 : f32
    %374 = vector.broadcast %cst_246 : f32 to vector<4x128xf32>
    %375 = arith.addf %374, %373 : vector<4x128xf32>
    %376 = arith.divf %374, %375 : vector<4x128xf32>
    %377 = math.tanh %371 : vector<4x128xf32>
    %378 = vector.extract_strided_slice %376 {offsets = [0, 0], sizes = [4, 32], strides = [1, 1]} : vector<4x128xf32> to vector<4x32xf32>
    %379 = vector.extract_strided_slice %376 {offsets = [0, 32], sizes = [4, 32], strides = [1, 1]} : vector<4x128xf32> to vector<4x32xf32>
    %380 = vector.extract_strided_slice %377 {offsets = [0, 64], sizes = [4, 32], strides = [1, 1]} : vector<4x128xf32> to vector<4x32xf32>
    %381 = vector.extract_strided_slice %376 {offsets = [0, 96], sizes = [4, 32], strides = [1, 1]} : vector<4x128xf32> to vector<4x32xf32>
    %382 = arith.mulf %379, %320 : vector<4x32xf32>
    %383 = arith.mulf %378, %380 : vector<4x32xf32>
    %384 = arith.addf %382, %383 : vector<4x32xf32>
    %385 = math.tanh %384 : vector<4x32xf32>
    %386 = arith.mulf %381, %385 : vector<4x32xf32>
    %cst_247 = arith.constant dense<0.000000e+00> : vector<4x128xf32>
    %387 = tpu.matmul %347, %225, %cst_247 {dimension_numbers = #tpu.dot_dimension_numbers<[1], [0], [0], [1], [0, 0, 1, 1], [], []>} : vector<4x32xf32>, vector<32x128xf32>, vector<4x128xf32> -> vector<4x128xf32>
    %388 = arith.addf %369, %387 : vector<4x128xf32>
    %389 = arith.negf %388 : vector<4x128xf32>
    %390 = math.exp %389 : vector<4x128xf32>
    %cst_248 = arith.constant 1.000000e+00 : f32
    %391 = vector.broadcast %cst_248 : f32 to vector<4x128xf32>
    %392 = arith.addf %391, %390 : vector<4x128xf32>
    %393 = arith.divf %391, %392 : vector<4x128xf32>
    %394 = math.tanh %388 : vector<4x128xf32>
    %395 = vector.extract_strided_slice %393 {offsets = [0, 0], sizes = [4, 32], strides = [1, 1]} : vector<4x128xf32> to vector<4x32xf32>
    %396 = vector.extract_strided_slice %393 {offsets = [0, 32], sizes = [4, 32], strides = [1, 1]} : vector<4x128xf32> to vector<4x32xf32>
    %397 = vector.extract_strided_slice %394 {offsets = [0, 64], sizes = [4, 32], strides = [1, 1]} : vector<4x128xf32> to vector<4x32xf32>
    %398 = vector.extract_strided_slice %393 {offsets = [0, 96], sizes = [4, 32], strides = [1, 1]} : vector<4x128xf32> to vector<4x32xf32>
    %399 = arith.mulf %396, %352 : vector<4x32xf32>
    %400 = arith.mulf %395, %397 : vector<4x32xf32>
    %401 = arith.addf %399, %400 : vector<4x32xf32>
    %402 = math.tanh %401 : vector<4x32xf32>
    %403 = arith.mulf %398, %402 : vector<4x32xf32>
    %c4_i32_249 = arith.constant 4 : i32
    %404 = arith.muli %363, %c4_i32_249 : i32
    %405 = arith.index_cast %404 : i32 to index
    %c0_250 = arith.constant 0 : index
    %406 = vector.load %arg2[%405, %c0_250] : memref<32x32xf32, #tpu.memory_space<vmem>>, vector<4x32xf32>
    %407 = arith.mulf %406, %403 : vector<4x32xf32>
    %cst_251 = arith.constant 1.000000e+00 : f32
    %408 = vector.broadcast %cst_251 : f32 to vector<4x32xf32>
    %409 = arith.subf %408, %406 : vector<4x32xf32>
    %410 = arith.mulf %409, %347 : vector<4x32xf32>
    %411 = arith.addf %407, %410 : vector<4x32xf32>
    %412 = arith.mulf %406, %401 : vector<4x32xf32>
    %cst_252 = arith.constant 1.000000e+00 : f32
    %413 = vector.broadcast %cst_252 : f32 to vector<4x32xf32>
    %414 = arith.subf %413, %406 : vector<4x32xf32>
    %415 = arith.mulf %414, %352 : vector<4x32xf32>
    %416 = arith.addf %412, %415 : vector<4x32xf32>
    %c4_i32_253 = arith.constant 4 : i32
    %417 = arith.muli %c2_i32, %c4_i32_253 : i32
    %418 = arith.index_cast %417 : i32 to index
    %c0_254 = arith.constant 0 : index
    %419 = vector.load %arg3[%418, %c0_254] : memref<32x32xf32, #tpu.memory_space<vmem>>, vector<4x32xf32>
    %420 = arith.mulf %419, %386 : vector<4x32xf32>
    %421 = arith.addf %357, %420 : vector<4x32xf32>
    %c4_i32_255 = arith.constant 4 : i32
    %422 = arith.muli %363, %c4_i32_255 : i32
    %423 = arith.index_cast %422 : i32 to index
    %c0_256 = arith.constant 0 : index
    %424 = vector.load %arg3[%423, %c0_256] : memref<32x32xf32, #tpu.memory_space<vmem>>, vector<4x32xf32>
    %425 = arith.mulf %424, %403 : vector<4x32xf32>
    %426 = arith.addf %362, %425 : vector<4x32xf32>
    %c3_i32 = arith.constant 3 : i32
    %c7_i32_257 = arith.constant 7 : i32
    %427 = arith.subi %c7_i32_257, %c3_i32 : i32
    %c4_i32_258 = arith.constant 4 : i32
    %428 = arith.muli %c3_i32, %c4_i32_258 : i32
    %429 = arith.index_cast %428 : i32 to index
    %c0_259 = arith.constant 0 : index
    %430 = vector.load %arg13[%429, %c0_259] : memref<32x128xf32, #tpu.memory_space<vmem>>, vector<4x128xf32>
    %c4_i32_260 = arith.constant 4 : i32
    %431 = arith.muli %427, %c4_i32_260 : i32
    %432 = arith.index_cast %431 : i32 to index
    %c0_261 = arith.constant 0 : index
    %433 = vector.load %arg14[%432, %c0_261] : memref<32x128xf32, #tpu.memory_space<vmem>>, vector<4x128xf32>
    %cst_262 = arith.constant dense<0.000000e+00> : vector<4x128xf32>
    %434 = tpu.matmul %386, %224, %cst_262 {dimension_numbers = #tpu.dot_dimension_numbers<[1], [0], [0], [1], [0, 0, 1, 1], [], []>} : vector<4x32xf32>, vector<32x128xf32>, vector<4x128xf32> -> vector<4x128xf32>
    %435 = arith.addf %430, %434 : vector<4x128xf32>
    %436 = arith.negf %435 : vector<4x128xf32>
    %437 = math.exp %436 : vector<4x128xf32>
    %cst_263 = arith.constant 1.000000e+00 : f32
    %438 = vector.broadcast %cst_263 : f32 to vector<4x128xf32>
    %439 = arith.addf %438, %437 : vector<4x128xf32>
    %440 = arith.divf %438, %439 : vector<4x128xf32>
    %441 = math.tanh %435 : vector<4x128xf32>
    %442 = vector.extract_strided_slice %440 {offsets = [0, 0], sizes = [4, 32], strides = [1, 1]} : vector<4x128xf32> to vector<4x32xf32>
    %443 = vector.extract_strided_slice %440 {offsets = [0, 32], sizes = [4, 32], strides = [1, 1]} : vector<4x128xf32> to vector<4x32xf32>
    %444 = vector.extract_strided_slice %441 {offsets = [0, 64], sizes = [4, 32], strides = [1, 1]} : vector<4x128xf32> to vector<4x32xf32>
    %445 = vector.extract_strided_slice %440 {offsets = [0, 96], sizes = [4, 32], strides = [1, 1]} : vector<4x128xf32> to vector<4x32xf32>
    %446 = arith.mulf %443, %384 : vector<4x32xf32>
    %447 = arith.mulf %442, %444 : vector<4x32xf32>
    %448 = arith.addf %446, %447 : vector<4x32xf32>
    %449 = math.tanh %448 : vector<4x32xf32>
    %450 = arith.mulf %445, %449 : vector<4x32xf32>
    %cst_264 = arith.constant dense<0.000000e+00> : vector<4x128xf32>
    %451 = tpu.matmul %411, %225, %cst_264 {dimension_numbers = #tpu.dot_dimension_numbers<[1], [0], [0], [1], [0, 0, 1, 1], [], []>} : vector<4x32xf32>, vector<32x128xf32>, vector<4x128xf32> -> vector<4x128xf32>
    %452 = arith.addf %433, %451 : vector<4x128xf32>
    %453 = arith.negf %452 : vector<4x128xf32>
    %454 = math.exp %453 : vector<4x128xf32>
    %cst_265 = arith.constant 1.000000e+00 : f32
    %455 = vector.broadcast %cst_265 : f32 to vector<4x128xf32>
    %456 = arith.addf %455, %454 : vector<4x128xf32>
    %457 = arith.divf %455, %456 : vector<4x128xf32>
    %458 = math.tanh %452 : vector<4x128xf32>
    %459 = vector.extract_strided_slice %457 {offsets = [0, 0], sizes = [4, 32], strides = [1, 1]} : vector<4x128xf32> to vector<4x32xf32>
    %460 = vector.extract_strided_slice %457 {offsets = [0, 32], sizes = [4, 32], strides = [1, 1]} : vector<4x128xf32> to vector<4x32xf32>
    %461 = vector.extract_strided_slice %458 {offsets = [0, 64], sizes = [4, 32], strides = [1, 1]} : vector<4x128xf32> to vector<4x32xf32>
    %462 = vector.extract_strided_slice %457 {offsets = [0, 96], sizes = [4, 32], strides = [1, 1]} : vector<4x128xf32> to vector<4x32xf32>
    %463 = arith.mulf %460, %416 : vector<4x32xf32>
    %464 = arith.mulf %459, %461 : vector<4x32xf32>
    %465 = arith.addf %463, %464 : vector<4x32xf32>
    %466 = math.tanh %465 : vector<4x32xf32>
    %467 = arith.mulf %462, %466 : vector<4x32xf32>
    %c4_i32_266 = arith.constant 4 : i32
    %468 = arith.muli %427, %c4_i32_266 : i32
    %469 = arith.index_cast %468 : i32 to index
    %c0_267 = arith.constant 0 : index
    %470 = vector.load %arg2[%469, %c0_267] : memref<32x32xf32, #tpu.memory_space<vmem>>, vector<4x32xf32>
    %471 = arith.mulf %470, %467 : vector<4x32xf32>
    %cst_268 = arith.constant 1.000000e+00 : f32
    %472 = vector.broadcast %cst_268 : f32 to vector<4x32xf32>
    %473 = arith.subf %472, %470 : vector<4x32xf32>
    %474 = arith.mulf %473, %411 : vector<4x32xf32>
    %475 = arith.addf %471, %474 : vector<4x32xf32>
    %476 = arith.mulf %470, %465 : vector<4x32xf32>
    %cst_269 = arith.constant 1.000000e+00 : f32
    %477 = vector.broadcast %cst_269 : f32 to vector<4x32xf32>
    %478 = arith.subf %477, %470 : vector<4x32xf32>
    %479 = arith.mulf %478, %416 : vector<4x32xf32>
    %480 = arith.addf %476, %479 : vector<4x32xf32>
    %c4_i32_270 = arith.constant 4 : i32
    %481 = arith.muli %c3_i32, %c4_i32_270 : i32
    %482 = arith.index_cast %481 : i32 to index
    %c0_271 = arith.constant 0 : index
    %483 = vector.load %arg3[%482, %c0_271] : memref<32x32xf32, #tpu.memory_space<vmem>>, vector<4x32xf32>
    %484 = arith.mulf %483, %450 : vector<4x32xf32>
    %485 = arith.addf %421, %484 : vector<4x32xf32>
    %c4_i32_272 = arith.constant 4 : i32
    %486 = arith.muli %427, %c4_i32_272 : i32
    %487 = arith.index_cast %486 : i32 to index
    %c0_273 = arith.constant 0 : index
    %488 = vector.load %arg3[%487, %c0_273] : memref<32x32xf32, #tpu.memory_space<vmem>>, vector<4x32xf32>
    %489 = arith.mulf %488, %467 : vector<4x32xf32>
    %490 = arith.addf %426, %489 : vector<4x32xf32>
    %c4_i32_274 = arith.constant 4 : i32
    %c7_i32_275 = arith.constant 7 : i32
    %491 = arith.subi %c7_i32_275, %c4_i32_274 : i32
    %c4_i32_276 = arith.constant 4 : i32
    %492 = arith.muli %c4_i32_274, %c4_i32_276 : i32
    %493 = arith.index_cast %492 : i32 to index
    %c0_277 = arith.constant 0 : index
    %494 = vector.load %arg13[%493, %c0_277] : memref<32x128xf32, #tpu.memory_space<vmem>>, vector<4x128xf32>
    %c4_i32_278 = arith.constant 4 : i32
    %495 = arith.muli %491, %c4_i32_278 : i32
    %496 = arith.index_cast %495 : i32 to index
    %c0_279 = arith.constant 0 : index
    %497 = vector.load %arg14[%496, %c0_279] : memref<32x128xf32, #tpu.memory_space<vmem>>, vector<4x128xf32>
    %cst_280 = arith.constant dense<0.000000e+00> : vector<4x128xf32>
    %498 = tpu.matmul %450, %224, %cst_280 {dimension_numbers = #tpu.dot_dimension_numbers<[1], [0], [0], [1], [0, 0, 1, 1], [], []>} : vector<4x32xf32>, vector<32x128xf32>, vector<4x128xf32> -> vector<4x128xf32>
    %499 = arith.addf %494, %498 : vector<4x128xf32>
    %500 = arith.negf %499 : vector<4x128xf32>
    %501 = math.exp %500 : vector<4x128xf32>
    %cst_281 = arith.constant 1.000000e+00 : f32
    %502 = vector.broadcast %cst_281 : f32 to vector<4x128xf32>
    %503 = arith.addf %502, %501 : vector<4x128xf32>
    %504 = arith.divf %502, %503 : vector<4x128xf32>
    %505 = math.tanh %499 : vector<4x128xf32>
    %506 = vector.extract_strided_slice %504 {offsets = [0, 0], sizes = [4, 32], strides = [1, 1]} : vector<4x128xf32> to vector<4x32xf32>
    %507 = vector.extract_strided_slice %504 {offsets = [0, 32], sizes = [4, 32], strides = [1, 1]} : vector<4x128xf32> to vector<4x32xf32>
    %508 = vector.extract_strided_slice %505 {offsets = [0, 64], sizes = [4, 32], strides = [1, 1]} : vector<4x128xf32> to vector<4x32xf32>
    %509 = vector.extract_strided_slice %504 {offsets = [0, 96], sizes = [4, 32], strides = [1, 1]} : vector<4x128xf32> to vector<4x32xf32>
    %510 = arith.mulf %507, %448 : vector<4x32xf32>
    %511 = arith.mulf %506, %508 : vector<4x32xf32>
    %512 = arith.addf %510, %511 : vector<4x32xf32>
    %513 = math.tanh %512 : vector<4x32xf32>
    %514 = arith.mulf %509, %513 : vector<4x32xf32>
    %cst_282 = arith.constant dense<0.000000e+00> : vector<4x128xf32>
    %515 = tpu.matmul %475, %225, %cst_282 {dimension_numbers = #tpu.dot_dimension_numbers<[1], [0], [0], [1], [0, 0, 1, 1], [], []>} : vector<4x32xf32>, vector<32x128xf32>, vector<4x128xf32> -> vector<4x128xf32>
    %516 = arith.addf %497, %515 : vector<4x128xf32>
    %517 = arith.negf %516 : vector<4x128xf32>
    %518 = math.exp %517 : vector<4x128xf32>
    %cst_283 = arith.constant 1.000000e+00 : f32
    %519 = vector.broadcast %cst_283 : f32 to vector<4x128xf32>
    %520 = arith.addf %519, %518 : vector<4x128xf32>
    %521 = arith.divf %519, %520 : vector<4x128xf32>
    %522 = math.tanh %516 : vector<4x128xf32>
    %523 = vector.extract_strided_slice %521 {offsets = [0, 0], sizes = [4, 32], strides = [1, 1]} : vector<4x128xf32> to vector<4x32xf32>
    %524 = vector.extract_strided_slice %521 {offsets = [0, 32], sizes = [4, 32], strides = [1, 1]} : vector<4x128xf32> to vector<4x32xf32>
    %525 = vector.extract_strided_slice %522 {offsets = [0, 64], sizes = [4, 32], strides = [1, 1]} : vector<4x128xf32> to vector<4x32xf32>
    %526 = vector.extract_strided_slice %521 {offsets = [0, 96], sizes = [4, 32], strides = [1, 1]} : vector<4x128xf32> to vector<4x32xf32>
    %527 = arith.mulf %524, %480 : vector<4x32xf32>
    %528 = arith.mulf %523, %525 : vector<4x32xf32>
    %529 = arith.addf %527, %528 : vector<4x32xf32>
    %530 = math.tanh %529 : vector<4x32xf32>
    %531 = arith.mulf %526, %530 : vector<4x32xf32>
    %c4_i32_284 = arith.constant 4 : i32
    %532 = arith.muli %491, %c4_i32_284 : i32
    %533 = arith.index_cast %532 : i32 to index
    %c0_285 = arith.constant 0 : index
    %534 = vector.load %arg2[%533, %c0_285] : memref<32x32xf32, #tpu.memory_space<vmem>>, vector<4x32xf32>
    %535 = arith.mulf %534, %531 : vector<4x32xf32>
    %cst_286 = arith.constant 1.000000e+00 : f32
    %536 = vector.broadcast %cst_286 : f32 to vector<4x32xf32>
    %537 = arith.subf %536, %534 : vector<4x32xf32>
    %538 = arith.mulf %537, %475 : vector<4x32xf32>
    %539 = arith.addf %535, %538 : vector<4x32xf32>
    %540 = arith.mulf %534, %529 : vector<4x32xf32>
    %cst_287 = arith.constant 1.000000e+00 : f32
    %541 = vector.broadcast %cst_287 : f32 to vector<4x32xf32>
    %542 = arith.subf %541, %534 : vector<4x32xf32>
    %543 = arith.mulf %542, %480 : vector<4x32xf32>
    %544 = arith.addf %540, %543 : vector<4x32xf32>
    %c4_i32_288 = arith.constant 4 : i32
    %545 = arith.muli %c4_i32_274, %c4_i32_288 : i32
    %546 = arith.index_cast %545 : i32 to index
    %c0_289 = arith.constant 0 : index
    %547 = vector.load %arg3[%546, %c0_289] : memref<32x32xf32, #tpu.memory_space<vmem>>, vector<4x32xf32>
    %548 = arith.mulf %547, %514 : vector<4x32xf32>
    %549 = arith.addf %485, %548 : vector<4x32xf32>
    %c4_i32_290 = arith.constant 4 : i32
    %550 = arith.muli %491, %c4_i32_290 : i32
    %551 = arith.index_cast %550 : i32 to index
    %c0_291 = arith.constant 0 : index
    %552 = vector.load %arg3[%551, %c0_291] : memref<32x32xf32, #tpu.memory_space<vmem>>, vector<4x32xf32>
    %553 = arith.mulf %552, %531 : vector<4x32xf32>
    %554 = arith.addf %490, %553 : vector<4x32xf32>
    %c5_i32 = arith.constant 5 : i32
    %c7_i32_292 = arith.constant 7 : i32
    %555 = arith.subi %c7_i32_292, %c5_i32 : i32
    %c4_i32_293 = arith.constant 4 : i32
    %556 = arith.muli %c5_i32, %c4_i32_293 : i32
    %557 = arith.index_cast %556 : i32 to index
    %c0_294 = arith.constant 0 : index
    %558 = vector.load %arg13[%557, %c0_294] : memref<32x128xf32, #tpu.memory_space<vmem>>, vector<4x128xf32>
    %c4_i32_295 = arith.constant 4 : i32
    %559 = arith.muli %555, %c4_i32_295 : i32
    %560 = arith.index_cast %559 : i32 to index
    %c0_296 = arith.constant 0 : index
    %561 = vector.load %arg14[%560, %c0_296] : memref<32x128xf32, #tpu.memory_space<vmem>>, vector<4x128xf32>
    %cst_297 = arith.constant dense<0.000000e+00> : vector<4x128xf32>
    %562 = tpu.matmul %514, %224, %cst_297 {dimension_numbers = #tpu.dot_dimension_numbers<[1], [0], [0], [1], [0, 0, 1, 1], [], []>} : vector<4x32xf32>, vector<32x128xf32>, vector<4x128xf32> -> vector<4x128xf32>
    %563 = arith.addf %558, %562 : vector<4x128xf32>
    %564 = arith.negf %563 : vector<4x128xf32>
    %565 = math.exp %564 : vector<4x128xf32>
    %cst_298 = arith.constant 1.000000e+00 : f32
    %566 = vector.broadcast %cst_298 : f32 to vector<4x128xf32>
    %567 = arith.addf %566, %565 : vector<4x128xf32>
    %568 = arith.divf %566, %567 : vector<4x128xf32>
    %569 = math.tanh %563 : vector<4x128xf32>
    %570 = vector.extract_strided_slice %568 {offsets = [0, 0], sizes = [4, 32], strides = [1, 1]} : vector<4x128xf32> to vector<4x32xf32>
    %571 = vector.extract_strided_slice %568 {offsets = [0, 32], sizes = [4, 32], strides = [1, 1]} : vector<4x128xf32> to vector<4x32xf32>
    %572 = vector.extract_strided_slice %569 {offsets = [0, 64], sizes = [4, 32], strides = [1, 1]} : vector<4x128xf32> to vector<4x32xf32>
    %573 = vector.extract_strided_slice %568 {offsets = [0, 96], sizes = [4, 32], strides = [1, 1]} : vector<4x128xf32> to vector<4x32xf32>
    %574 = arith.mulf %571, %512 : vector<4x32xf32>
    %575 = arith.mulf %570, %572 : vector<4x32xf32>
    %576 = arith.addf %574, %575 : vector<4x32xf32>
    %577 = math.tanh %576 : vector<4x32xf32>
    %578 = arith.mulf %573, %577 : vector<4x32xf32>
    %cst_299 = arith.constant dense<0.000000e+00> : vector<4x128xf32>
    %579 = tpu.matmul %539, %225, %cst_299 {dimension_numbers = #tpu.dot_dimension_numbers<[1], [0], [0], [1], [0, 0, 1, 1], [], []>} : vector<4x32xf32>, vector<32x128xf32>, vector<4x128xf32> -> vector<4x128xf32>
    %580 = arith.addf %561, %579 : vector<4x128xf32>
    %581 = arith.negf %580 : vector<4x128xf32>
    %582 = math.exp %581 : vector<4x128xf32>
    %cst_300 = arith.constant 1.000000e+00 : f32
    %583 = vector.broadcast %cst_300 : f32 to vector<4x128xf32>
    %584 = arith.addf %583, %582 : vector<4x128xf32>
    %585 = arith.divf %583, %584 : vector<4x128xf32>
    %586 = math.tanh %580 : vector<4x128xf32>
    %587 = vector.extract_strided_slice %585 {offsets = [0, 0], sizes = [4, 32], strides = [1, 1]} : vector<4x128xf32> to vector<4x32xf32>
    %588 = vector.extract_strided_slice %585 {offsets = [0, 32], sizes = [4, 32], strides = [1, 1]} : vector<4x128xf32> to vector<4x32xf32>
    %589 = vector.extract_strided_slice %586 {offsets = [0, 64], sizes = [4, 32], strides = [1, 1]} : vector<4x128xf32> to vector<4x32xf32>
    %590 = vector.extract_strided_slice %585 {offsets = [0, 96], sizes = [4, 32], strides = [1, 1]} : vector<4x128xf32> to vector<4x32xf32>
    %591 = arith.mulf %588, %544 : vector<4x32xf32>
    %592 = arith.mulf %587, %589 : vector<4x32xf32>
    %593 = arith.addf %591, %592 : vector<4x32xf32>
    %594 = math.tanh %593 : vector<4x32xf32>
    %595 = arith.mulf %590, %594 : vector<4x32xf32>
    %c4_i32_301 = arith.constant 4 : i32
    %596 = arith.muli %555, %c4_i32_301 : i32
    %597 = arith.index_cast %596 : i32 to index
    %c0_302 = arith.constant 0 : index
    %598 = vector.load %arg2[%597, %c0_302] : memref<32x32xf32, #tpu.memory_space<vmem>>, vector<4x32xf32>
    %599 = arith.mulf %598, %595 : vector<4x32xf32>
    %cst_303 = arith.constant 1.000000e+00 : f32
    %600 = vector.broadcast %cst_303 : f32 to vector<4x32xf32>
    %601 = arith.subf %600, %598 : vector<4x32xf32>
    %602 = arith.mulf %601, %539 : vector<4x32xf32>
    %603 = arith.addf %599, %602 : vector<4x32xf32>
    %604 = arith.mulf %598, %593 : vector<4x32xf32>
    %cst_304 = arith.constant 1.000000e+00 : f32
    %605 = vector.broadcast %cst_304 : f32 to vector<4x32xf32>
    %606 = arith.subf %605, %598 : vector<4x32xf32>
    %607 = arith.mulf %606, %544 : vector<4x32xf32>
    %608 = arith.addf %604, %607 : vector<4x32xf32>
    %c4_i32_305 = arith.constant 4 : i32
    %609 = arith.muli %c5_i32, %c4_i32_305 : i32
    %610 = arith.index_cast %609 : i32 to index
    %c0_306 = arith.constant 0 : index
    %611 = vector.load %arg3[%610, %c0_306] : memref<32x32xf32, #tpu.memory_space<vmem>>, vector<4x32xf32>
    %612 = arith.mulf %611, %578 : vector<4x32xf32>
    %613 = arith.addf %549, %612 : vector<4x32xf32>
    %c4_i32_307 = arith.constant 4 : i32
    %614 = arith.muli %555, %c4_i32_307 : i32
    %615 = arith.index_cast %614 : i32 to index
    %c0_308 = arith.constant 0 : index
    %616 = vector.load %arg3[%615, %c0_308] : memref<32x32xf32, #tpu.memory_space<vmem>>, vector<4x32xf32>
    %617 = arith.mulf %616, %595 : vector<4x32xf32>
    %618 = arith.addf %554, %617 : vector<4x32xf32>
    %c6_i32 = arith.constant 6 : i32
    %c7_i32_309 = arith.constant 7 : i32
    %619 = arith.subi %c7_i32_309, %c6_i32 : i32
    %c4_i32_310 = arith.constant 4 : i32
    %620 = arith.muli %c6_i32, %c4_i32_310 : i32
    %621 = arith.index_cast %620 : i32 to index
    %c0_311 = arith.constant 0 : index
    %622 = vector.load %arg13[%621, %c0_311] : memref<32x128xf32, #tpu.memory_space<vmem>>, vector<4x128xf32>
    %c4_i32_312 = arith.constant 4 : i32
    %623 = arith.muli %619, %c4_i32_312 : i32
    %624 = arith.index_cast %623 : i32 to index
    %c0_313 = arith.constant 0 : index
    %625 = vector.load %arg14[%624, %c0_313] : memref<32x128xf32, #tpu.memory_space<vmem>>, vector<4x128xf32>
    %cst_314 = arith.constant dense<0.000000e+00> : vector<4x128xf32>
    %626 = tpu.matmul %578, %224, %cst_314 {dimension_numbers = #tpu.dot_dimension_numbers<[1], [0], [0], [1], [0, 0, 1, 1], [], []>} : vector<4x32xf32>, vector<32x128xf32>, vector<4x128xf32> -> vector<4x128xf32>
    %627 = arith.addf %622, %626 : vector<4x128xf32>
    %628 = arith.negf %627 : vector<4x128xf32>
    %629 = math.exp %628 : vector<4x128xf32>
    %cst_315 = arith.constant 1.000000e+00 : f32
    %630 = vector.broadcast %cst_315 : f32 to vector<4x128xf32>
    %631 = arith.addf %630, %629 : vector<4x128xf32>
    %632 = arith.divf %630, %631 : vector<4x128xf32>
    %633 = math.tanh %627 : vector<4x128xf32>
    %634 = vector.extract_strided_slice %632 {offsets = [0, 0], sizes = [4, 32], strides = [1, 1]} : vector<4x128xf32> to vector<4x32xf32>
    %635 = vector.extract_strided_slice %632 {offsets = [0, 32], sizes = [4, 32], strides = [1, 1]} : vector<4x128xf32> to vector<4x32xf32>
    %636 = vector.extract_strided_slice %633 {offsets = [0, 64], sizes = [4, 32], strides = [1, 1]} : vector<4x128xf32> to vector<4x32xf32>
    %637 = vector.extract_strided_slice %632 {offsets = [0, 96], sizes = [4, 32], strides = [1, 1]} : vector<4x128xf32> to vector<4x32xf32>
    %638 = arith.mulf %635, %576 : vector<4x32xf32>
    %639 = arith.mulf %634, %636 : vector<4x32xf32>
    %640 = arith.addf %638, %639 : vector<4x32xf32>
    %641 = math.tanh %640 : vector<4x32xf32>
    %642 = arith.mulf %637, %641 : vector<4x32xf32>
    %cst_316 = arith.constant dense<0.000000e+00> : vector<4x128xf32>
    %643 = tpu.matmul %603, %225, %cst_316 {dimension_numbers = #tpu.dot_dimension_numbers<[1], [0], [0], [1], [0, 0, 1, 1], [], []>} : vector<4x32xf32>, vector<32x128xf32>, vector<4x128xf32> -> vector<4x128xf32>
    %644 = arith.addf %625, %643 : vector<4x128xf32>
    %645 = arith.negf %644 : vector<4x128xf32>
    %646 = math.exp %645 : vector<4x128xf32>
    %cst_317 = arith.constant 1.000000e+00 : f32
    %647 = vector.broadcast %cst_317 : f32 to vector<4x128xf32>
    %648 = arith.addf %647, %646 : vector<4x128xf32>
    %649 = arith.divf %647, %648 : vector<4x128xf32>
    %650 = math.tanh %644 : vector<4x128xf32>
    %651 = vector.extract_strided_slice %649 {offsets = [0, 0], sizes = [4, 32], strides = [1, 1]} : vector<4x128xf32> to vector<4x32xf32>
    %652 = vector.extract_strided_slice %649 {offsets = [0, 32], sizes = [4, 32], strides = [1, 1]} : vector<4x128xf32> to vector<4x32xf32>
    %653 = vector.extract_strided_slice %650 {offsets = [0, 64], sizes = [4, 32], strides = [1, 1]} : vector<4x128xf32> to vector<4x32xf32>
    %654 = vector.extract_strided_slice %649 {offsets = [0, 96], sizes = [4, 32], strides = [1, 1]} : vector<4x128xf32> to vector<4x32xf32>
    %655 = arith.mulf %652, %608 : vector<4x32xf32>
    %656 = arith.mulf %651, %653 : vector<4x32xf32>
    %657 = arith.addf %655, %656 : vector<4x32xf32>
    %658 = math.tanh %657 : vector<4x32xf32>
    %659 = arith.mulf %654, %658 : vector<4x32xf32>
    %c4_i32_318 = arith.constant 4 : i32
    %660 = arith.muli %619, %c4_i32_318 : i32
    %661 = arith.index_cast %660 : i32 to index
    %c0_319 = arith.constant 0 : index
    %662 = vector.load %arg2[%661, %c0_319] : memref<32x32xf32, #tpu.memory_space<vmem>>, vector<4x32xf32>
    %663 = arith.mulf %662, %659 : vector<4x32xf32>
    %cst_320 = arith.constant 1.000000e+00 : f32
    %664 = vector.broadcast %cst_320 : f32 to vector<4x32xf32>
    %665 = arith.subf %664, %662 : vector<4x32xf32>
    %666 = arith.mulf %665, %603 : vector<4x32xf32>
    %667 = arith.addf %663, %666 : vector<4x32xf32>
    %668 = arith.mulf %662, %657 : vector<4x32xf32>
    %cst_321 = arith.constant 1.000000e+00 : f32
    %669 = vector.broadcast %cst_321 : f32 to vector<4x32xf32>
    %670 = arith.subf %669, %662 : vector<4x32xf32>
    %671 = arith.mulf %670, %608 : vector<4x32xf32>
    %672 = arith.addf %668, %671 : vector<4x32xf32>
    %c4_i32_322 = arith.constant 4 : i32
    %673 = arith.muli %c6_i32, %c4_i32_322 : i32
    %674 = arith.index_cast %673 : i32 to index
    %c0_323 = arith.constant 0 : index
    %675 = vector.load %arg3[%674, %c0_323] : memref<32x32xf32, #tpu.memory_space<vmem>>, vector<4x32xf32>
    %676 = arith.mulf %675, %642 : vector<4x32xf32>
    %677 = arith.addf %613, %676 : vector<4x32xf32>
    %c4_i32_324 = arith.constant 4 : i32
    %678 = arith.muli %619, %c4_i32_324 : i32
    %679 = arith.index_cast %678 : i32 to index
    %c0_325 = arith.constant 0 : index
    %680 = vector.load %arg3[%679, %c0_325] : memref<32x32xf32, #tpu.memory_space<vmem>>, vector<4x32xf32>
    %681 = arith.mulf %680, %659 : vector<4x32xf32>
    %682 = arith.addf %618, %681 : vector<4x32xf32>
    %c7_i32_326 = arith.constant 7 : i32
    %c7_i32_327 = arith.constant 7 : i32
    %683 = arith.subi %c7_i32_327, %c7_i32_326 : i32
    %c4_i32_328 = arith.constant 4 : i32
    %684 = arith.muli %c7_i32_326, %c4_i32_328 : i32
    %685 = arith.index_cast %684 : i32 to index
    %c0_329 = arith.constant 0 : index
    %686 = vector.load %arg13[%685, %c0_329] : memref<32x128xf32, #tpu.memory_space<vmem>>, vector<4x128xf32>
    %c4_i32_330 = arith.constant 4 : i32
    %687 = arith.muli %683, %c4_i32_330 : i32
    %688 = arith.index_cast %687 : i32 to index
    %c0_331 = arith.constant 0 : index
    %689 = vector.load %arg14[%688, %c0_331] : memref<32x128xf32, #tpu.memory_space<vmem>>, vector<4x128xf32>
    %cst_332 = arith.constant dense<0.000000e+00> : vector<4x128xf32>
    %690 = tpu.matmul %642, %224, %cst_332 {dimension_numbers = #tpu.dot_dimension_numbers<[1], [0], [0], [1], [0, 0, 1, 1], [], []>} : vector<4x32xf32>, vector<32x128xf32>, vector<4x128xf32> -> vector<4x128xf32>
    %691 = arith.addf %686, %690 : vector<4x128xf32>
    %692 = arith.negf %691 : vector<4x128xf32>
    %693 = math.exp %692 : vector<4x128xf32>
    %cst_333 = arith.constant 1.000000e+00 : f32
    %694 = vector.broadcast %cst_333 : f32 to vector<4x128xf32>
    %695 = arith.addf %694, %693 : vector<4x128xf32>
    %696 = arith.divf %694, %695 : vector<4x128xf32>
    %697 = math.tanh %691 : vector<4x128xf32>
    %698 = vector.extract_strided_slice %696 {offsets = [0, 0], sizes = [4, 32], strides = [1, 1]} : vector<4x128xf32> to vector<4x32xf32>
    %699 = vector.extract_strided_slice %696 {offsets = [0, 32], sizes = [4, 32], strides = [1, 1]} : vector<4x128xf32> to vector<4x32xf32>
    %700 = vector.extract_strided_slice %697 {offsets = [0, 64], sizes = [4, 32], strides = [1, 1]} : vector<4x128xf32> to vector<4x32xf32>
    %701 = vector.extract_strided_slice %696 {offsets = [0, 96], sizes = [4, 32], strides = [1, 1]} : vector<4x128xf32> to vector<4x32xf32>
    %702 = arith.mulf %699, %640 : vector<4x32xf32>
    %703 = arith.mulf %698, %700 : vector<4x32xf32>
    %704 = arith.addf %702, %703 : vector<4x32xf32>
    %705 = math.tanh %704 : vector<4x32xf32>
    %706 = arith.mulf %701, %705 : vector<4x32xf32>
    %cst_334 = arith.constant dense<0.000000e+00> : vector<4x128xf32>
    %707 = tpu.matmul %667, %225, %cst_334 {dimension_numbers = #tpu.dot_dimension_numbers<[1], [0], [0], [1], [0, 0, 1, 1], [], []>} : vector<4x32xf32>, vector<32x128xf32>, vector<4x128xf32> -> vector<4x128xf32>
    %708 = arith.addf %689, %707 : vector<4x128xf32>
    %709 = arith.negf %708 : vector<4x128xf32>
    %710 = math.exp %709 : vector<4x128xf32>
    %cst_335 = arith.constant 1.000000e+00 : f32
    %711 = vector.broadcast %cst_335 : f32 to vector<4x128xf32>
    %712 = arith.addf %711, %710 : vector<4x128xf32>
    %713 = arith.divf %711, %712 : vector<4x128xf32>
    %714 = math.tanh %708 : vector<4x128xf32>
    %715 = vector.extract_strided_slice %713 {offsets = [0, 0], sizes = [4, 32], strides = [1, 1]} : vector<4x128xf32> to vector<4x32xf32>
    %716 = vector.extract_strided_slice %713 {offsets = [0, 32], sizes = [4, 32], strides = [1, 1]} : vector<4x128xf32> to vector<4x32xf32>
    %717 = vector.extract_strided_slice %714 {offsets = [0, 64], sizes = [4, 32], strides = [1, 1]} : vector<4x128xf32> to vector<4x32xf32>
    %718 = vector.extract_strided_slice %713 {offsets = [0, 96], sizes = [4, 32], strides = [1, 1]} : vector<4x128xf32> to vector<4x32xf32>
    %719 = arith.mulf %716, %672 : vector<4x32xf32>
    %720 = arith.mulf %715, %717 : vector<4x32xf32>
    %721 = arith.addf %719, %720 : vector<4x32xf32>
    %722 = math.tanh %721 : vector<4x32xf32>
    %723 = arith.mulf %718, %722 : vector<4x32xf32>
    %c4_i32_336 = arith.constant 4 : i32
    %724 = arith.muli %683, %c4_i32_336 : i32
    %725 = arith.index_cast %724 : i32 to index
    %c0_337 = arith.constant 0 : index
    %726 = vector.load %arg2[%725, %c0_337] : memref<32x32xf32, #tpu.memory_space<vmem>>, vector<4x32xf32>
    %727 = arith.mulf %726, %723 : vector<4x32xf32>
    %cst_338 = arith.constant 1.000000e+00 : f32
    %728 = vector.broadcast %cst_338 : f32 to vector<4x32xf32>
    %729 = arith.subf %728, %726 : vector<4x32xf32>
    %730 = arith.mulf %729, %667 : vector<4x32xf32>
    %731 = arith.addf %727, %730 : vector<4x32xf32>
    %732 = arith.mulf %726, %721 : vector<4x32xf32>
    %cst_339 = arith.constant 1.000000e+00 : f32
    %733 = vector.broadcast %cst_339 : f32 to vector<4x32xf32>
    %734 = arith.subf %733, %726 : vector<4x32xf32>
    %735 = arith.mulf %734, %672 : vector<4x32xf32>
    %736 = arith.addf %732, %735 : vector<4x32xf32>
    %c4_i32_340 = arith.constant 4 : i32
    %737 = arith.muli %c7_i32_326, %c4_i32_340 : i32
    %738 = arith.index_cast %737 : i32 to index
    %c0_341 = arith.constant 0 : index
    %739 = vector.load %arg3[%738, %c0_341] : memref<32x32xf32, #tpu.memory_space<vmem>>, vector<4x32xf32>
    %740 = arith.mulf %739, %706 : vector<4x32xf32>
    %741 = arith.addf %677, %740 : vector<4x32xf32>
    %c4_i32_342 = arith.constant 4 : i32
    %742 = arith.muli %683, %c4_i32_342 : i32
    %743 = arith.index_cast %742 : i32 to index
    %c0_343 = arith.constant 0 : index
    %744 = vector.load %arg3[%743, %c0_343] : memref<32x32xf32, #tpu.memory_space<vmem>>, vector<4x32xf32>
    %745 = arith.mulf %744, %723 : vector<4x32xf32>
    %746 = arith.addf %682, %745 : vector<4x32xf32>
    %c8_i32 = arith.constant 8 : i32
    %747 = vector.extract_strided_slice %741 {offsets = [0, 0], sizes = [2, 32], strides = [1, 1]} : vector<4x32xf32> to vector<2x32xf32>
    %748 = vector.extract_strided_slice %741 {offsets = [2, 0], sizes = [2, 32], strides = [1, 1]} : vector<4x32xf32> to vector<2x32xf32>
    %749 = vector.extract_strided_slice %746 {offsets = [0, 0], sizes = [2, 32], strides = [1, 1]} : vector<4x32xf32> to vector<2x32xf32>
    %750 = vector.extract_strided_slice %746 {offsets = [2, 0], sizes = [2, 32], strides = [1, 1]} : vector<4x32xf32> to vector<2x32xf32>
    %751 = arith.addf %747, %748 : vector<2x32xf32>
    %752 = arith.addf %749, %750 : vector<2x32xf32>
    %753 = arith.subf %747, %748 : vector<2x32xf32>
    %754 = arith.mulf %753, %753 : vector<2x32xf32>
    %755 = arith.subf %749, %750 : vector<2x32xf32>
    %756 = arith.mulf %755, %755 : vector<2x32xf32>
    %757 = tpu.concatenate %751, %752, %754, %756 in 1 : vector<2x32xf32>, vector<2x32xf32>, vector<2x32xf32>, vector<2x32xf32> -> vector<2x128xf32>
    %c0_344 = arith.constant 0 : index
    %c0_345 = arith.constant 0 : index
    %758 = vector.load %arg8[%c0_344, %c0_345] : memref<128x32xf32, #tpu.memory_space<vmem>>, vector<128x32xf32>
    %cst_346 = arith.constant dense<0.000000e+00> : vector<2x32xf32>
    %759 = tpu.matmul %757, %758, %cst_346 {dimension_numbers = #tpu.dot_dimension_numbers<[1], [0], [0], [1], [0, 0, 1, 1], [], []>} : vector<2x128xf32>, vector<128x32xf32>, vector<2x32xf32> -> vector<2x32xf32>
    %c0_347 = arith.constant 0 : index
    %c0_348 = arith.constant 0 : index
    %760 = vector.load %arg9[%c0_347, %c0_348] : memref<1x32xf32, #tpu.memory_space<vmem>>, vector<1x32xf32>
    %761 = vector.broadcast %760 : vector<1x32xf32> to vector<2x32xf32>
    %762 = arith.addf %759, %761 : vector<2x32xf32>
    %c0_349 = arith.constant 0 : index
    %c0_350 = arith.constant 0 : index
    %763 = vector.load %arg10[%c0_349, %c0_350] : memref<32x2xf32, #tpu.memory_space<vmem>>, vector<32x2xf32>
    %cst_351 = arith.constant dense<0.000000e+00> : vector<2x2xf32>
    %764 = tpu.matmul %762, %763, %cst_351 {dimension_numbers = #tpu.dot_dimension_numbers<[1], [0], [0], [1], [0, 0, 1, 1], [], []>} : vector<2x32xf32>, vector<32x2xf32>, vector<2x2xf32> -> vector<2x2xf32>
    %c0_352 = arith.constant 0 : index
    %c0_353 = arith.constant 0 : index
    %765 = vector.load %arg11[%c0_352, %c0_353] : memref<1x2xf32, #tpu.memory_space<vmem>>, vector<1x2xf32>
    %766 = vector.broadcast %765 : vector<1x2xf32> to vector<2x2xf32>
    %767 = arith.addf %764, %766 : vector<2x2xf32>
    %768 = arith.negf %767 : vector<2x2xf32>
    %769 = math.exp %768 : vector<2x2xf32>
    %cst_354 = arith.constant 1.000000e+00 : f32
    %770 = vector.broadcast %cst_354 : f32 to vector<2x2xf32>
    %771 = arith.addf %770, %769 : vector<2x2xf32>
    %772 = arith.divf %770, %771 : vector<2x2xf32>
    %c0_355 = arith.constant 0 : index
    %c0_356 = arith.constant 0 : index
    %773 = vector.load %arg12[%c0_355, %c0_356] : memref<2x2xf32, #tpu.memory_space<vmem>>, vector<2x2xf32>
    tpu.vector_store %arg12[%c0_355, %c0_356], %772 {strides = array<i32>} : memref<2x2xf32, #tpu.memory_space<vmem>>, vector<2x2xf32>,
    return
  }
}

</mosaic_0001>

<bundles_post_ra>
// kernel: neg.2
= control target key start
LH: loop header
LB: loop body
LE: loop exit
PB: predicated region body
PF: predicated region fallthrough
CT: control target
= control target key end

     0   :  { %s24_s0 = inlined_call_operand.vmem [shape: s32[2], index: 0, kind: input, shape index: {}]   ;;  %s25_s1 = inlined_call_operand.vmem [shape: s32[2], index: 1, kind: output, shape index: {}]  }
   0x1   :  { %v2_v0 = vld [vmem:[%s24_s0] sm:$0x1] }
   0x2   :  { %v5_v1 = vsub.s32 0, %v2_v0 }
   0x4   :  { %7 = vst [vmem:[%s25_s1] sm:$0x1] %v5_v1 }

// kernel: semantic_sim_forward.1
= control target key start
LH: loop header
LB: loop body
LE: loop exit
PB: predicated region body
PF: predicated region fallthrough
CT: control target
= control target key end

     0   :  { %17 = vsyncpa [#allocation6], 0  ;;  %s4440_s0 = inlined_call_operand.vmem [shape: s32[4,8], index: 0, kind: input, shape index: {}]   ;;  %s4441_s1 = inlined_call_operand.vmem [shape: f32[56,256], index: 1, kind: input, shape index: {}]   ;;  %s4442_s2 = inlined_call_operand.vmem [shape: f32[32,32], index: 2, kind: input, shape index: {}]   ;;  %s4443_s3 = inlined_call_operand.vmem [shape: f32[32,32], index: 3, kind: input, shape index: {}]   ;;  %s4444_s4 = inlined_call_operand.vmem [shape: f32[2,4,32], index: 4, kind: input, shape index: {}]   ;;  %s4445_s5 = inlined_call_operand.vmem [shape: f32[2,4,32], index: 5, kind: input, shape index: {}]   ;;  %s4446_s6 = inlined_call_operand.vmem [shape: f32[32,128], index: 6, kind: input, shape index: {}]   ;;  %s4447_s7 = inlined_call_operand.vmem [shape: f32[32,128], index: 7, kind: input, shape index: {}]   ;;  %s4448_s8 = inlined_call_operand.vmem [shape: f32[128,32], index: 8, kind: input, shape index: {}]   ;;  %s4449_s9 = inlined_call_operand.vmem [shape: f32[1,32], index: 9, kind: input, shape index: {}]   ;;  %s4450_s10 = inlined_call_operand.vmem [shape: f32[32,2], index: 10, kind: input, shape index: {}]   ;;  %s4451_s11 = inlined_call_operand.vmem [shape: f32[1,2], index: 11, kind: input, shape index: {}]   ;;  %s4452_s12 = inlined_call_operand.hbm [shape: f32[2,2], index: 12, kind: output, shape index: {}]  }
   0x1   :  { %18 = vsyncpa [#allocation5], 0  ;;  %s25_s23 = sshll.u32 %s4440_s0, 4  ;;  %s26_s23 = int_to_ptr.vmem [resolvable:$true] %s25_s23 }
   0x2   :  { %s3410_s24 = scalar_lea.vmem %s26_s23, 64  ;;  %p3415_p1 = scmp.lt.s32.totalorder %s26_s23, %s26_s23 }
   0x3   :  { %p3411_p0 = scmp.ne.s32.totalorder %s26_s23, %s3410_s24  ;;  %p3416_p2 = scmp.lt.s32.totalorder %s3410_s24, %s3410_s24 }
   0x5   :  { %p3417_p3 = por %p3416_p2, %p3415_p1 }
   0x7   :  { %p3418_p4 = pnand %p3417_p3, %p3411_p0 }
   0x9   :  { %3421 = shalt.err (!%p3418_p4)
}
   0xa   :  { %s3446_s25 = smov [#allocation4]  }
   0xb   :  { %28 = dma.vmem_to_smem %s26_s23, 64, %s3446_s25, [#allocation6]  }
   0xc   :  { %3442 = dma.done.wait [#allocation6], 64  }
   0xd   :  { %3443 = vsyncadd [#allocation6], 4294967232 }
   0xe   :  { %54 = sfence }
   0xf   :  { %v3524_v0 = vld [vmem:[%s4446_s6 + $0x18] sm:$0xff]  ;;  %v3447_v1 = vmov 0.0   ;;  %v3530_v2 = vld [vmem:[%s4446_s6 + $0x10] sm:$0xff]  ;;  %vm3448_vm0 = vmmov 0   ;;  %s3535_s29 = sld [smem:[#allocation4]]  ;;  %v3542_v3 = vld [vmem:[%s4446_s6 + $0x8] sm:$0xff]  ;;  %v67_v19 = vlaneseq }
  0x10   :  { %3039 = vmatprep.subr.mxu1 %v3447_v1  ;;  %3047 = vmatprep.mubr.msk.f32.mxu1 %vm3448_vm0, %v3447_v1  ;;  %v2868_v4 = vld [vmem:[%s4445_s5 + $0x4] sm:$0xf]  ;;  %v3550_v5 = vld [vmem:[%s4442_s2 + $0x1c] sm:$0xf]  ;;  %s3449_s18 = smov 32   ;;  %s3556_s19 = sld [smem:[#allocation4 + $0x80]] }
  0x11   :  { %3040 = vmatpush3.msra.mxu1 %v3524_v0  ;;  %3061 = vmatprep.subr.mxu0 %v3447_v1  ;;  %v858_v6 = vsub.f32 1.0, %v3550_v5  ;;  %v3562_v7 = vld [vmem:[%s4446_s6] sm:$0xff]  ;;  %s3564_s22 = sld [smem:[#allocation4 + $0x100]]  ;;  %vm647_vm1 = vcmask 261120   ;;  %v3580_v10 = vld [vmem:[%s4447_s7 + $0x18] sm:$0xff]  ;;  %v3594_v11 = vld [vmem:[%s4447_s7 + $0x10] sm:$0xff] }
  0x12   :  { %3041 = vmatprep.subr.mxu1 %v3447_v1  ;;  %3062 = vmatpush3.msra.mxu0 %v3524_v0  ;;  %v639_v8 = vld [vmem:[%s4444_s4] sm:$0xf]  ;;  %s3582_s27 = sld [smem:[#allocation4 + $0x180]]  ;;  %v3604_v12 = vld [vmem:[%s4447_s7 + $0x8] sm:$0xff]  ;;  %v3630_v15 = vld [vmem:[%s4444_s4 + $0x4] sm:$0xf] }
  0x13   :  { %3042 = vmatpush3.msra.mxu1 %v3530_v2  ;;  %832 = vrot.lane.b32.xlu1 %v2868_v4, %s3449_s18  ;;  %v3573_v9 = vmul.f32 %v2868_v4, %v858_v6  ;;  %v3620_v14 = vld [vmem:[%s4447_s7] sm:$0xff]  ;;  %s2861_s13 = sld [smem:[#allocation4 + $0x107]]  ;;  %v68_v20 = vshrl.u32 %v67_v19, 7  ;;  %vm2472_vm2 = vcmask 523264   ;;  %vm2474_vm3 = vcmask 785408  }
  0x14   :  { %3043 = vmatprep.subr.mxu1 %v3447_v1  ;;  %3063 = vmatprep.subr.mxu0 %v3447_v1  ;;  %v640_v40 = vld [vmem:[%s4445_s5] sm:$0xf]  ;;  %s2783_s5 = sld [smem:[#allocation4 + $0x1]]  ;;  %vm2659_vm4 = vcmask 9216  }
  0x15   :  { %3044 = vmatpush3.msra.mxu1 %v3542_v3  ;;  %3064 = vmatpush3.msra.mxu0 %v3530_v2  ;;  %s56_s0 = sshra.s32 %s3535_s29, 3  ;;  %s59_s28 = sand.u32 7, %s3535_s29  ;;  %v3670_v21 = vsub.s32 1, %v68_v20 }
  0x16   :  { %3045 = vmatprep.subr.mxu1 %v3447_v1  ;;  %3065 = vmatprep.subr.mxu0 %v3447_v1  ;;  %s2905_s14 = sshll.u32 %s56_s0, 4  ;;  %s74_s29 = sshra.s32 %s3556_s19, 3 }
  0x17   :  { %3046 = vmatpush3.msra.mxu1 %v3562_v7  ;;  %3066 = vmatpush3.msra.mxu0 %v3542_v3  ;;  %s62_s15 = sadd.s32 %s2905_s14, %s59_s28  ;;  %s77_s24 = sand.u32 7, %s3556_s19 }
  0x18   :  { %3048 = vmatmul.mubr.msk.f32.vlgmr.msra.gmra.mxu1 %vm647_vm1, %v639_v8  ;;  %3050 = vmatprep.subr.mxu1 %v3447_v1  ;;  %s63_s23 = scalar_lea.vmem %s4441_s1, %s62_s15  ;;  %s2906_s25 = sshll.u32 %s74_s29, 4 }
  0x19   :  { %3051 = vmatpush3.msra.mxu1 %v3580_v10  ;;  %3058 = vmatprep.mubr.msk.f32.mxu1 %vm3448_vm0, %v3447_v1  ;;  %v3612_v13 = vld [vmem:[%s63_s23] ss:$8 sm:$0x3]  ;;  %s92_s26 = sshra.s32 %s3564_s22, 3  ;;  %s80_s19 = sadd.s32 %s2906_s25, %s77_s24 }
  0x1a   :  { %3052 = vmatprep.subr.mxu1 %v3447_v1  ;;  %3067 = vmatprep.subr.mxu0 %v3447_v1  ;;  %65 = vst [vmem:[#allocation2] sm:$0x1] %v3612_v13  ;;  %s95_s30 = sand.u32 7, %s3564_s22  ;;  %s81_s16 = scalar_lea.vmem %s4441_s1, %s80_s19 }
  0x1b   :  { %3053 = vmatpush3.msra.mxu1 %v3594_v11  ;;  %3068 = vmatpush3.msra.mxu0 %v3562_v7  ;;  %s2907_s17 = sshll.u32 %s92_s26, 4  ;;  %v3637_v16 = vld [vmem:[%s81_s16] ss:$8 sm:$0x3]  ;;  %s110_s20 = sshra.s32 %s3582_s27, 3 }
  0x1c   :  { %3054 = vmatprep.subr.mxu1 %v3447_v1  ;;  %3069 = vmatprep.mubr.msk.f32.mxu0 %vm3448_vm0, %v3447_v1  ;;  %s98_s22 = sadd.s32 %s2907_s17, %s95_s30  ;;  %83 = vst [vmem:[#allocation2 + $0x1] sm:$0x1] %v3637_v16  ;;  %s113_s24 = sand.u32 7, %s3582_s27 }
  0x1d   :  { %3055 = vmatpush3.msra.mxu1 %v3604_v12  ;;  %3083 = vmatprep.subr.mxu0 %v3447_v1  ;;  %s99_s23 = scalar_lea.vmem %s4441_s1, %s98_s22  ;;  %s2908_s25 = sshll.u32 %s110_s20, 4 }
  0x1e   :  { %3056 = vmatprep.subr.mxu1 %v3447_v1  ;;  %v3648_v17 = vld [vmem:[%s99_s23] ss:$8 sm:$0x3]  ;;  %s116_s26 = sadd.s32 %s2908_s25, %s113_s24  ;;  %s2855_s19 = sld [smem:[#allocation4 + $0x7]] }
  0x1f   :  { %3057 = vmatpush3.msra.mxu1 %v3620_v14  ;;  %101 = vst [vmem:[#allocation2 + $0x2] sm:$0x1] %v3648_v17  ;;  %s117_s27 = scalar_lea.vmem %s4441_s1, %s116_s26  ;;  %s2858_s30 = sld [smem:[#allocation4 + $0x87]] }
  0x20   :  { %3059 = vmatmul.mubr.msk.f32.vlgmr.msra.gmra.mxu1 %vm647_vm1, %v3630_v15  ;;  %3072 = vmatprep.subr.mxu1 %v3447_v1  ;;  %v3659_v18 = vld [vmem:[%s117_s27] ss:$8 sm:$0x3]  ;;  %s3668_s14 = sld [smem:[#allocation4 + $0x187]]  ;;  %s596_s25 = sshra.s32 %s2861_s13, 3 }
  0x21   :  { %3073 = vmatpush3.msra.mxu1 %v3580_v10  ;;  %3080 = vmatprep.mubr.msk.f32.mxu1 %vm3448_vm0, %v3447_v1  ;;  %119 = vst [vmem:[#allocation2 + $0x3] sm:$0x1] %v3659_v18  ;;  %s599_s0 = sand.u32 7, %s2861_s13  ;;  %s3703_s28 = sld [smem:[#allocation4 + $0x101]] }
  0x22   :  { %3074 = vmatprep.subr.mxu1 %v3447_v1  ;;  %s3705_s27 = sld [smem:[#allocation4 + $0x181]] }
  0x23   :  { %3075 = vmatpush3.msra.mxu1 %v3594_v11 }
  0x24   :  { %3076 = vmatprep.subr.mxu1 %v3447_v1  ;;  %s560_s15 = sshra.s32 %s2855_s19, 3  ;;  %s563_s29 = sand.u32 7, %s2855_s19 }
  0x25   :  { %3077 = vmatpush3.msra.mxu1 %v3604_v12  ;;  %s2933_s16 = sshll.u32 %s560_s15, 4  ;;  %s578_s22 = sshra.s32 %s2858_s30, 3 }
  0x26   :  { %3078 = vmatprep.subr.mxu1 %v3447_v1  ;;  %s566_s17 = sadd.s32 %s2933_s16, %s563_s29  ;;  %s581_s23 = sand.u32 7, %s2858_s30 }
  0x27   :  { %3079 = vmatpush3.msra.mxu1 %v3620_v14  ;;  %s567_s4 = scalar_lea.vmem %s4441_s1, %s566_s17  ;;  %s2934_s24 = sshll.u32 %s578_s22, 4 }
  0x28   :  { %3094 = vmatprep.subr.mxu1 %v3447_v1  ;;  %v568_v22 = vld [vmem:[%s567_s4] ss:$8 sm:$0x3]  ;;  %s584_s26 = sadd.s32 %s2934_s24, %s581_s23  ;;  %s2935_s15 = sshll.u32 %s596_s25, 4 }
  0x29   :  { %v574_v23 = vrot.slane %v568_v22, %v3670_v21  ;;  %569 = vst [vmem:[#allocation2 + $0x1c] sm:$0x1] %v568_v22  ;;  %s585_s19 = scalar_lea.vmem %s4441_s1, %s584_s26  ;;  %s602_s29 = sadd.s32 %s2935_s15, %s599_s0  ;;  %v645_v33 = vld [vmem:[#allocation2] sm:$0xf] }
  0x2a   :  { %v586_v24 = vld [vmem:[%s585_s19] ss:$8 sm:$0x3]  ;;  %s614_s16 = sshra.s32 %s3668_s14, 3  ;;  %s603_s22 = scalar_lea.vmem %s4441_s1, %s602_s29 }
  0x2b   :  { %576 = vst [vmem:[#allocation3 + $0x1c] sm:$0x1] %v574_v23  ;;  %v592_v25 = vrot.slane %v586_v24, %v3670_v21  ;;  %s617_s20 = sand.u32 7, %s3668_s14  ;;  %587 = vst [vmem:[#allocation2 + $0x1d] sm:$0x1] %v586_v24  ;;  %s2936_s13 = sshll.u32 %s614_s16, 4 }
  0x2c   :  { %v604_v26 = vld [vmem:[%s603_s22] ss:$8 sm:$0x3]  ;;  %s620_s21 = sadd.s32 %s2936_s13, %s617_s20  ;;  %s3450_s14 = smov 64  }
  0x2d   :  { %594 = vst [vmem:[#allocation3 + $0x1d] sm:$0x1] %v592_v25  ;;  %v610_v27 = vrot.slane %v604_v26, %v3670_v21  ;;  %605 = vst [vmem:[#allocation2 + $0x1e] sm:$0x1] %v604_v26  ;;  %s621_s24 = scalar_lea.vmem %s4441_s1, %s620_s21  ;;  %s2786_s0 = sld [smem:[#allocation4 + $0x81]]  ;;  %v859_v25 = vmul.f32 %v3630_v15, %v858_v6 }
  0x2e   :  { %v622_v28 = vld [vmem:[%s621_s24] ss:$8 sm:$0x3]  ;;  %s128_s19 = sshra.s32 %s2783_s5, 3  ;;  %s131_s15 = sand.u32 7, %s2783_s5 }
  0x2f   :  { %612 = vst [vmem:[#allocation3 + $0x1e] sm:$0x1] %v610_v27  ;;  %v628_v29 = vrot.slane %v622_v28, %v3670_v21  ;;  %623 = vst [vmem:[#allocation2 + $0x1f] sm:$0x1] %v622_v28  ;;  %s2909_s29 = sshll.u32 %s128_s19, 4  ;;  %s164_s23 = sshra.s32 %s3703_s28, 3 }
  0x30   :  { %s134_s30 = sadd.s32 %s2909_s29, %s131_s15  ;;  %s3451_s24 = smov 96  }
  0x31   :  { %630 = vst [vmem:[#allocation3 + $0x1f] sm:$0x1] %v628_v29  ;;  %s135_s13 = scalar_lea.vmem %s4441_s1, %s134_s30  ;;  %s2911_s19 = sshll.u32 %s164_s23, 4 }
  0x32   :  { %v3711_v20 = vld [vmem:[%s135_s13] ss:$8 sm:$0x3]  ;;  %s182_s15 = sshra.s32 %s3705_s27, 3  ;;  %s2846_s23 = sld [smem:[#allocation4 + $0x86]] }
  0x33   :  { %s146_s16 = sshra.s32 %s2786_s0, 3  ;;  %s149_s17 = sand.u32 7, %s2786_s0  ;;  %137 = vst [vmem:[#allocation2 + $0x4] sm:$0x1] %v3711_v20 }
  0x34   :  { %s2910_s21 = sshll.u32 %s146_s16, 4  ;;  %s167_s0 = sand.u32 7, %s3703_s28 }
  0x35   :  { %s152_s4 = sadd.s32 %s2910_s21, %s149_s17  ;;  %s170_s29 = sadd.s32 %s2911_s19, %s167_s0 }
  0x36   :  { %s153_s5 = scalar_lea.vmem %s4441_s1, %s152_s4  ;;  %s185_s16 = sand.u32 7, %s3705_s27 }
  0x37   :  { %v3721_v22 = vld [vmem:[%s153_s5] ss:$8 sm:$0x3]  ;;  %s171_s22 = scalar_lea.vmem %s4441_s1, %s170_s29  ;;  %s2912_s20 = sshll.u32 %s182_s15, 4 }
  0x38   :  { %v646_v32 = vld [vmem:[#allocation3 + $0x1c] sm:$0xf]  ;;  %155 = vst [vmem:[#allocation2 + $0x5] sm:$0x1] %v3721_v22  ;;  %s188_s13 = sadd.s32 %s2912_s20, %s185_s16  ;;  %s2843_s27 = sld [smem:[#allocation4 + $0x6]] }
  0x39   :  { %v3729_v23 = vld [vmem:[%s171_s22] ss:$8 sm:$0x3]  ;;  %s189_s4 = scalar_lea.vmem %s4441_s1, %s188_s13  ;;  %s2849_s25 = sld [smem:[#allocation4 + $0x106]] }
  0x3a   :  { %173 = vst [vmem:[#allocation2 + $0x6] sm:$0x1] %v3729_v23  ;;  %v3735_v24 = vld [vmem:[%s189_s4] ss:$8 sm:$0x3]  ;;  %s3773_s26 = sld [smem:[#allocation4 + $0x186]] }
  0x3b   :  { %191 = vst [vmem:[#allocation2 + $0x7] sm:$0x1] %v3735_v24  ;;  %s506_s29 = sshra.s32 %s2846_s23, 3  ;;  %s509_s22 = sand.u32 7, %s2846_s23 }
  0x3c   :  { %s2930_s20 = sshll.u32 %s506_s29, 4  ;;  %s3809_s4 = sld [smem:[#allocation4 + $0x182]] }
  0x3d   :  { %s512_s21 = sadd.s32 %s2930_s20, %s509_s22 }
  0x3e   :  { %s488_s5 = sshra.s32 %s2843_s27, 3  ;;  %s491_s0 = sand.u32 7, %s2843_s27 }
  0x3f   :  { %s2929_s19 = sshll.u32 %s488_s5, 4  ;;  %s524_s13 = sshra.s32 %s2849_s25, 3 }
  0x40   :  { %s494_s15 = sadd.s32 %s2929_s19, %s491_s0  ;;  %s527_s28 = sand.u32 7, %s2849_s25 }
  0x41   :  { %s495_s17 = scalar_lea.vmem %s4441_s1, %s494_s15  ;;  %s513_s5 = scalar_lea.vmem %s4441_s1, %s512_s21 }
  0x42   :  { %v496_v6 = vld [vmem:[%s495_s17] ss:$8 sm:$0x3]  ;;  %s2931_s0 = sshll.u32 %s524_s13, 4  ;;  %s542_s16 = sshra.s32 %s3773_s26, 3 }
  0x43   :  { %v502_v15 = vrot.slane %v496_v6, %v3670_v21  ;;  %497 = vst [vmem:[#allocation2 + $0x18] sm:$0x1] %v496_v6  ;;  %s530_s19 = sadd.s32 %s2931_s0, %s527_s28  ;;  %s545_s30 = sand.u32 7, %s3773_s26 }
  0x44   :  { %s531_s29 = scalar_lea.vmem %s4441_s1, %s530_s19  ;;  %s2932_s25 = sshll.u32 %s542_s16, 4 }
  0x45   :  { %504 = vst [vmem:[#allocation3 + $0x18] sm:$0x1] %v502_v15  ;;  %s548_s17 = sadd.s32 %s2932_s25, %s545_s30  ;;  %s2795_s26 = sld [smem:[#allocation4 + $0x2]] }
  0x46   :  { %s549_s13 = scalar_lea.vmem %s4441_s1, %s548_s17  ;;  %s2798_s21 = sld [smem:[#allocation4 + $0x82]] }
  0x47   :  { %s2801_s28 = sld [smem:[#allocation4 + $0x102]] }
  0x4b   :  { %s200_s27 = sshra.s32 %s2795_s26, 3 }
  0x4c   :  { %s2913_s0 = sshll.u32 %s200_s27, 4  ;;  %s218_s19 = sshra.s32 %s2798_s21, 3 }
  0x4d   :  { %s221_s23 = sand.u32 7, %s2798_s21  ;;  %s2914_s25 = sshll.u32 %s218_s19, 4 }
  0x4e   :  { %s224_s17 = sadd.s32 %s2914_s25, %s221_s23  ;;  %s236_s22 = sshra.s32 %s2801_s28, 3 }
  0x4f   :  { %s239_s27 = sand.u32 7, %s2801_s28  ;;  %s2915_s21 = sshll.u32 %s236_s22, 4 }
  0x50   :  { %s257_s19 = sand.u32 7, %s3809_s4 }
  0x85   :  { %v833_v53 = vpop.permute.xlu1 %832 }
  0xd8   :  { %v717_v30 = vpop.f32.mrf.mxu1 }
  0xd9   :  { %v721_v37 = vadd.f32 %v717_v30, %v645_v33  ;;  %v514_v30 = vld [vmem:[%s513_s5] ss:$8 sm:$0x3]  ;;  %s203_s5 = sand.u32 7, %s2795_s26  ;;  %s225_s26 = scalar_lea.vmem %s4441_s1, %s224_s17 }
  0xda   :  { %v3049_v31 = vpop.f32.mrf.mxu1  ;;  %515 = vst [vmem:[#allocation2 + $0x19] sm:$0x1] %v514_v30  ;;  %s206_s16 = sadd.s32 %s2913_s0, %s203_s5  ;;  %s254_s5 = sshra.s32 %s3809_s4, 3 }
  0xdb   :  { %v2870_v42 = vmul.f32 -1.442695, %v721_v37  ;;  %v520_v31 = vrot.slane %v514_v30, %v3670_v21  ;;  %s207_s30 = scalar_lea.vmem %s4441_s1, %s206_s16  ;;  %s242_s0 = sadd.s32 %s2915_s21, %s239_s27 }
  0xdc   :  { %s243_s15 = scalar_lea.vmem %s4441_s1, %s242_s0  ;;  %s2831_s21 = sld [smem:[#allocation4 + $0x5]] }
  0xdd   :  { %522 = vst [vmem:[#allocation3 + $0x19] sm:$0x1] %v520_v31  ;;  %v3816_v31 = vld [vmem:[%s207_s30] ss:$8 sm:$0x3]  ;;  %s2837_s0 = sld [smem:[#allocation4 + $0x105]] }
  0xde   :  { %209 = vst [vmem:[#allocation2 + $0x8] sm:$0x1] %v3816_v31  ;;  %s2816_s27 = sld [smem:[#allocation4 + $0x183]] }
  0xe0   :  { %v819_v34 = vpop.f32.mrf.mxu1 }
  0xe1   :  { %v823_v35 = vadd.f32 %v819_v34, %v646_v32  ;;  %v532_v32 = vld [vmem:[%s531_s29] ss:$8 sm:$0x3]  ;;  %s2916_s29 = sshll.u32 %s254_s5, 4  ;;  %s2834_s5 = sld [smem:[#allocation4 + $0x85]] }
  0xe2   :  { %v3060_v36 = vpop.f32.mrf.mxu1  ;;  %v538_v33 = vrot.slane %v532_v32, %v3670_v21  ;;  %533 = vst [vmem:[#allocation2 + $0x1a] sm:$0x1] %v532_v32  ;;  %v550_v34 = vld [vmem:[%s549_s13] ss:$8 sm:$0x3]  ;;  %s260_s30 = sadd.s32 %s2916_s29, %s257_s19  ;;  %s3887_s19 = sld [smem:[#allocation4 + $0x185]] }
  0xe3   :  { %3268 = vtanh.f32 %v823_v35  ;;  %v2872_v41 = vmul.f32 -1.442695, %v823_v35  ;;  %v556_v35 = vrot.slane %v550_v34, %v3670_v21  ;;  %551 = vst [vmem:[#allocation2 + $0x1b] sm:$0x1] %v550_v34  ;;  %v878_v36 = vld [vmem:[#allocation2 + $0x4] sm:$0xf]  ;;  %s261_s17 = scalar_lea.vmem %s4441_s1, %s260_s30 }
  0xe4   :  { %3270 = vtanh.f32 %v721_v37  ;;  %540 = vst [vmem:[#allocation3 + $0x1a] sm:$0x1] %v538_v33  ;;  %v3823_v32 = vld [vmem:[%s225_s26] ss:$8 sm:$0x3]  ;;  %s416_s16 = sshra.s32 %s2831_s21, 3 }
  0xe5   :  { %3272 = vpow2.f32 %v2872_v41  ;;  %558 = vst [vmem:[#allocation3 + $0x1b] sm:$0x1] %v556_v35  ;;  %227 = vst [vmem:[#allocation2 + $0x9] sm:$0x1] %v3823_v32  ;;  %v3843_v35 = vld [vmem:[%s4442_s2 + $0x18] sm:$0xf] }
  0xe6   :  { %3274 = vpow2.f32 %v2870_v42  ;;  %v3831_v33 = vld [vmem:[%s243_s15] ss:$8 sm:$0x3]  ;;  %s419_s23 = sand.u32 7, %s2831_s21  ;;  %s2925_s15 = sshll.u32 %s416_s16, 4 }
  0xe7   :  { %245 = vst [vmem:[#allocation2 + $0xa] sm:$0x1] %v3831_v33  ;;  %v3837_v34 = vld [vmem:[%s261_s17] ss:$8 sm:$0x3]  ;;  %s422_s29 = sadd.s32 %s2925_s15, %s419_s23  ;;  %s434_s30 = sshra.s32 %s2834_s5, 3 }
  0xe8   :  { %263 = vst [vmem:[#allocation2 + $0xb] sm:$0x1] %v3837_v34  ;;  %s423_s17 = scalar_lea.vmem %s4441_s1, %s422_s29  ;;  %s437_s22 = sand.u32 7, %s2834_s5 }
  0xe9   :  { %s2926_s4 = sshll.u32 %s434_s30, 4  ;;  %s452_s20 = sshra.s32 %s2837_s0, 3 }
  0xea   :  { %s440_s13 = sadd.s32 %s2926_s4, %s437_s22  ;;  %s455_s26 = sand.u32 7, %s2837_s0 }
  0xeb   :  { %s441_s16 = scalar_lea.vmem %s4441_s1, %s440_s13  ;;  %s2927_s23 = sshll.u32 %s452_s20, 4 }
  0xec   :  { %v879_v37 = vld [vmem:[#allocation3 + $0x18] sm:$0xf]  ;;  %s458_s15 = sadd.s32 %s2927_s23, %s455_s26  ;;  %s470_s25 = sshra.s32 %s3887_s19, 3 }
  0xed   :  { %s459_s30 = scalar_lea.vmem %s4441_s1, %s458_s15  ;;  %s473_s28 = sand.u32 7, %s3887_s19 }
  0xee   :  { %s2928_s0 = sshll.u32 %s470_s25, 4  ;;  %s2807_s19 = sld [smem:[#allocation4 + $0x3]] }
  0xef   :  { %s2810_s13 = sld [smem:[#allocation4 + $0x83]] }
  0xf0   :  { %v3269_v38 = vpop.eup %3268  ;;  %s2813_s26 = sld [smem:[#allocation4 + $0x103]] }
  0xf1   :  { %837 = vrot.lane.b32.xlu0 %v3269_v38, %s3450_s14  ;;  %v3271_v39 = vpop.eup %3270  ;;  %s4034_s4 = sld [smem:[#allocation4 + $0x184]] }
  0xf2   :  { %v3273_v43 = vpop.eup %3272 }
  0xf3   :  { %v827_v44 = vadd.f32 1.0, %v3273_v43  ;;  %v3275_v45 = vpop.eup %3274 }
  0xf4   :  { %v725_v46 = vadd.f32 1.0, %v3275_v45  ;;  %s272_s21 = sshra.s32 %s2807_s19, 3 }
  0xf5   :  { %735 = vrot.lane.b32.xlu0 %v3271_v39, %s3450_s14  ;;  %3276 = vrcp.f32 %v827_v44  ;;  %s2917_s23 = sshll.u32 %s272_s21, 4  ;;  %s290_s15 = sshra.s32 %s2810_s13, 3 }
  0xf6   :  { %3278 = vrcp.f32 %v725_v46  ;;  %s293_s5 = sand.u32 7, %s2810_s13  ;;  %s308_s22 = sshra.s32 %s2813_s26, 3 }
  0xf7   :  { %s311_s21 = sand.u32 7, %s2813_s26  ;;  %s2919_s13 = sshll.u32 %s308_s22, 4 }
  0xf8   :  { %s2822_s22 = sld [smem:[#allocation4 + $0x84]] }
  0xf9   :  { %730 = vrot.lane.b32.xlu0 %v640_v40, %s3449_s18 }
 0x102   :  { %v3277_v47 = vpop.eup %3276 }
 0x103   :  { %v3279_v50 = vpop.eup %3278  ;;  %v835_v54 = vmul.f32 %v3277_v47, %v833_v53 }
 0x163   :  { %v838_v48 = vpop.permute.xlu0 %837 }
 0x164   :  { %v840_v49 = vmul.f32 %v3277_v47, %v838_v48 }
 0x166   :  { %842 = vrot.lane.b32.xlu1 %v840_v49, %s3449_s18 }
 0x167   :  { %v736_v51 = vpop.permute.xlu0 %735 }
 0x168   :  { %v738_v52 = vmul.f32 %v3279_v50, %v736_v51 }
 0x16a   :  { %740 = vrot.lane.b32.xlu1 %v738_v52, %s3449_s18 }
 0x16b   :  { %v731_v55 = vpop.permute.xlu0 %730 }
 0x16c   :  { %v733_v58 = vmul.f32 %v3279_v50, %v731_v55 }
 0x1d8   :  { %v843_v56 = vpop.permute.xlu1 %842 }
 0x1d9   :  { %v845_v57 = vadd.f32 %v843_v56, %v835_v54 }
 0x1db   :  { %3280 = vtanh.f32 %v845_v57 }
 0x1dc   :  { %v741_v59 = vpop.permute.xlu1 %740 }
 0x1dd   :  { %v3698_v60 = vadd.f32 %v741_v59, %v733_v58 }
 0x1df   :  { %3282 = vtanh.f32 %v3698_v60 }
 0x1e8   :  { %v3281_v61 = vpop.eup %3280 }
 0x1e9   :  { %848 = vrot.lane.b32.xlu0 %v3281_v61, %s3450_s14 }
 0x1ec   :  { %v3283_v62 = vpop.eup %3282 }
 0x1ed   :  { %746 = vrot.lane.b32.xlu1 %v3283_v62, %s3450_s14 }
 0x25b   :  { %v849_v63 = vpop.permute.xlu0 %848 }
 0x25c   :  { %v851_v4 = vmul.f32 %v3277_v47, %v849_v63 }
 0x25e   :  { %854 = vrot.lane.b32.xlu0 %v851_v4, %s3449_s18 }
 0x25f   :  { %v747_v8 = vpop.permute.xlu1 %746 }
 0x260   :  { %v749_v19 = vmul.f32 %v3279_v50, %v747_v8 }
 0x262   :  { %862 = vrot.lane.b32.xlu0 %v845_v57, %s3451_s24  ;;  %870 = vrot.lane.b32.xlu1 %v749_v19, %s3449_s18 }
 0x2d0   :  { %v3741_v26 = vpop.permute.xlu0 %854 }
 0x2d1   :  { %v857_v27 = vmul.f32 %v3741_v26, %v3550_v5 }
 0x2d3   :  { %v3745_v28 = vadd.f32 %v859_v25, %v857_v27 }
 0x2d4   :  { %v3747_v29 = vpop.permute.xlu1 %870  ;;  %v863_v44 = vpop.permute.xlu0 %862 }
 0x2d5   :  { %3070 = vmatmul.mubr.msk.f32.vlgmr.msra.gmra.mxu0 %vm647_vm1, %v3747_v29  ;;  %3081 = vmatmul.mubr.msk.f32.vlgmr.msra.gmra.mxu1 %vm647_vm1, %v3745_v28  ;;  %v865_v46 = vmul.f32 %v863_v44, %v3550_v5 }
 0x2d6   :  { %3084 = vmatpush3.msra.mxu0 %v3524_v0  ;;  %3095 = vmatpush3.msra.mxu1 %v3580_v10 }
 0x2d7   :  { %3085 = vmatprep.subr.mxu0 %v3447_v1  ;;  %3096 = vmatprep.subr.mxu1 %v3447_v1  ;;  %v3797_v48 = vadd.f32 %v3573_v9, %v865_v46 }
 0x2d8   :  { %3086 = vmatpush3.msra.mxu0 %v3530_v2  ;;  %3091 = vmatprep.mubr.msk.f32.mxu0 %vm3448_vm0, %v3447_v1 }
 0x2d9   :  { %3087 = vmatprep.subr.mxu0 %v3447_v1  ;;  %3097 = vmatpush3.msra.mxu1 %v3594_v11 }
 0x2da   :  { %3088 = vmatpush3.msra.mxu0 %v3542_v3  ;;  %3098 = vmatprep.subr.mxu1 %v3447_v1 }
 0x2db   :  { %3089 = vmatprep.subr.mxu0 %v3447_v1  ;;  %3099 = vmatpush3.msra.mxu1 %v3604_v12 }
 0x2dc   :  { %3090 = vmatpush3.msra.mxu0 %v3562_v7  ;;  %3100 = vmatprep.subr.mxu1 %v3447_v1 }
 0x2dd   :  { %3101 = vmatpush3.msra.mxu1 %v3620_v14  ;;  %3102 = vmatprep.mubr.msk.f32.mxu1 %vm3448_vm0, %v3447_v1 }
 0x2de   :  { %3105 = vmatprep.subr.mxu0 %v3447_v1  ;;  %3116 = vmatprep.subr.mxu1 %v3447_v1 }
 0x395   :  { %v948_v38 = vpop.f32.mrf.mxu0  ;;  %v1046_v39 = vpop.f32.mrf.mxu1 }
 0x396   :  { %v952_v40 = vadd.f32 %v948_v38, %v878_v36  ;;  %v1050_v41 = vadd.f32 %v1046_v39, %v879_v37  ;;  %v1085_v36 = vsub.f32 1.0, %v3843_v35  ;;  %v875_v37 = vld [vmem:[%s4443_s3 + $0x1c] sm:$0xf]  ;;  %v1102_v38 = vld [vmem:[%s4443_s3 + $0x18] sm:$0xf] }
 0x397   :  { %v3071_v42 = vpop.f32.mrf.mxu0  ;;  %v3082_v43 = vpop.f32.mrf.mxu1 }
 0x398   :  { %3284 = vtanh.f32 %v952_v40  ;;  %v2874_v49 = vmul.f32 -1.442695, %v952_v40  ;;  %v2876_v50 = vmul.f32 -1.442695, %v1050_v41  ;;  %v1086_v42 = vmul.f32 %v1085_v36, %v3745_v28  ;;  %v1105_v28 = vld [vmem:[#allocation2 + $0x8] sm:$0xf] }
 0x399   :  { %3286 = vtanh.f32 %v1050_v41  ;;  %v876_v41 = vmul.f32 %v875_v37, %v3741_v26 }
 0x39a   :  { %3288 = vpow2.f32 %v2874_v49 }
 0x39b   :  { %3290 = vpow2.f32 %v2876_v50 }
 0x3a5   :  { %v3285_v45 = vpop.eup %3284 }
 0x3a6   :  { %v3287_v47 = vpop.eup %3286  ;;  %962 = vrot.lane.b32.xlu0 %v3285_v45, %s3450_s14 }
 0x3a7   :  { %1064 = vrot.lane.b32.xlu1 %v3287_v47, %s3450_s14  ;;  %v3289_v51 = vpop.eup %3288 }
 0x3a8   :  { %v3291_v52 = vpop.eup %3290  ;;  %v956_v53 = vadd.f32 1.0, %v3289_v51 }
 0x3a9   :  { %v1054_v54 = vadd.f32 1.0, %v3291_v52 }
 0x3aa   :  { %3292 = vrcp.f32 %v956_v53 }
 0x3ab   :  { %1059 = vrot.lane.b32.xlu1 %v3797_v48, %s3449_s18  ;;  %3294 = vrcp.f32 %v1054_v54 }
 0x3b7   :  { %v3293_v5 = vpop.eup %3292 }
 0x3b8   :  { %v3295_v56 = vpop.eup %3294  ;;  %v960_v61 = vmul.f32 %v3293_v5, %v3698_v60 }
 0x418   :  { %v963_v55 = vpop.permute.xlu0 %962 }
 0x419   :  { %v965_v57 = vmul.f32 %v3293_v5, %v963_v55  ;;  %v1065_v58 = vpop.permute.xlu1 %1064 }
 0x41a   :  { %v1067_v9 = vmul.f32 %v3295_v56, %v1065_v58  ;;  %v1093_v58 = vmul.f32 %v1085_v36, %v3797_v48 }
 0x41b   :  { %967 = vrot.lane.b32.xlu1 %v965_v57, %s3449_s18 }
 0x41c   :  { %1069 = vrot.lane.b32.xlu0 %v1067_v9, %s3449_s18 }
 0x41d   :  { %v1060_v59 = vpop.permute.xlu1 %1059 }
 0x41e   :  { %v1062_v62 = vmul.f32 %v3295_v56, %v1060_v59 }
 0x48d   :  { %v968_v63 = vpop.permute.xlu1 %967 }
 0x48e   :  { %v1070_v4 = vpop.permute.xlu0 %1069  ;;  %v3804_v8 = vadd.f32 %v968_v63, %v960_v61 }
 0x48f   :  { %v1072_v19 = vadd.f32 %v1070_v4, %v1062_v62 }
 0x490   :  { %3296 = vtanh.f32 %v3804_v8 }
 0x491   :  { %3298 = vtanh.f32 %v1072_v19 }
 0x49d   :  { %v3297_v25 = vpop.eup %3296 }
 0x49e   :  { %v3299_v27 = vpop.eup %3298  ;;  %973 = vrot.lane.b32.xlu1 %v3297_v25, %s3450_s14 }
 0x49f   :  { %1075 = vrot.lane.b32.xlu0 %v3299_v27, %s3450_s14 }
 0x510   :  { %v974_v6 = vpop.permute.xlu1 %973 }
 0x511   :  { %v1076_v60 = vpop.permute.xlu0 %1075  ;;  %v976_v15 = vmul.f32 %v3293_v5, %v974_v6 }
 0x512   :  { %v1078_v30 = vmul.f32 %v3295_v56, %v1076_v60 }
 0x513   :  { %1097 = vrot.lane.b32.xlu1 %v976_v15, %s3449_s18 }
 0x514   :  { %1081 = vrot.lane.b32.xlu0 %v1078_v30, %s3449_s18 }
 0x518   :  { %1089 = vrot.lane.b32.xlu0 %v1072_v19, %s3451_s24 }
 0x585   :  { %v3852_v39 = vpop.permute.xlu1 %1097 }
 0x586   :  { %v1082_v40 = vpop.permute.xlu0 %1081  ;;  %3092 = vmatmul.mubr.msk.f32.vlgmr.msra.gmra.mxu0 %vm647_vm1, %v3852_v39 }
 0x587   :  { %v1084_v43 = vmul.f32 %v1082_v40, %v3843_v35  ;;  %v1103_v44 = vmul.f32 %v1102_v38, %v1082_v40  ;;  %3106 = vmatpush3.msra.mxu0 %v3524_v0  ;;  %3113 = vmatprep.mubr.msk.f32.mxu0 %vm3448_vm0, %v3447_v1  ;;  %v424_v0 = vld [vmem:[%s423_s17] ss:$8 sm:$0x3]  ;;  %s476_s17 = sadd.s32 %s2928_s0, %s473_s28  ;;  %s2918_s0 = sshll.u32 %s290_s15, 4 }
 0x588   :  { %3107 = vmatprep.subr.mxu0 %v3447_v1  ;;  %425 = vst [vmem:[#allocation2 + $0x14] sm:$0x1] %v424_v0  ;;  %s477_s20 = scalar_lea.vmem %s4441_s1, %s476_s17  ;;  %s296_s17 = sadd.s32 %s2918_s0, %s293_s5 }
 0x589   :  { %v3865_v45 = vadd.f32 %v1086_v42, %v1084_v43  ;;  %3108 = vmatpush3.msra.mxu0 %v3530_v2  ;;  %v3868_v46 = vadd.f32 %v1103_v44, %v876_v41  ;;  %v430_v2 = vrot.slane %v424_v0, %v3670_v21  ;;  %s329_s15 = sand.u32 7, %s2816_s27  ;;  %s365_s5 = sand.u32 7, %s2822_s22 }
 0x58a   :  { %3109 = vmatprep.subr.mxu0 %v3447_v1  ;;  %v1090_v55 = vpop.permute.xlu0 %1089 }
 0x58b   :  { %3103 = vmatmul.mubr.msk.f32.vlgmr.msra.gmra.mxu1 %vm647_vm1, %v3865_v45  ;;  %3110 = vmatpush3.msra.mxu0 %v3542_v3  ;;  %432 = vst [vmem:[#allocation3 + $0x14] sm:$0x1] %v430_v2  ;;  %v442_v3 = vld [vmem:[%s441_s16] ss:$8 sm:$0x3]  ;;  %v1092_v56 = vmul.f32 %v1090_v55, %v3843_v35  ;;  %s275_s16 = sand.u32 7, %s2807_s19  ;;  %s297_s19 = scalar_lea.vmem %s4441_s1, %s296_s17 }
 0x58c   :  { %3111 = vmatprep.subr.mxu0 %v3447_v1  ;;  %3117 = vmatpush3.msra.mxu1 %v3580_v10  ;;  %443 = vst [vmem:[#allocation2 + $0x15] sm:$0x1] %v442_v3  ;;  %v460_v10 = vld [vmem:[%s459_s30] ss:$8 sm:$0x3]  ;;  %s278_s25 = sadd.s32 %s2917_s23, %s275_s16  ;;  %s326_s16 = sshra.s32 %s2816_s27, 3 }
 0x58d   :  { %3112 = vmatpush3.msra.mxu0 %v3562_v7  ;;  %3118 = vmatprep.subr.mxu1 %v3447_v1  ;;  %v448_v7 = vrot.slane %v442_v3, %v3670_v21  ;;  %461 = vst [vmem:[#allocation2 + $0x16] sm:$0x1] %v460_v10  ;;  %v3913_v9 = vadd.f32 %v1093_v58, %v1092_v56  ;;  %s279_s28 = scalar_lea.vmem %s4441_s1, %s278_s25  ;;  %s314_s23 = sadd.s32 %s2919_s13, %s311_s21  ;;  %v4000_v56 = vld [vmem:[%s4446_s6] sm:$0xff]  ;;  %v4028_v58 = vld [vmem:[%s4447_s7 + $0x8] sm:$0xff] }
 0x58e   :  { %3119 = vmatpush3.msra.mxu1 %v3594_v11  ;;  %3124 = vmatprep.mubr.msk.f32.mxu1 %vm3448_vm0, %v3447_v1  ;;  %v466_v11 = vrot.slane %v460_v10, %v3670_v21  ;;  %v3930_v3 = vld [vmem:[%s279_s28] ss:$8 sm:$0x3]  ;;  %s315_s29 = scalar_lea.vmem %s4441_s1, %s314_s23  ;;  %s2920_s30 = sshll.u32 %s326_s16, 4 }
 0x58f   :  { %3120 = vmatprep.subr.mxu1 %v3447_v1  ;;  %3127 = vmatprep.subr.mxu0 %v3447_v1  ;;  %450 = vst [vmem:[#allocation3 + $0x15] sm:$0x1] %v448_v7  ;;  %281 = vst [vmem:[#allocation2 + $0xc] sm:$0x1] %v3930_v3  ;;  %s332_s28 = sadd.s32 %s2920_s30, %s329_s15  ;;  %s2825_s27 = sld [smem:[#allocation4 + $0x104]] }
 0x590   :  { %3121 = vmatpush3.msra.mxu1 %v3604_v12  ;;  %468 = vst [vmem:[#allocation3 + $0x16] sm:$0x1] %v466_v11  ;;  %v478_v12 = vld [vmem:[%s477_s20] ss:$8 sm:$0x3]  ;;  %s333_s17 = scalar_lea.vmem %s4441_s1, %s332_s28  ;;  %s362_s16 = sshra.s32 %s2822_s22, 3 }
 0x591   :  { %3122 = vmatprep.subr.mxu1 %v3447_v1  ;;  %v484_v26 = vrot.slane %v478_v12, %v3670_v21  ;;  %479 = vst [vmem:[#allocation2 + $0x17] sm:$0x1] %v478_v12  ;;  %v3937_v7 = vld [vmem:[%s297_s19] ss:$8 sm:$0x3]  ;;  %s401_s23 = sand.u32 7, %s4034_s4 }
 0x592   :  { %3123 = vmatpush3.msra.mxu1 %v3620_v14  ;;  %299 = vst [vmem:[#allocation2 + $0xd] sm:$0x1] %v3937_v7  ;;  %v3943_v10 = vld [vmem:[%s315_s29] ss:$8 sm:$0x3]  ;;  %s2922_s29 = sshll.u32 %s362_s16, 4 }
 0x593   :  { %3138 = vmatprep.subr.mxu1 %v3447_v1  ;;  %486 = vst [vmem:[#allocation3 + $0x17] sm:$0x1] %v484_v26  ;;  %317 = vst [vmem:[#allocation2 + $0xe] sm:$0x1] %v3943_v10  ;;  %v3955_v12 = vld [vmem:[%s4442_s2 + $0x14] sm:$0xf] }
 0x594   :  { %v3949_v11 = vld [vmem:[%s333_s17] ss:$8 sm:$0x3]  ;;  %s2819_s17 = sld [smem:[#allocation4 + $0x4]] }
 0x595   :  { %335 = vst [vmem:[#allocation2 + $0xf] sm:$0x1] %v3949_v11  ;;  %s380_s30 = sshra.s32 %s2825_s27, 3  ;;  %s383_s28 = sand.u32 7, %s2825_s27 }
 0x59a   :  { %v1106_v51 = vld [vmem:[#allocation3 + $0x14] sm:$0xf]  ;;  %s344_s20 = sshra.s32 %s2819_s17, 3  ;;  %s347_s19 = sand.u32 7, %s2819_s17 }
 0x59b   :  { %s2921_s21 = sshll.u32 %s344_s20, 4  ;;  %s2923_s20 = sshll.u32 %s380_s30, 4 }
 0x59c   :  { %s350_s13 = sadd.s32 %s2921_s21, %s347_s19  ;;  %s386_s19 = sadd.s32 %s2923_s20, %s383_s28 }
 0x59d   :  { %s351_s25 = scalar_lea.vmem %s4441_s1, %s350_s13  ;;  %s398_s21 = sshra.s32 %s4034_s4, 3 }
 0x59e   :  { %s387_s16 = scalar_lea.vmem %s4441_s1, %s386_s19  ;;  %s2924_s27 = sshll.u32 %s398_s21, 4 }
 0x59f   :  { %s404_s15 = sadd.s32 %s2924_s27, %s401_s23 }
 0x646   :  { %v1175_v47 = vpop.f32.mrf.mxu0 }
 0x647   :  { %v1179_v49 = vadd.f32 %v1175_v47, %v1105_v28  ;;  %v1312_v28 = vsub.f32 1.0, %v3955_v12  ;;  %v3965_v47 = vld [vmem:[%s4446_s6 + $0x18] sm:$0xff] }
 0x648   :  { %v3093_v50 = vpop.f32.mrf.mxu0 }
 0x649   :  { %3300 = vtanh.f32 %v1179_v49  ;;  %v2878_v59 = vmul.f32 -1.442695, %v1179_v49  ;;  %v3973_v49 = vld [vmem:[%s4443_s3 + $0x14] sm:$0xf] }
 0x64a   :  { %v3979_v50 = vld [vmem:[%s4446_s6 + $0x10] sm:$0xff] }
 0x64b   :  { %v1273_v52 = vpop.f32.mrf.mxu1 }
 0x64c   :  { %v1277_v53 = vadd.f32 %v1273_v52, %v1106_v51  ;;  %v1313_v52 = vmul.f32 %v1312_v28, %v3865_v45 }
 0x64d   :  { %v3104_v54 = vpop.f32.mrf.mxu1 }
 0x64e   :  { %3302 = vtanh.f32 %v1277_v53  ;;  %v2880_v61 = vmul.f32 -1.442695, %v1277_v53 }
 0x64f   :  { %3304 = vpow2.f32 %v2878_v59 }
 0x650   :  { %3306 = vpow2.f32 %v2880_v61 }
 0x656   :  { %v3301_v5 = vpop.eup %3300 }
 0x657   :  { %1189 = vrot.lane.b32.xlu0 %v3301_v5, %s3450_s14  ;;  %v3991_v5 = vld [vmem:[%s4446_s6 + $0x8] sm:$0xff]  ;;  %s368_s6 = sadd.s32 %s2922_s29, %s365_s5  ;;  %s405_s29 = scalar_lea.vmem %s4441_s1, %s404_s15 }
 0x658   :  { %s369_s17 = scalar_lea.vmem %s4441_s1, %s368_s6 }
 0x659   :  { %v370_v61 = vld [vmem:[%s369_s17] ss:$8 sm:$0x3] }
 0x65a   :  { %371 = vst [vmem:[#allocation2 + $0x11] sm:$0x1] %v370_v61 }
 0x65b   :  { %v3303_v57 = vpop.eup %3302 }
 0x65c   :  { %1291 = vrot.lane.b32.xlu1 %v3303_v57, %s3450_s14  ;;  %v3305_v62 = vpop.eup %3304  ;;  %v4012_v57 = vld [vmem:[%s4447_s7 + $0x18] sm:$0xff] }
 0x65d   :  { %v1183_v63 = vadd.f32 1.0, %v3305_v62  ;;  %v3307_v4 = vpop.eup %3306  ;;  %v376_v62 = vrot.slane %v370_v61, %v3670_v21 }
 0x65e   :  { %v1281_v19 = vadd.f32 1.0, %v3307_v4 }
 0x65f   :  { %3308 = vrcp.f32 %v1183_v63  ;;  %v388_v63 = vld [vmem:[%s387_s16] ss:$8 sm:$0x3]  ;;  %378 = vst [vmem:[#allocation3 + $0x11] sm:$0x1] %v376_v62 }
 0x660   :  { %1286 = vrot.lane.b32.xlu1 %v3913_v9, %s3449_s18  ;;  %3310 = vrcp.f32 %v1281_v19  ;;  %v394_v4 = vrot.slane %v388_v63, %v3670_v21  ;;  %389 = vst [vmem:[#allocation2 + $0x12] sm:$0x1] %v388_v63  ;;  %v406_v19 = vld [vmem:[%s405_s29] ss:$8 sm:$0x3] }
 0x661   :  { %407 = vst [vmem:[#allocation2 + $0x13] sm:$0x1] %v406_v19 }
 0x662   :  { %396 = vst [vmem:[#allocation3 + $0x12] sm:$0x1] %v394_v4 }
 0x66c   :  { %v3309_v25 = vpop.eup %3308 }
 0x66d   :  { %v3311_v6 = vpop.eup %3310  ;;  %v1187_v35 = vmul.f32 %v3309_v25, %v3804_v8 }
 0x6c9   :  { %v1190_v27 = vpop.permute.xlu0 %1189 }
 0x6ca   :  { %v1192_v48 = vmul.f32 %v3309_v25, %v1190_v27  ;;  %v1332_v27 = vld [vmem:[#allocation2 + $0xc] sm:$0xf] }
 0x6cc   :  { %1194 = vrot.lane.b32.xlu1 %v1192_v48, %s3449_s18 }
 0x6ce   :  { %v1292_v60 = vpop.permute.xlu1 %1291 }
 0x6cf   :  { %v1294_v15 = vmul.f32 %v3311_v6, %v1292_v60 }
 0x6d1   :  { %1296 = vrot.lane.b32.xlu0 %v1294_v15, %s3449_s18 }
 0x6d2   :  { %v1287_v30 = vpop.permute.xlu1 %1286 }
 0x6d3   :  { %v1289_v38 = vmul.f32 %v3311_v6, %v1287_v30 }
 0x73e   :  { %v1195_v36 = vpop.permute.xlu1 %1194 }
 0x73f   :  { %v3920_v37 = vadd.f32 %v1195_v36, %v1187_v35 }
 0x741   :  { %3312 = vtanh.f32 %v3920_v37 }
 0x743   :  { %v1297_v40 = vpop.permute.xlu0 %1296 }
 0x744   :  { %v1299_v41 = vadd.f32 %v1297_v40, %v1289_v38 }
 0x746   :  { %3314 = vtanh.f32 %v1299_v41 }
 0x74e   :  { %v3313_v42 = vpop.eup %3312 }
 0x74f   :  { %1200 = vrot.lane.b32.xlu1 %v3313_v42, %s3450_s14 }
 0x753   :  { %v3315_v43 = vpop.eup %3314 }
 0x754   :  { %1302 = vrot.lane.b32.xlu0 %v3315_v43, %s3450_s14  ;;  %v1320_v43 = vmul.f32 %v1312_v28, %v3913_v9 }
 0x7c1   :  { %v1201_v44 = vpop.permute.xlu1 %1200 }
 0x7c2   :  { %v1203_v0 = vmul.f32 %v3309_v25, %v1201_v44  ;;  %v412_v25 = vrot.slane %v406_v19, %v3670_v21 }
 0x7c4   :  { %1324 = vrot.lane.b32.xlu1 %v1203_v0, %s3449_s18  ;;  %414 = vst [vmem:[#allocation3 + $0x13] sm:$0x1] %v412_v25 }
 0x7c6   :  { %v1303_v8 = vpop.permute.xlu0 %1302 }
 0x7c7   :  { %v1305_v2 = vmul.f32 %v3311_v6, %v1303_v8 }
 0x7c9   :  { %1308 = vrot.lane.b32.xlu0 %v1305_v2, %s3449_s18 }
 0x7cd   :  { %1316 = vrot.lane.b32.xlu0 %v1299_v41, %s3451_s24 }
 0x836   :  { %v3957_v26 = vpop.permute.xlu1 %1324 }
 0x837   :  { %3114 = vmatmul.mubr.msk.f32.vlgmr.msra.gmra.mxu0 %vm647_vm1, %v3957_v26 }
 0x838   :  { %3128 = vmatpush3.msra.mxu0 %v3965_v47  ;;  %3135 = vmatprep.mubr.msk.f32.mxu0 %vm3448_vm0, %v3447_v1 }
 0x839   :  { %3129 = vmatprep.subr.mxu0 %v3447_v1 }
 0x83a   :  { %3130 = vmatpush3.msra.mxu0 %v3979_v50 }
 0x83b   :  { %v1309_v51 = vpop.permute.xlu0 %1308  ;;  %3131 = vmatprep.subr.mxu0 %v3447_v1 }
 0x83c   :  { %v1311_v53 = vmul.f32 %v1309_v51, %v3955_v12  ;;  %v1330_v54 = vmul.f32 %v3973_v49, %v1309_v51  ;;  %3132 = vmatpush3.msra.mxu0 %v3991_v5 }
 0x83d   :  { %3133 = vmatprep.subr.mxu0 %v3447_v1 }
 0x83e   :  { %v3995_v55 = vadd.f32 %v1313_v52, %v1311_v53  ;;  %3134 = vmatpush3.msra.mxu0 %v4000_v56  ;;  %v4004_v45 = vadd.f32 %v1330_v54, %v3868_v46  ;;  %v4021_v46 = vld [vmem:[%s4447_s7 + $0x10] sm:$0xff] }
 0x83f   :  { %3149 = vmatprep.subr.mxu0 %v3447_v1  ;;  %v1317_v40 = vpop.permute.xlu0 %1316 }
 0x840   :  { %3125 = vmatmul.mubr.msk.f32.vlgmr.msra.gmra.mxu1 %vm647_vm1, %v3995_v55  ;;  %v1319_v41 = vmul.f32 %v1317_v40, %v3955_v12  ;;  %v4092_v40 = vld [vmem:[%s4443_s3 + $0x10] sm:$0xf] }
 0x841   :  { %3139 = vmatpush3.msra.mxu1 %v4012_v57  ;;  %3146 = vmatprep.mubr.msk.f32.mxu1 %vm3448_vm0, %v3447_v1 }
 0x842   :  { %3140 = vmatprep.subr.mxu1 %v3447_v1  ;;  %v4060_v44 = vadd.f32 %v1320_v43, %v1319_v41 }
 0x843   :  { %3141 = vmatpush3.msra.mxu1 %v4021_v46 }
 0x844   :  { %3142 = vmatprep.subr.mxu1 %v3447_v1 }
 0x845   :  { %3143 = vmatpush3.msra.mxu1 %v4028_v58 }
 0x846   :  { %3144 = vmatprep.subr.mxu1 %v3447_v1 }
 0x847   :  { %3145 = vmatpush3.msra.mxu1 %v3620_v14  ;;  %v352_v14 = vld [vmem:[%s351_s25] ss:$8 sm:$0x3] }
 0x848   :  { %3160 = vmatprep.subr.mxu1 %v3447_v1  ;;  %v358_v59 = vrot.slane %v352_v14, %v3670_v21  ;;  %353 = vst [vmem:[#allocation2 + $0x10] sm:$0x1] %v352_v14 }
 0x84a   :  { %360 = vst [vmem:[#allocation3 + $0x10] sm:$0x1] %v358_v59 }
 0x851   :  { %v1333_v15 = vld [vmem:[#allocation3 + $0x10] sm:$0xf] }
 0x8f7   :  { %v1402_v48 = vpop.f32.mrf.mxu0 }
 0x8f8   :  { %v1406_v6 = vadd.f32 %v1402_v48, %v1332_v27 }
 0x8f9   :  { %v3115_v60 = vpop.f32.mrf.mxu0 }
 0x8fa   :  { %3316 = vtanh.f32 %v1406_v6  ;;  %v2882_v0 = vmul.f32 -1.442695, %v1406_v6 }
 0x900   :  { %v1500_v30 = vpop.f32.mrf.mxu1 }
 0x901   :  { %v1504_v35 = vadd.f32 %v1500_v30, %v1333_v15 }
 0x902   :  { %v3126_v36 = vpop.f32.mrf.mxu1 }
 0x903   :  { %3318 = vtanh.f32 %v1504_v35  ;;  %v2884_v8 = vmul.f32 -1.442695, %v1504_v35  ;;  %v1533_v36 = vld [vmem:[%s4442_s2 + $0x10] sm:$0xf] }
 0x904   :  { %3320 = vpow2.f32 %v2882_v0 }
 0x905   :  { %3322 = vpow2.f32 %v2884_v8 }
 0x907   :  { %v3317_v38 = vpop.eup %3316 }
 0x908   :  { %1416 = vrot.lane.b32.xlu0 %v3317_v38, %s3450_s14  ;;  %v1539_v38 = vsub.f32 1.0, %v1533_v36 }
 0x910   :  { %v3319_v42 = vpop.eup %3318 }
 0x911   :  { %1518 = vrot.lane.b32.xlu1 %v3319_v42, %s3450_s14  ;;  %v3321_v2 = vpop.eup %3320  ;;  %v1540_v42 = vmul.f32 %v1539_v38, %v3995_v55  ;;  %v4117_v55 = vld [vmem:[%s4447_s7] sm:$0xff] }
 0x912   :  { %v1410_v51 = vadd.f32 1.0, %v3321_v2  ;;  %v3323_v52 = vpop.eup %3322 }
 0x913   :  { %v1508_v53 = vadd.f32 1.0, %v3323_v52  ;;  %v322_v52 = vrot.slane %v3943_v10, %v3670_v21 }
 0x914   :  { %3324 = vrcp.f32 %v1410_v51  ;;  %v304_v51 = vrot.slane %v3937_v7, %v3670_v21 }
 0x915   :  { %1513 = vrot.lane.b32.xlu1 %v4060_v44, %s3449_s18  ;;  %3326 = vrcp.f32 %v1508_v53  ;;  %v340_v53 = vrot.slane %v3949_v11, %v3670_v21  ;;  %324 = vst [vmem:[#allocation3 + $0xe] sm:$0x1] %v322_v52 }
 0x916   :  { %306 = vst [vmem:[#allocation3 + $0xd] sm:$0x1] %v304_v51 }
 0x917   :  { %342 = vst [vmem:[#allocation3 + $0xf] sm:$0x1] %v340_v53 }
 0x921   :  { %v3325_v54 = vpop.eup %3324 }
 0x922   :  { %v3327_v28 = vpop.eup %3326  ;;  %v1414_v62 = vmul.f32 %v3325_v54, %v3920_v37 }
 0x97a   :  { %v1417_v12 = vpop.permute.xlu0 %1416 }
 0x97b   :  { %v1419_v9 = vmul.f32 %v3325_v54, %v1417_v12 }
 0x97d   :  { %1421 = vrot.lane.b32.xlu1 %v1419_v9, %s3449_s18 }
 0x983   :  { %v1519_v14 = vpop.permute.xlu1 %1518 }
 0x984   :  { %v1521_v59 = vmul.f32 %v3327_v28, %v1519_v14 }
 0x986   :  { %1523 = vrot.lane.b32.xlu0 %v1521_v59, %s3449_s18 }
 0x987   :  { %v1514_v61 = vpop.permute.xlu1 %1513 }
 0x988   :  { %v1516_v19 = vmul.f32 %v3327_v28, %v1514_v61 }
 0x9ef   :  { %v1422_v63 = vpop.permute.xlu1 %1421 }
 0x9f0   :  { %v4067_v4 = vadd.f32 %v1422_v63, %v1414_v62  ;;  %v1547_v63 = vmul.f32 %v1539_v38, %v4060_v44 }
 0x9f2   :  { %3328 = vtanh.f32 %v4067_v4 }
 0x9f8   :  { %v1524_v25 = vpop.permute.xlu0 %1523 }
 0x9f9   :  { %v1526_v27 = vadd.f32 %v1524_v25, %v1516_v19 }
 0x9fb   :  { %3330 = vtanh.f32 %v1526_v27 }
 0x9ff   :  { %v3329_v48 = vpop.eup %3328 }
 0xa00   :  { %1427 = vrot.lane.b32.xlu1 %v3329_v48, %s3450_s14 }
 0xa08   :  { %v3331_v6 = vpop.eup %3330 }
 0xa09   :  { %1529 = vrot.lane.b32.xlu0 %v3331_v6, %s3450_s14 }
 0xa72   :  { %v1428_v60 = vpop.permute.xlu1 %1427 }
 0xa73   :  { %v1430_v15 = vmul.f32 %v3325_v54, %v1428_v60  ;;  %v1559_v54 = vld [vmem:[#allocation2 + $0x10] sm:$0xf] }
 0xa75   :  { %1551 = vrot.lane.b32.xlu1 %v1430_v15, %s3449_s18 }
 0xa7b   :  { %v1530_v37 = vpop.permute.xlu0 %1529 }
 0xa7c   :  { %v1532_v30 = vmul.f32 %v3327_v28, %v1530_v37 }
 0xa7e   :  { %1535 = vrot.lane.b32.xlu0 %v1532_v30, %s3449_s18 }
 0xa82   :  { %1543 = vrot.lane.b32.xlu0 %v1526_v27, %s3451_s24 }
 0xae7   :  { %v4075_v35 = vpop.permute.xlu1 %1551 }
 0xae8   :  { %3136 = vmatmul.mubr.msk.f32.vlgmr.msra.gmra.mxu0 %vm647_vm1, %v4075_v35 }
 0xae9   :  { %3150 = vmatpush3.msra.mxu0 %v3965_v47  ;;  %3157 = vmatprep.mubr.msk.f32.mxu0 %vm3448_vm0, %v3447_v1 }
 0xaea   :  { %3151 = vmatprep.subr.mxu0 %v3447_v1 }
 0xaeb   :  { %3152 = vmatpush3.msra.mxu0 %v3979_v50 }
 0xaec   :  { %3153 = vmatprep.subr.mxu0 %v3447_v1 }
 0xaed   :  { %3154 = vmatpush3.msra.mxu0 %v3991_v5 }
 0xaee   :  { %3155 = vmatprep.subr.mxu0 %v3447_v1 }
 0xaef   :  { %3156 = vmatpush3.msra.mxu0 %v4000_v56 }
 0xaf0   :  { %v1536_v41 = vpop.permute.xlu0 %1535  ;;  %3171 = vmatprep.subr.mxu0 %v3447_v1 }
 0xaf1   :  { %v1538_v43 = vmul.f32 %v1536_v41, %v1533_v36  ;;  %v1557_v0 = vmul.f32 %v4092_v40, %v1536_v41 }
 0xaf3   :  { %v4099_v8 = vadd.f32 %v1540_v42, %v1538_v43  ;;  %v4102_v2 = vadd.f32 %v1557_v0, %v4004_v45  ;;  %v286_v45 = vrot.slane %v3930_v3, %v3670_v21 }
 0xaf4   :  { %v1544_v10 = vpop.permute.xlu0 %1543 }
 0xaf5   :  { %3147 = vmatmul.mubr.msk.f32.vlgmr.msra.gmra.mxu1 %vm647_vm1, %v4099_v8  ;;  %288 = vst [vmem:[#allocation3 + $0xc] sm:$0x1] %v286_v45  ;;  %v1546_v62 = vmul.f32 %v1544_v10, %v1533_v36 }
 0xaf6   :  { %3161 = vmatpush3.msra.mxu1 %v4012_v57  ;;  %3168 = vmatprep.mubr.msk.f32.mxu1 %vm3448_vm0, %v3447_v1 }
 0xaf7   :  { %3162 = vmatprep.subr.mxu1 %v3447_v1  ;;  %v4132_v19 = vadd.f32 %v1547_v63, %v1546_v62 }
 0xaf8   :  { %3163 = vmatpush3.msra.mxu1 %v4021_v46 }
 0xaf9   :  { %3164 = vmatprep.subr.mxu1 %v3447_v1 }
 0xafa   :  { %3165 = vmatpush3.msra.mxu1 %v4028_v58 }
 0xafb   :  { %3166 = vmatprep.subr.mxu1 %v3447_v1 }
 0xafc   :  { %3167 = vmatpush3.msra.mxu1 %v4117_v55  ;;  %v1560_v14 = vld [vmem:[#allocation3 + $0xc] sm:$0xf] }
 0xafd   :  { %3182 = vmatprep.subr.mxu1 %v3447_v1 }
 0xba8   :  { %v1629_v12 = vpop.f32.mrf.mxu0 }
 0xba9   :  { %v1633_v9 = vadd.f32 %v1629_v12, %v1559_v54 }
 0xbaa   :  { %v3137_v28 = vpop.f32.mrf.mxu0 }
 0xbab   :  { %3332 = vtanh.f32 %v1633_v9  ;;  %v2886_v25 = vmul.f32 -1.442695, %v1633_v9 }
 0xbb5   :  { %v1727_v3 = vpop.f32.mrf.mxu1 }
 0xbb6   :  { %v1731_v59 = vadd.f32 %v1727_v3, %v1560_v14 }
 0xbb7   :  { %v3148_v61 = vpop.f32.mrf.mxu1 }
 0xbb8   :  { %v3333_v7 = vpop.eup %3332  ;;  %3334 = vtanh.f32 %v1731_v59  ;;  %v2888_v27 = vmul.f32 -1.442695, %v1731_v59  ;;  %v1760_v59 = vld [vmem:[%s4442_s2 + $0xc] sm:$0xf] }
 0xbb9   :  { %1643 = vrot.lane.b32.xlu0 %v3333_v7, %s3450_s14  ;;  %3336 = vpow2.f32 %v2886_v25  ;;  %v1766_v61 = vsub.f32 1.0, %v1760_v59  ;;  %v4167_v7 = vld [vmem:[%s4443_s3 + $0xc] sm:$0xf] }
 0xbba   :  { %3338 = vpow2.f32 %v2888_v27 }
 0xbbb   :  { %v1767_v62 = vmul.f32 %v1766_v61, %v4099_v8  ;;  %v214_v8 = vrot.slane %v3816_v31, %v3670_v21 }
 0xbbd   :  { %216 = vst [vmem:[#allocation3 + $0x8] sm:$0x1] %v214_v8 }
 0xbc5   :  { %v3335_v11 = vpop.eup %3334 }
 0xbc6   :  { %1745 = vrot.lane.b32.xlu1 %v3335_v11, %s3450_s14  ;;  %v3337_v48 = vpop.eup %3336 }
 0xbc7   :  { %v1637_v6 = vadd.f32 1.0, %v3337_v48  ;;  %v3339_v60 = vpop.eup %3338  ;;  %v250_v48 = vrot.slane %v3831_v33, %v3670_v21 }
 0xbc8   :  { %v1735_v15 = vadd.f32 1.0, %v3339_v60  ;;  %v1784_v60 = vld [vmem:[#allocation2 + $0x14] sm:$0xf] }
 0xbc9   :  { %3340 = vrcp.f32 %v1637_v6  ;;  %v268_v6 = vrot.slane %v3837_v34, %v3670_v21  ;;  %252 = vst [vmem:[#allocation3 + $0xa] sm:$0x1] %v250_v48 }
 0xbca   :  { %1740 = vrot.lane.b32.xlu1 %v4132_v19, %s3449_s18  ;;  %3342 = vrcp.f32 %v1735_v15 }
 0xbcb   :  { %270 = vst [vmem:[#allocation3 + $0xb] sm:$0x1] %v268_v6 }
 0xbd6   :  { %v3341_v37 = vpop.eup %3340 }
 0xbd7   :  { %v3343_v36 = vpop.eup %3342  ;;  %v1641_v43 = vmul.f32 %v3341_v37, %v4067_v4 }
 0xc2b   :  { %v1644_v30 = vpop.permute.xlu0 %1643 }
 0xc2c   :  { %v1646_v44 = vmul.f32 %v3341_v37, %v1644_v30 }
 0xc2e   :  { %1648 = vrot.lane.b32.xlu1 %v1646_v44, %s3449_s18 }
 0xc38   :  { %v1746_v38 = vpop.permute.xlu1 %1745 }
 0xc39   :  { %v1748_v41 = vmul.f32 %v3343_v36, %v1746_v38 }
 0xc3b   :  { %1750 = vrot.lane.b32.xlu0 %v1748_v41, %s3449_s18 }
 0xc3c   :  { %v1741_v42 = vpop.permute.xlu1 %1740 }
 0xc3d   :  { %v1743_v51 = vmul.f32 %v3343_v36, %v1741_v42  ;;  %v1774_v42 = vmul.f32 %v1766_v61, %v4132_v19 }
 0xca0   :  { %v1649_v0 = vpop.permute.xlu1 %1648 }
 0xca1   :  { %v4139_v45 = vadd.f32 %v1649_v0, %v1641_v43 }
 0xca3   :  { %3344 = vtanh.f32 %v4139_v45 }
 0xcad   :  { %v1751_v52 = vpop.permute.xlu0 %1750 }
 0xcae   :  { %v1753_v53 = vadd.f32 %v1751_v52, %v1743_v51 }
 0xcb0   :  { %v3345_v54 = vpop.eup %3344  ;;  %3346 = vtanh.f32 %v1753_v53 }
 0xcb1   :  { %1654 = vrot.lane.b32.xlu1 %v3345_v54, %s3450_s14 }
 0xcbd   :  { %v3347_v12 = vpop.eup %3346 }
 0xcbe   :  { %1756 = vrot.lane.b32.xlu0 %v3347_v12, %s3450_s14 }
 0xd23   :  { %v1655_v9 = vpop.permute.xlu1 %1654 }
 0xd24   :  { %v1657_v28 = vmul.f32 %v3341_v37, %v1655_v9 }
 0xd26   :  { %1777 = vrot.lane.b32.xlu1 %v1657_v28, %s3449_s18 }
 0xd30   :  { %v1757_v4 = vpop.permute.xlu0 %1756 }
 0xd31   :  { %v1759_v14 = vmul.f32 %v3343_v36, %v1757_v4 }
 0xd33   :  { %1762 = vrot.lane.b32.xlu0 %v1759_v14, %s3449_s18 }
 0xd37   :  { %1770 = vrot.lane.b32.xlu0 %v1753_v53, %s3451_s24 }
 0xd98   :  { %v4147_v3 = vpop.permute.xlu1 %1777 }
 0xd99   :  { %3158 = vmatmul.mubr.msk.f32.vlgmr.msra.gmra.mxu0 %vm647_vm1, %v4147_v3 }
 0xd9a   :  { %3172 = vmatpush3.msra.mxu0 %v3965_v47  ;;  %3179 = vmatprep.mubr.msk.f32.mxu0 %vm3448_vm0, %v3447_v1 }
 0xd9b   :  { %3173 = vmatprep.subr.mxu0 %v3447_v1 }
 0xd9c   :  { %3174 = vmatpush3.msra.mxu0 %v3979_v50 }
 0xd9d   :  { %3175 = vmatprep.subr.mxu0 %v3447_v1 }
 0xd9e   :  { %3176 = vmatpush3.msra.mxu0 %v3991_v5 }
 0xd9f   :  { %3177 = vmatprep.subr.mxu0 %v3447_v1 }
 0xda0   :  { %3178 = vmatpush3.msra.mxu0 %v4000_v56 }
 0xda1   :  { %3193 = vmatprep.subr.mxu0 %v3447_v1 }
 0xda5   :  { %v1763_v10 = vpop.permute.xlu0 %1762 }
 0xda6   :  { %v1765_v11 = vmul.f32 %v1763_v10, %v1760_v59  ;;  %v1782_v63 = vmul.f32 %v1763_v10, %v4167_v7 }
 0xda8   :  { %v4171_v25 = vadd.f32 %v1767_v62, %v1765_v11  ;;  %v4174_v27 = vadd.f32 %v1782_v63, %v4102_v2  ;;  %v232_v2 = vrot.slane %v3823_v32, %v3670_v21 }
 0xda9   :  { %v1771_v33 = vpop.permute.xlu0 %1770 }
 0xdaa   :  { %3169 = vmatmul.mubr.msk.f32.vlgmr.msra.gmra.mxu1 %vm647_vm1, %v4171_v25  ;;  %234 = vst [vmem:[#allocation3 + $0x9] sm:$0x1] %v232_v2  ;;  %v1773_v41 = vmul.f32 %v1771_v33, %v1760_v59 }
 0xdab   :  { %3183 = vmatpush3.msra.mxu1 %v4012_v57  ;;  %3190 = vmatprep.mubr.msk.f32.mxu1 %vm3448_vm0, %v3447_v1 }
 0xdac   :  { %3184 = vmatprep.subr.mxu1 %v3447_v1  ;;  %v4199_v43 = vadd.f32 %v1774_v42, %v1773_v41 }
 0xdad   :  { %3185 = vmatpush3.msra.mxu1 %v4021_v46 }
 0xdae   :  { %3186 = vmatprep.subr.mxu1 %v3447_v1 }
 0xdaf   :  { %3187 = vmatpush3.msra.mxu1 %v4028_v58 }
 0xdb0   :  { %3188 = vmatprep.subr.mxu1 %v3447_v1 }
 0xdb1   :  { %3189 = vmatpush3.msra.mxu1 %v4117_v55  ;;  %v1785_v44 = vld [vmem:[#allocation3 + $0x8] sm:$0xf] }
 0xdb2   :  { %3204 = vmatprep.subr.mxu1 %v3447_v1 }
 0xe59   :  { %v1854_v15 = vpop.f32.mrf.mxu0 }
 0xe5a   :  { %v1858_v37 = vadd.f32 %v1854_v15, %v1784_v60 }
 0xe5b   :  { %v3159_v30 = vpop.f32.mrf.mxu0 }
 0xe5c   :  { %3348 = vtanh.f32 %v1858_v37  ;;  %v2890_v0 = vmul.f32 -1.442695, %v1858_v37 }
 0xe69   :  { %v3349_v31 = vpop.eup %3348 }
 0xe6a   :  { %v1952_v36 = vpop.f32.mrf.mxu1  ;;  %1868 = vrot.lane.b32.xlu0 %v3349_v31, %s3450_s14  ;;  %v4234_v31 = vld [vmem:[%s4443_s3 + $0x8] sm:$0xf] }
 0xe6b   :  { %v1956_v32 = vadd.f32 %v1952_v36, %v1785_v44 }
 0xe6c   :  { %v3170_v38 = vpop.f32.mrf.mxu1 }
 0xe6d   :  { %3350 = vtanh.f32 %v1956_v32  ;;  %v2892_v52 = vmul.f32 -1.442695, %v1956_v32 }
 0xe6e   :  { %3352 = vpow2.f32 %v2890_v0 }
 0xe6f   :  { %3354 = vpow2.f32 %v2892_v52 }
 0xe7a   :  { %v3351_v34 = vpop.eup %3350 }
 0xe7b   :  { %1970 = vrot.lane.b32.xlu1 %v3351_v34, %s3450_s14  ;;  %v3353_v51 = vpop.eup %3352 }
 0xe7c   :  { %v1862_v53 = vadd.f32 1.0, %v3353_v51  ;;  %v3355_v54 = vpop.eup %3354 }
 0xe7d   :  { %v1960_v9 = vadd.f32 1.0, %v3355_v54 }
 0xe7e   :  { %3356 = vrcp.f32 %v1862_v53 }
 0xe7f   :  { %1965 = vrot.lane.b32.xlu1 %v4199_v43, %s3449_s18  ;;  %3358 = vrcp.f32 %v1960_v9 }
 0xe8b   :  { %v3357_v12 = vpop.eup %3356 }
 0xe8c   :  { %v3359_v19 = vpop.eup %3358  ;;  %v1866_v10 = vmul.f32 %v3357_v12, %v4139_v45 }
 0xedc   :  { %v1869_v28 = vpop.permute.xlu0 %1868 }
 0xedd   :  { %v1871_v4 = vmul.f32 %v3357_v12, %v1869_v28 }
 0xedf   :  { %1873 = vrot.lane.b32.xlu1 %v1871_v4, %s3449_s18 }
 0xeed   :  { %v1971_v14 = vpop.permute.xlu1 %1970 }
 0xeee   :  { %v1973_v59 = vmul.f32 %v3359_v19, %v1971_v14 }
 0xef0   :  { %1975 = vrot.lane.b32.xlu0 %v1973_v59, %s3449_s18 }
 0xef1   :  { %v1966_v61 = vpop.permute.xlu1 %1965 }
 0xef2   :  { %v1968_v8 = vmul.f32 %v3359_v19, %v1966_v61 }
 0xf51   :  { %v1874_v62 = vpop.permute.xlu1 %1873 }
 0xf52   :  { %v4206_v11 = vadd.f32 %v1874_v62, %v1866_v10 }
 0xf54   :  { %3360 = vtanh.f32 %v4206_v11 }
 0xf61   :  { %v3361_v63 = vpop.eup %3360 }
 0xf62   :  { %v1976_v2 = vpop.permute.xlu0 %1975  ;;  %1879 = vrot.lane.b32.xlu1 %v3361_v63, %s3450_s14 }
 0xf63   :  { %v1978_v48 = vadd.f32 %v1976_v2, %v1968_v8 }
 0xf65   :  { %3362 = vtanh.f32 %v1978_v48 }
 0xf72   :  { %v3363_v6 = vpop.eup %3362 }
 0xf73   :  { %1981 = vrot.lane.b32.xlu0 %v3363_v6, %s3450_s14 }
 0xfd4   :  { %v1880_v60 = vpop.permute.xlu1 %1879 }
 0xfd5   :  { %v1882_v15 = vmul.f32 %v3357_v12, %v1880_v60 }
 0xfd7   :  { %2002 = vrot.lane.b32.xlu1 %v1882_v15, %s3449_s18 }
 0xfe5   :  { %v1982_v45 = vpop.permute.xlu0 %1981 }
 0xfe6   :  { %v1984_v37 = vmul.f32 %v3359_v19, %v1982_v45 }
 0xfe8   :  { %1987 = vrot.lane.b32.xlu0 %v1984_v37, %s3449_s18 }
 0xfec   :  { %1995 = vrot.lane.b32.xlu0 %v1978_v48, %s3451_s24 }
0x1049   :  { %v4214_v30 = vpop.permute.xlu1 %2002 }
0x104a   :  { %3180 = vmatmul.mubr.msk.f32.vlgmr.msra.gmra.mxu0 %vm647_vm1, %v4214_v30 }
0x104b   :  { %3194 = vmatpush3.msra.mxu0 %v3965_v47  ;;  %3201 = vmatprep.mubr.msk.f32.mxu0 %vm3448_vm0, %v3447_v1  ;;  %v1985_v47 = vld [vmem:[%s4442_s2 + $0x8] sm:$0xf] }
0x104c   :  { %3195 = vmatprep.subr.mxu0 %v3447_v1  ;;  %v1991_v44 = vsub.f32 1.0, %v1985_v47 }
0x104d   :  { %3196 = vmatpush3.msra.mxu0 %v3979_v50 }
0x104e   :  { %3197 = vmatprep.subr.mxu0 %v3447_v1  ;;  %v1992_v36 = vmul.f32 %v1991_v44, %v4171_v25  ;;  %v160_v25 = vrot.slane %v3721_v22, %v3670_v21  ;;  %v1999_v52 = vmul.f32 %v1991_v44, %v4199_v43 }
0x104f   :  { %3198 = vmatpush3.msra.mxu0 %v3991_v5 }
0x1050   :  { %3199 = vmatprep.subr.mxu0 %v3447_v1  ;;  %162 = vst [vmem:[#allocation3 + $0x5] sm:$0x1] %v160_v25 }
0x1051   :  { %3200 = vmatpush3.msra.mxu0 %v4000_v56 }
0x1052   :  { %3215 = vmatprep.subr.mxu0 %v3447_v1 }
0x105a   :  { %v1988_v50 = vpop.permute.xlu0 %1987 }
0x105b   :  { %v1990_v5 = vmul.f32 %v1988_v50, %v1985_v47  ;;  %v2007_v32 = vmul.f32 %v1988_v50, %v4234_v31 }
0x105d   :  { %v4238_v38 = vadd.f32 %v1992_v36, %v1990_v5  ;;  %v4241_v56 = vadd.f32 %v2007_v32, %v4174_v27  ;;  %v178_v27 = vrot.slane %v3729_v23, %v3670_v21  ;;  %v2210_v5 = vld [vmem:[%s4442_s2 + $0x4] sm:$0xf] }
0x105e   :  { %v1996_v23 = vpop.permute.xlu0 %1995  ;;  %v2216_v32 = vsub.f32 1.0, %v2210_v5 }
0x105f   :  { %3191 = vmatmul.mubr.msk.f32.vlgmr.msra.gmra.mxu1 %vm647_vm1, %v4238_v38  ;;  %180 = vst [vmem:[#allocation3 + $0x6] sm:$0x1] %v178_v27  ;;  %v1998_v51 = vmul.f32 %v1996_v23, %v1985_v47 }
0x1060   :  { %3205 = vmatpush3.msra.mxu1 %v4012_v57  ;;  %3212 = vmatprep.mubr.msk.f32.mxu1 %vm3448_vm0, %v3447_v1  ;;  %v142_v57 = vrot.slane %v3711_v20, %v3670_v21  ;;  %v2217_v27 = vmul.f32 %v2216_v32, %v4238_v38  ;;  %v106_v38 = vrot.slane %v3648_v17, %v3670_v21 }
0x1061   :  { %3206 = vmatprep.subr.mxu1 %v3447_v1  ;;  %v4266_v53 = vadd.f32 %v1999_v52, %v1998_v51 }
0x1062   :  { %3207 = vmatpush3.msra.mxu1 %v4021_v46  ;;  %v196_v46 = vrot.slane %v3735_v24, %v3670_v21  ;;  %144 = vst [vmem:[#allocation3 + $0x4] sm:$0x1] %v142_v57  ;;  %v4293_v57 = vld [vmem:[%s4443_s3 + $0x4] sm:$0xf]  ;;  %108 = vst [vmem:[#allocation3 + $0x2] sm:$0x1] %v106_v38  ;;  %v1780_v38 = vmul.f32 %v4147_v3, %v4092_v40 }
0x1063   :  { %3208 = vmatprep.subr.mxu1 %v3447_v1 }
0x1064   :  { %3209 = vmatpush3.msra.mxu1 %v4028_v58  ;;  %198 = vst [vmem:[#allocation3 + $0x7] sm:$0x1] %v196_v46  ;;  %v2009_v58 = vld [vmem:[#allocation2 + $0x18] sm:$0xf] }
0x1065   :  { %3210 = vmatprep.subr.mxu1 %v3447_v1 }
0x1066   :  { %3211 = vmatpush3.msra.mxu1 %v4117_v55 }
0x1067   :  { %3250 = vmatprep.subr.mxu1 %v3447_v1 }
0x106b   :  { %v2010_v20 = vld [vmem:[#allocation3 + $0x4] sm:$0xf] }
0x110a   :  { %v2079_v55 = vpop.f32.mrf.mxu0 }
0x110b   :  { %v2083_v33 = vadd.f32 %v2079_v55, %v2009_v58 }
0x110c   :  { %v3181_v41 = vpop.f32.mrf.mxu0 }
0x110d   :  { %3364 = vtanh.f32 %v2083_v33  ;;  %v2894_v54 = vmul.f32 -1.442695, %v2083_v33  ;;  %v70_v41 = vrot.slane %v3612_v13, %v3670_v21 }
0x110f   :  { %72 = vst [vmem:[#allocation3] sm:$0x1] %v70_v41  ;;  %v1554_v41 = vmul.f32 %v4075_v35, %v4167_v7  ;;  %v2488_v35 = vld [vmem:[%s4448_s8 + $0x60] sm:$0xff] }
0x111a   :  { %v3365_v34 = vpop.eup %3364 }
0x111b   :  { %2093 = vrot.lane.b32.xlu0 %v3365_v34, %s3450_s14  ;;  %v88_v34 = vrot.slane %v3637_v16, %v3670_v21  ;;  %v2224_v16 = vmul.f32 %v2216_v32, %v4266_v53  ;;  %v2490_v32 = vld [vmem:[%s4448_s8 + $0x70] sm:$0xff] }
0x111d   :  { %90 = vst [vmem:[#allocation3 + $0x1] sm:$0x1] %v88_v34 }
0x111f   :  { %v2177_v22 = vpop.f32.mrf.mxu1 }
0x1120   :  { %v2181_v42 = vadd.f32 %v2177_v22, %v2010_v20  ;;  %v124_v20 = vrot.slane %v3659_v18, %v3670_v21 }
0x1121   :  { %v3192_v0 = vpop.f32.mrf.mxu1 }
0x1122   :  { %3366 = vtanh.f32 %v2181_v42  ;;  %v2896_v28 = vmul.f32 -1.442695, %v2181_v42  ;;  %126 = vst [vmem:[#allocation3 + $0x3] sm:$0x1] %v124_v20 }
0x1123   :  { %3368 = vpow2.f32 %v2894_v54 }
0x1129   :  { %v2235_v18 = vld [vmem:[#allocation3] sm:$0xf] }
0x112f   :  { %v3367_v24 = vpop.eup %3366 }
0x1130   :  { %2195 = vrot.lane.b32.xlu1 %v3367_v24, %s3450_s14  ;;  %v3369_v12 = vpop.eup %3368 }
0x1131   :  { %v2087_v9 = vadd.f32 1.0, %v3369_v12 }
0x1133   :  { %3370 = vrcp.f32 %v2087_v9 }
0x1134   :  { %2190 = vrot.lane.b32.xlu1 %v4266_v53, %s3449_s18  ;;  %3372 = vpow2.f32 %v2896_v28 }
0x1140   :  { %v3371_v4 = vpop.eup %3370 }
0x1141   :  { %v3373_v14 = vpop.eup %3372  ;;  %v2091_v8 = vmul.f32 %v3371_v4, %v4206_v11 }
0x1142   :  { %v2185_v43 = vadd.f32 1.0, %v3373_v14 }
0x1144   :  { %3374 = vrcp.f32 %v2185_v43 }
0x1151   :  { %v3375_v61 = vpop.eup %3374 }
0x118d   :  { %v2094_v19 = vpop.permute.xlu0 %2093 }
0x118e   :  { %v2096_v59 = vmul.f32 %v3371_v4, %v2094_v19 }
0x1190   :  { %2098 = vrot.lane.b32.xlu1 %v2096_v59, %s3449_s18 }
0x11a2   :  { %v2196_v10 = vpop.permute.xlu1 %2195 }
0x11a3   :  { %v2198_v62 = vmul.f32 %v3375_v61, %v2196_v10 }
0x11a5   :  { %2200 = vrot.lane.b32.xlu0 %v2198_v62, %s3449_s18 }
0x11a6   :  { %v2191_v63 = vpop.permute.xlu1 %2190 }
0x11a7   :  { %v2193_v60 = vmul.f32 %v3375_v61, %v2191_v63 }
0x1202   :  { %v2099_v2 = vpop.permute.xlu1 %2098 }
0x1203   :  { %v4273_v48 = vadd.f32 %v2099_v2, %v2091_v8 }
0x1205   :  { %3376 = vtanh.f32 %v4273_v48 }
0x1212   :  { %v3377_v6 = vpop.eup %3376 }
0x1213   :  { %2104 = vrot.lane.b32.xlu1 %v3377_v6, %s3450_s14 }
0x1217   :  { %v2201_v15 = vpop.permute.xlu0 %2200 }
0x1218   :  { %v2203_v45 = vadd.f32 %v2201_v15, %v2193_v60 }
0x121a   :  { %3378 = vtanh.f32 %v2203_v45 }
0x1227   :  { %v3379_v37 = vpop.eup %3378 }
0x1228   :  { %2206 = vrot.lane.b32.xlu0 %v3379_v37, %s3450_s14 }
0x1285   :  { %v2105_v47 = vpop.permute.xlu1 %2104 }
0x1286   :  { %v2107_v44 = vmul.f32 %v3371_v4, %v2105_v47 }
0x1288   :  { %2227 = vrot.lane.b32.xlu1 %v2107_v44, %s3449_s18 }
0x129a   :  { %v2207_v11 = vpop.permute.xlu0 %2206 }
0x129b   :  { %v2209_v50 = vmul.f32 %v3375_v61, %v2207_v11 }
0x129d   :  { %2212 = vrot.lane.b32.xlu0 %v2209_v50, %s3449_s18 }
0x12a1   :  { %2220 = vrot.lane.b32.xlu0 %v2203_v45, %s3451_s24 }
0x12fa   :  { %v4281_v36 = vpop.permute.xlu1 %2227 }
0x12fb   :  { %3202 = vmatmul.mubr.msk.f32.vlgmr.msra.gmra.mxu0 %vm647_vm1, %v4281_v36 }
0x12fc   :  { %3247 = vmatprep.mubr.msk.f32.mxu0 %vm3448_vm0, %v3447_v1 }
0x130f   :  { %v2213_v25 = vpop.permute.xlu0 %2212 }
0x1310   :  { %v2215_v46 = vmul.f32 %v2213_v25, %v2210_v5  ;;  %v2232_v58 = vmul.f32 %v2213_v25, %v4293_v57  ;;  %v4333_v25 = vld [vmem:[%s4443_s3] sm:$0xf] }
0x1312   :  { %v2218_v55 = vadd.f32 %v2217_v27, %v2215_v46  ;;  %v4298_v33 = vadd.f32 %v2232_v58, %v4241_v56  ;;  %v2234_v56 = vld [vmem:[#allocation2 + $0x1c] sm:$0xf]  ;;  %v1100_v27 = vmul.f32 %v3852_v39, %v4293_v57  ;;  %v873_v46 = vmul.f32 %v3747_v29, %v4333_v25  ;;  %v3408_v29 = vld [vmem:[%s4443_s3 + $0x18] sm:$0xf] }
0x1313   :  { %v2221_v23 = vpop.permute.xlu0 %2220  ;;  %v1327_v58 = vmul.f32 %v3957_v26, %v4234_v31  ;;  %v2230_v39 = vmul.f32 %v3408_v29, %v4281_v36  ;;  %v2489_v26 = vld [vmem:[%s4448_s8 + $0x68] sm:$0xff]  ;;  %v2486_v36 = vld [vmem:[%s4448_s8 + $0x50] sm:$0xff] }
0x1314   :  { %3213 = vmatmul.mubr.msk.f32.vlgmr.msra.gmra.mxu1 %vm647_vm1, %v2218_v55  ;;  %v2223_v13 = vmul.f32 %v2221_v23, %v2210_v5  ;;  %v2491_v5 = vld [vmem:[%s4448_s8 + $0x78] sm:$0xff]  ;;  %v1101_v55 = vadd.f32 %v1100_v27, %v873_v46  ;;  %v2484_v23 = vld [vmem:[%s4448_s8 + $0x40] sm:$0xff] }
0x1315   :  { %3258 = vmatprep.mubr.msk.f32.mxu1 %vm3448_vm0, %v3447_v1  ;;  %3216 = vmatpush3.msra.mxu0 %v2491_v5 }
0x1316   :  { %v2225_v17 = vadd.f32 %v2224_v16, %v2223_v13  ;;  %3217 = vmatprep.subr.mxu0 %v3447_v1  ;;  %v1328_v34 = vadd.f32 %v1327_v58, %v1101_v55 }
0x1317   :  { %3218 = vmatpush3.msra.mxu0 %v2490_v32 }
0x1318   :  { %3219 = vmatprep.subr.mxu0 %v3447_v1  ;;  %v1555_v20 = vadd.f32 %v1554_v41, %v1328_v34 }
0x1319   :  { %3220 = vmatpush3.msra.mxu0 %v2489_v26 }
0x131a   :  { %3221 = vmatprep.subr.mxu0 %v3447_v1 }
0x131b   :  { %3222 = vmatpush3.msra.mxu0 %v2488_v35 }
0x131c   :  { %3223 = vmatprep.subr.mxu0 %v3447_v1 }
0x13bb   :  { %v2304_v22 = vpop.f32.mrf.mxu0 }
0x13bc   :  { %v2308_v42 = vadd.f32 %v2304_v22, %v2234_v56  ;;  %v2005_v56 = vmul.f32 %v4214_v30, %v3973_v49  ;;  %v1781_v22 = vadd.f32 %v1780_v38, %v1555_v20  ;;  %v2487_v49 = vld [vmem:[%s4448_s8 + $0x58] sm:$0xff] }
0x13bd   :  { %v3203_v0 = vpop.f32.mrf.mxu0  ;;  %v3409_v30 = vld [vmem:[%s4443_s3 + $0x1c] sm:$0xf]  ;;  %3224 = vmatpush3.msra.mxu0 %v2487_v49 }
0x13be   :  { %3380 = vtanh.f32 %v2308_v42  ;;  %v2898_v12 = vmul.f32 -1.442695, %v2308_v42  ;;  %v2006_v40 = vadd.f32 %v2005_v56, %v1781_v22  ;;  %3225 = vmatprep.subr.mxu0 %v3447_v1  ;;  %v2485_v42 = vld [vmem:[%s4448_s8 + $0x48] sm:$0xff] }
0x13bf   :  { %3226 = vmatpush3.msra.mxu0 %v2486_v36 }
0x13c0   :  { %v2231_v7 = vadd.f32 %v2230_v39, %v2006_v40  ;;  %3227 = vmatprep.subr.mxu0 %v3447_v1 }
0x13c1   :  { %3228 = vmatpush3.msra.mxu0 %v2485_v42 }
0x13c2   :  { %3229 = vmatprep.subr.mxu0 %v3447_v1 }
0x13c3   :  { %3230 = vmatpush3.msra.mxu0 %v2484_v23 }
0x13c4   :  { %3231 = vmatprep.subr.mxu0 %v3447_v1 }
0x13cb   :  { %v3381_v51 = vpop.eup %3380 }
0x13cc   :  { %2318 = vrot.lane.b32.xlu1 %v3381_v51, %s3450_s14  ;;  %v2483_v51 = vld [vmem:[%s4448_s8 + $0x38] sm:$0xff] }
0x13cd   :  { %3232 = vmatpush3.msra.mxu0 %v2483_v51 }
0x13ce   :  { %3233 = vmatprep.subr.mxu0 %v3447_v1 }
0x13d0   :  { %2415 = vrot.lane.b32.xlu1 %v2225_v17, %s3449_s18 }
0x13d4   :  { %v2402_v21 = vpop.f32.mrf.mxu1 }
0x13d5   :  { %v2406_v24 = vadd.f32 %v2402_v21, %v2235_v18  ;;  %v2482_v18 = vld [vmem:[%s4448_s8 + $0x30] sm:$0xff]  ;;  %v2481_v21 = vld [vmem:[%s4448_s8 + $0x28] sm:$0xff] }
0x13d6   :  { %v3214_v52 = vpop.f32.mrf.mxu1  ;;  %3234 = vmatpush3.msra.mxu0 %v2482_v18 }
0x13d7   :  { %3382 = vtanh.f32 %v2406_v24  ;;  %v2900_v4 = vmul.f32 -1.442695, %v2406_v24  ;;  %3235 = vmatprep.subr.mxu0 %v3447_v1  ;;  %v2480_v24 = vld [vmem:[%s4448_s8 + $0x20] sm:$0xff]  ;;  %v2479_v52 = vld [vmem:[%s4448_s8 + $0x18] sm:$0xff] }
0x13d8   :  { %3384 = vpow2.f32 %v2898_v12  ;;  %3236 = vmatpush3.msra.mxu0 %v2481_v21  ;;  %v2477_v12 = vld [vmem:[%s4448_s8 + $0x8] sm:$0xff] }
0x13d9   :  { %3237 = vmatprep.subr.mxu0 %v3447_v1 }
0x13da   :  { %3238 = vmatpush3.msra.mxu0 %v2480_v24 }
0x13db   :  { %3239 = vmatprep.subr.mxu0 %v3447_v1 }
0x13dc   :  { %3240 = vmatpush3.msra.mxu0 %v2479_v52 }
0x13dd   :  { %3241 = vmatprep.subr.mxu0 %v3447_v1 }
0x13e4   :  { %v3383_v54 = vpop.eup %3382 }
0x13e5   :  { %2420 = vrot.lane.b32.xlu0 %v3383_v54, %s3450_s14  ;;  %v3385_v9 = vpop.eup %3384  ;;  %v2478_v54 = vld [vmem:[%s4448_s8 + $0x10] sm:$0xff] }
0x13e6   :  { %v2312_v28 = vadd.f32 1.0, %v3385_v9  ;;  %3242 = vmatpush3.msra.mxu0 %v2478_v54  ;;  %v2476_v9 = vld [vmem:[%s4448_s8] sm:$0xff] }
0x13e7   :  { %3243 = vmatprep.subr.mxu0 %v3447_v1 }
0x13e8   :  { %3386 = vrcp.f32 %v2312_v28  ;;  %3244 = vmatpush3.msra.mxu0 %v2477_v12 }
0x13e9   :  { %3388 = vpow2.f32 %v2900_v4  ;;  %3245 = vmatprep.subr.mxu0 %v3447_v1 }
0x13ea   :  { %3246 = vmatpush3.msra.mxu0 %v2476_v9 }
0x13f5   :  { %v3387_v53 = vpop.eup %3386 }
0x13f6   :  { %v3389_v59 = vpop.eup %3388  ;;  %v2316_v63 = vmul.f32 %v3387_v53, %v4273_v48 }
0x13f7   :  { %v2410_v43 = vadd.f32 1.0, %v3389_v59 }
0x13f9   :  { %3390 = vrcp.f32 %v2410_v43 }
0x1406   :  { %v3391_v61 = vpop.eup %3390 }
0x143e   :  { %v2319_v19 = vpop.permute.xlu1 %2318 }
0x143f   :  { %v2321_v14 = vmul.f32 %v3387_v53, %v2319_v19  ;;  %v2571_v19 = vld [vmem:[%s4450_s10 + $0x10] sm:$0xff] }
0x1441   :  { %2323 = vrot.lane.b32.xlu0 %v2321_v14, %s3449_s18 }
0x1442   :  { %v2416_v60 = vpop.permute.xlu1 %2415 }
0x1443   :  { %v2418_v15 = vmul.f32 %v3391_v61, %v2416_v60  ;;  %v2570_v60 = vld [vmem:[%s4450_s10 + $0x8] sm:$0xff] }
0x1457   :  { %v2421_v10 = vpop.permute.xlu0 %2420 }
0x1458   :  { %v2423_v62 = vmul.f32 %v3391_v61, %v2421_v10 }
0x145a   :  { %2425 = vrot.lane.b32.xlu1 %v2423_v62, %s3449_s18 }
0x14b3   :  { %v2324_v8 = vpop.permute.xlu0 %2323 }
0x14b4   :  { %v2326_v2 = vadd.f32 %v2324_v8, %v2316_v63 }
0x14b6   :  { %3392 = vtanh.f32 %v2326_v2 }
0x14c3   :  { %v3393_v6 = vpop.eup %3392 }
0x14c4   :  { %2329 = vrot.lane.b32.xlu0 %v3393_v6, %s3450_s14 }
0x14cc   :  { %v2426_v45 = vpop.permute.xlu1 %2425 }
0x14cd   :  { %v2428_v37 = vadd.f32 %v2426_v45, %v2418_v15  ;;  %v2569_v15 = vld [vmem:[%s4450_s10] sm:$0xff] }
0x14ce   :  { %v2901_v45 = vld [vmem:[%s4449_s9] ss:$0 sm:$0xff] }
0x14cf   :  { %3394 = vtanh.f32 %v2428_v37 }
0x14dc   :  { %v3395_v47 = vpop.eup %3394 }
0x14dd   :  { %2431 = vrot.lane.b32.xlu1 %v3395_v47, %s3450_s14 }
0x1536   :  { %v2330_v44 = vpop.permute.xlu0 %2329 }
0x1537   :  { %v2332_v11 = vmul.f32 %v3387_v53, %v2330_v44  ;;  %v2572_v53 = vld [vmem:[%s4450_s10 + $0x18] sm:$0xff]  ;;  %s3452_s10 = smov [#allocation7]  }
0x1538   :  { %3251 = vmatpush3.msra.mxu1 %v2572_v53  ;;  %s2667_s2 = sshll.u32 %s3452_s10, 4  ;;  %s2668_s2 = int_to_ptr.vmem [resolvable:$true] %s2667_s2 }
0x1539   :  { %2436 = vrot.lane.b32.xlu0 %v2332_v11, %s3449_s18  ;;  %3252 = vmatprep.subr.mxu1 %v3447_v1  ;;  %v2902_v11 = vld [vmem:[%s4451_s11] ss:$0 sm:$0xff]  ;;  %s3422_s9 = scalar_lea.vmem %s2668_s2, 32  ;;  %p3427_p6 = scmp.lt.s32.totalorder %s2668_s2, %s2668_s2 }
0x153a   :  { %3253 = vmatpush3.msra.mxu1 %v2571_v19  ;;  %p3423_p5 = scmp.ne.s32.totalorder %s2668_s2, %s3422_s9  ;;  %p3428_p7 = scmp.lt.s32.totalorder %s3422_s9, %s3422_s9 }
0x153b   :  { %3254 = vmatprep.subr.mxu1 %v3447_v1 }
0x153c   :  { %3255 = vmatpush3.msra.mxu1 %v2570_v60  ;;  %p3429_p8 = por %p3428_p7, %p3427_p6 }
0x153d   :  { %3256 = vmatprep.subr.mxu1 %v3447_v1 }
0x153e   :  { %3257 = vmatpush3.msra.mxu1 %v2569_v15  ;;  %p3430_p9 = pnand %p3429_p8, %p3423_p5 }
0x154f   :  { %v2432_v50 = vpop.permute.xlu1 %2431 }
0x1550   :  { %v2434_v48 = vmul.f32 %v3391_v61, %v2432_v50 }
0x1552   :  { %2442 = vrot.lane.b32.xlu1 %v2434_v48, %s3449_s18 }
0x15ab   :  { %v2437_v3 = vpop.permute.xlu0 %2436 }
0x15ac   :  { %v2439_v31 = vmul.f32 %v3409_v30, %v2437_v3 }
0x15ae   :  { %v2440_v57 = vadd.f32 %v2439_v31, %v2231_v7 }
0x15b0   :  { %v2448_v0 = vrot.slane %v2440_v57, 2 }
0x15b2   :  { %v2455_v13 = vsub.f32 %v2440_v57, %v2448_v0  ;;  %v2450_v16 = vadd.f32 %v2448_v0, %v2440_v57 }
0x15b4   :  { %v2456_v17 = vmul.f32 %v2455_v13, %v2455_v13 }
0x15b6   :  { %2464 = vrot.lane.b32.xlu1 %v2456_v17, %s3450_s14 }
0x15c4   :  { %v2443_v28 = vpop.permute.xlu1 %2442 }
0x15c5   :  { %v2445_v4 = vmul.f32 %v2443_v28, %v4333_v25 }
0x15c7   :  { %v2446_v14 = vadd.f32 %v2445_v4, %v4298_v33 }
0x15c9   :  { %v2452_v59 = vrot.slane %v2446_v14, 2 }
0x15cb   :  { %v2454_v43 = vadd.f32 %v2452_v59, %v2446_v14  ;;  %v2457_v61 = vsub.f32 %v2446_v14, %v2452_v59 }
0x15cd   :  { %2460 = vrot.lane.b32.xlu0 %v2454_v43, %s3449_s18  ;;  %v2458_v10 = vmul.f32 %v2457_v61, %v2457_v61 }
0x15d1   :  { %2468 = vrot.lane.b32.xlu0 %v2458_v10, %s3451_s24 }
0x1628   :  { %v2465_v8 = vpop.permute.xlu1 %2464 }
0x163f   :  { %v2461_v62 = vpop.permute.xlu0 %2460 }
0x1640   :  { %v2471_v63 = vsel %vm647_vm1, %v2450_v16, %v2461_v62 }
0x1641   :  { %v2473_v2 = vsel %vm2472_vm2, %v2471_v63, %v2465_v8 }
0x1643   :  { %v2469_v33 = vpop.permute.xlu0 %2468 }
0x1644   :  { %v2475_v6 = vsel %vm2474_vm3, %v2473_v2, %v2469_v33 }
0x1645   :  { %3248 = vmatmul.mubr.f32.vlgmr.msra.gmra.mxu0 %v2475_v6 }
0x1705   :  { %v2565_v37 = vpop.f32.mrf.mxu0 }
0x1706   :  { %v2566_v47 = vadd.f32 %v2901_v45, %v2565_v37 }
0x1707   :  { %v3249_v44 = vpop.f32.mrf.mxu0 }
0x1708   :  { %3259 = vmatmul.mubr.msk.f32.vlgmr.msra.gmra.mxu1 %vm647_vm1, %v2566_v47 }
0x17c8   :  { %v2649_v50 = vpop.f32.mrf.mxu1 }
0x17c9   :  { %v2650_v1 = vadd.f32 %v2902_v11, %v2649_v50 }
0x17ca   :  { %v3260_v48 = vpop.f32.mrf.mxu1 }
0x17cb   :  { %v2904_v5 = vmul.f32 -1.442695, %v2650_v1 }
0x17cd   :  { %3396 = vpow2.f32 %v2904_v5 }
0x17da   :  { %v3397_v32 = vpop.eup %3396 }
0x17db   :  { %v2656_v25 = vadd.f32 1.0, %v3397_v32 }
0x17dd   :  { %3398 = vrcp.f32 %v2656_v25 }
0x17ea   :  { %v3399_v27 = vpop.eup %3398 }
0x17eb   :  { %2660 = vst.msk [vmem:[#allocation7] sm:$0x3] %vm2659_vm4, %v3399_v27 }
0x17ec   :  { %3433 = shalt.err (!%p3430_p9)
}
0x17ed   :  { %2670 = dma.vmem_to_hbm [thread:$0]  %s2668_s2, 32, %s4452_s12, [#allocation5]  }
0x17ee   :  { %3444 = dma.done.wait [#allocation5], 32  }
0x17ef   :  { %3445 = vsyncadd [#allocation5], 4294967264 }
0x17f0   :  { %2674 = vsyncpa [#allocation5], 1 }
0x17f1   :  { %2675 = vsyncpa [#allocation6], 1 }

</bundles_post_ra>
